<compile_context>
chip_gen: v6e
topology: v6e:2x2x1
jax: 0.10.0
libtpu: 0.0.40
codegen_flags: <defaults>
</compile_context>

<pallas_src>
import math
from functools import partial

import numpy as np
import jax
import jax.numpy as jnp
from jax.experimental import pallas as pl
from jax.experimental.pallas import tpu as pltpu

# Module-consistent sizes (hidden_dim / output_dim from the PyTorch file).
INPUT_DIM = 4
HIDDEN_DIM = 10
OUTPUT_DIM = 1
LAYERS = 2
BATCH = 2
SEQ = 8

GP = 128  # gate pitch: each of the 4 gates gets its own lane-aligned 128-lane block
# TODO(synk): a 32-lane gate pitch (weights (128,128), gate extraction via
# pltpu.roll + lane masks) would cut weight bytes 4x and MXU column passes 2-4x
# further; kept at 128 here for simplicity / padding-invariant robustness.


def _lstm_fc_kernel(num_layers, seq_len, batch, *refs):
    """Wavefront multi-layer LSTM recurrence + final Linear in one program.

    refs = [x_ref (T*B, 128) f32]
           + layer 0:        [wih0 (128, 512) bf16, whh0 (128, 512) bf16, b0 (1, 512) f32]
           + layers 1..L-1:  [wstack_l (256, 512) bf16, b_l (1, 512) f32]   (wstack = [wih; whh])
           + [fcw (1, 128) f32, fcb (1, 1) f32]
           + [out_ref (B, 1) f32]
           + [xp_ref (T*B, 512) f32 VMEM scratch]   (layer-0 input projection)

    Gate packing invariant: gate g lives in lanes [128g, 128g+H); all padding
    weight columns / bias lanes are exactly zero (bf16 cast preserves zeros),
    so padding lanes of h and c stay exactly 0 across timesteps and never leak
    into the matmuls or the final reduction.
    """
    B, T = batch, seq_len
    x_ref = refs[0]
    wih0_ref, whh0_ref, b0_ref = refs[1], refs[2], refs[3]
    deep_refs = refs[4:4 + 2 * (num_layers - 1)]
    fcw_ref = refs[4 + 2 * (num_layers - 1)]
    fcb_ref = refs[5 + 2 * (num_layers - 1)]
    out_ref = refs[6 + 2 * (num_layers - 1)]
    xp_ref = refs[7 + 2 * (num_layers - 1)]

    # Hoisted layer-0 input projection (+ fused bias) for ALL timesteps: one
    # well-shaped bf16 matmul, staged to VMEM so per-step slabs are cheap
    # off-chain loads rather than live vregs / sublane extracts.
    xp_ref[...] = jnp.dot(x_ref[...].astype(jnp.bfloat16), wih0_ref[...],
                          preferred_element_type=jnp.float32) + b0_ref[...]

    whh0 = whh0_ref[...]                                       # (128, 512) bf16
    wstk = [deep_refs[2 * i][...] for i in range(num_layers - 1)]      # (256, 512) bf16
    bstk = [deep_refs[2 * i + 1][...] for i in range(num_layers - 1)]  # (1, 512) f32

    def gate_update(gates, c):
        # PyTorch gate order i, f, g, o; each slice is a whole 128-lane block.
        i_g = jax.nn.sigmoid(gates[:, 0 * GP:1 * GP])
        f_g = jax.nn.sigmoid(gates[:, 1 * GP:2 * GP])
        g_g = jnp.tanh(gates[:, 2 * GP:3 * GP])
        o_g = jax.nn.sigmoid(gates[:, 3 * GP:4 * GP])
        c_new = f_g * c + i_g * g_g
        h_new = o_g * jnp.tanh(c_new)
        return h_new, c_new

    h = [jnp.zeros((B, GP), jnp.float32) for _ in range(num_layers)]
    c = [jnp.zeros((B, GP), jnp.float32) for _ in range(num_layers)]

    # Wavefront: at wave s, layer l runs its timestep t = s - l.  Layer l>0
    # consumes layer l-1's output produced in the PREVIOUS wave (h_snap), so
    # all per-wave updates are mutually independent and can overlap.
    for s in range(T + num_layers - 1):
        h_snap = list(h)
        for l in range(num_layers):
            t = s - l
            if not (0 <= t < T):
                continue
            if l == 0:
                gates = xp_ref[t * B:(t + 1) * B, :] + jnp.dot(
                    h[0].astype(jnp.bfloat16), whh0,
                    preferred_element_type=jnp.float32)
            else:
                # Fused K=256 matmul: [x_l ; h_l] @ [wih_l ; whh_l] + b_l.
                xk = jnp.concatenate([h_snap[l - 1], h[l]],
                                     axis=-1).astype(jnp.bfloat16)     # (B, 256)
                gates = jnp.dot(xk, wstk[l - 1],
                                preferred_element_type=jnp.float32) + bstk[l - 1]
            h[l], c[l] = gate_update(gates, c[l])

    # fc(x[:, -1]) with OUTPUT_DIM == 1: VPU multiply + lane reduction instead
    # of an MXU round-trip for 20 MACs.  Padding lanes are zero on both sides.
    out = jnp.sum(h[num_layers - 1] * fcw_ref[...], axis=-1, keepdims=True) + fcb_ref[...]
    out_ref[...] = out.astype(out_ref.dtype)


def pack_params(params):
    """One-time, host-side packing into the kernel's lane-packed bf16 layout.

    Done with numpy outside the per-call path so the forward dispatch is just
    the pallas_call (per-call weight re-packing previously cost more than the
    kernel itself).
    """
    H = HIDDEN_DIM
    packed = []
    for l, (w_ih, w_hh, b_ih, b_hh) in enumerate(params["lstm"]):
        d_in = INPUT_DIM if l == 0 else HIDDEN_DIM
        wih_t = np.asarray(w_ih, np.float32).T          # (d_in, 4H)
        whh_t = np.asarray(w_hh, np.float32).T          # (H, 4H)
        bias = np.asarray(b_ih, np.float32) + np.asarray(b_hh, np.float32)
        wih_p = np.zeros((GP, 4 * GP), np.float32)
        whh_p = np.zeros((GP, 4 * GP), np.float32)
        b_p = np.zeros((1, 4 * GP), np.float32)
        for g in range(4):
            wih_p[:d_in, g * GP:g * GP + H] = wih_t[:, g * H:(g + 1) * H]
            whh_p[:H, g * GP:g * GP + H] = whh_t[:, g * H:(g + 1) * H]
            b_p[0, g * GP:g * GP + H] = bias[g * H:(g + 1) * H]
        if l == 0:
            packed += [jnp.asarray(wih_p, jnp.bfloat16),
                       jnp.asarray(whh_p, jnp.bfloat16),
                       jnp.asarray(b_p, jnp.float32)]
        else:
            # Stacked [wih ; whh] for the fused K=256 per-step matmul.
            wstack = np.concatenate([wih_p, whh_p], axis=0)       # (256, 512)
            packed += [jnp.asarray(wstack, jnp.bfloat16),
                       jnp.asarray(b_p, jnp.float32)]
    fcw_p = np.zeros((1, GP), np.float32)
    fcw_p[0, :H] = np.asarray(params["fc_w"], np.float32)[0, :]
    fcb_p = np.asarray(params["fc_b"], np.float32).reshape(1, OUTPUT_DIM)
    packed += [jnp.asarray(fcw_p, jnp.float32), jnp.asarray(fcb_p, jnp.float32)]
    return packed


@jax.jit
def net_forward(x, packed):
    """x: (B, T, input_dim) float32 (batch_first, like the PyTorch module)."""
    B, T, D = x.shape

    # Time-major, flattened to (T*B, GP) with zero lane padding (D -> GP).
    x_tm = jnp.transpose(x, (1, 0, 2)).astype(jnp.float32).reshape(T * B, D)
    x_pad = jnp.pad(x_tm, ((0, 0), (0, GP - D)))

    flat = [x_pad] + list(packed)
    kernel = partial(_lstm_fc_kernel, LAYERS, T, B)
    in_specs = [pl.BlockSpec(memory_space=pltpu.MemorySpace.VMEM) for _ in flat]
    out_spec = pl.BlockSpec(memory_space=pltpu.MemorySpace.VMEM)

    # Single program, no grid: total resident footprint is well under VMEM on
    # v5e/v6e/v7x, the kernel is latency-bound, and splitting B=2 across cores
    # would only duplicate the weight DMA (per review, deliberately NOT done).
    return pl.pallas_call(
        kernel,
        out_shape=jax.ShapeDtypeStruct((B, OUTPUT_DIM), jnp.float32),
        in_specs=in_specs,
        out_specs=out_spec,
        scratch_shapes=[pltpu.VMEM((T * B, 4 * GP), jnp.float32)],
    )(*flat)


def init_params(key, input_dim, hidden_dim, output_dim, layers):
    """Deterministic synthetic params, matching PyTorch LSTM/Linear shapes."""
    stdv = 1.0 / math.sqrt(hidden_dim)
    params = {"lstm": []}
    keys = jax.random.split(key, 4 * layers + 2)
    for l in range(layers):
        d_in = input_dim if l == 0 else hidden_dim
        k0, k1, k2, k3 = keys[4 * l:4 * l + 4]
        w_ih = jax.random.uniform(k0, (4 * hidden_dim, d_in), jnp.float32, -stdv, stdv)
        w_hh = jax.random.uniform(k1, (4 * hidden_dim, hidden_dim), jnp.float32, -stdv, stdv)
        b_ih = jax.random.uniform(k2, (4 * hidden_dim,), jnp.float32, -stdv, stdv)
        b_hh = jax.random.uniform(k3, (4 * hidden_dim,), jnp.float32, -stdv, stdv)
        params["lstm"].append((w_ih, w_hh, b_ih, b_hh))
    kf_w, kf_b = keys[4 * layers], keys[4 * layers + 1]
    params["fc_w"] = jax.random.uniform(kf_w, (output_dim, hidden_dim), jnp.float32,
                                        -stdv, stdv)
    params["fc_b"] = jax.random.uniform(kf_b, (output_dim,), jnp.float32, -stdv, stdv)
    return params


def _reference_forward(x, params):
    """Pure-JAX f32 reference of the PyTorch semantics (for a sanity check)."""
    H = HIDDEN_DIM
    B = x.shape[0]
    seq = x
    for (w_ih, w_hh, b_ih, b_hh) in params["lstm"]:
        h = jnp.zeros((B, H), jnp.float32)
        c = jnp.zeros((B, H), jnp.float32)
        outs = []
        for t in range(seq.shape[1]):
            g = seq[:, t, :] @ w_ih.T + b_ih + h @ w_hh.T + b_hh
            i_g = jax.nn.sigmoid(g[:, 0:H])
            f_g = jax.nn.sigmoid(g[:, H:2 * H])
            g_g = jnp.tanh(g[:, 2 * H:3 * H])
            o_g = jax.nn.sigmoid(g[:, 3 * H:4 * H])
            c = f_g * c + i_g * g_g
            h = o_g * jnp.tanh(c)
            outs.append(h)
        seq = jnp.stack(outs, axis=1)
    return seq[:, -1] @ params["fc_w"].T + params["fc_b"]


if __name__ == "__main__":
    key = jax.random.PRNGKey(0)
    kx, kp = jax.random.split(key)
    x = jax.random.normal(kx, (BATCH, SEQ, INPUT_DIM), jnp.float32)
    params = init_params(kp, INPUT_DIM, HIDDEN_DIM, OUTPUT_DIM, LAYERS)

    packed = pack_params(params)          # one-time, outside the per-call path

    out = net_forward(x, packed)
    out = jax.block_until_ready(out)

    ref = _reference_forward(x, params)
    assert out.shape == (BATCH, OUTPUT_DIM)
    # Tolerance accounts for bf16 weight / matmul-LHS rounding (review change);
    # h/c state and accumulation remain f32, so drift stays well inside this.
    assert jnp.allclose(out, ref, atol=2e-2, rtol=2e-2), (out, ref)

    print("KERNEL_OK")
</pallas_src>

<mosaic_0001>
module attributes {stable_mosaic.version = 11 : i64} {
  func.func @_lstm_fc_kernel(%arg0: memref<16x128xf32, #tpu.memory_space<vmem>>, %arg1: memref<128x512xbf16, #tpu.memory_space<vmem>>, %arg2: memref<128x512xbf16, #tpu.memory_space<vmem>>, %arg3: memref<1x512xf32, #tpu.memory_space<vmem>>, %arg4: memref<256x512xbf16, #tpu.memory_space<vmem>>, %arg5: memref<1x512xf32, #tpu.memory_space<vmem>>, %arg6: memref<1x128xf32, #tpu.memory_space<vmem>>, %arg7: memref<1x1xf32, #tpu.memory_space<vmem>>, %arg8: memref<2x1xf32, #tpu.memory_space<vmem>>, %arg9: memref<16x512xf32, #tpu.memory_space<vmem>>) attributes {dimension_semantics = [], scalar_prefetch = 0 : i64, scratch_operands = 1 : i64, tpu.core_type = #tpu.core_type<tc>} {
    %c0 = arith.constant 0 : index
    %c0_0 = arith.constant 0 : index
    %0 = vector.load %arg0[%c0, %c0_0] : memref<16x128xf32, #tpu.memory_space<vmem>>, vector<16x128xf32>
    %1 = arith.truncf %0 : vector<16x128xf32> to vector<16x128xbf16>
    %c0_1 = arith.constant 0 : index
    %c0_2 = arith.constant 0 : index
    %2 = vector.load %arg1[%c0_1, %c0_2] : memref<128x512xbf16, #tpu.memory_space<vmem>>, vector<128x512xbf16>
    %cst = arith.constant dense<0.000000e+00> : vector<16x512xf32>
    %3 = tpu.matmul %1, %2, %cst {dimension_numbers = #tpu.dot_dimension_numbers<[1], [0], [0], [1], [0, 0, 1, 1], [], []>} : vector<16x128xbf16>, vector<128x512xbf16>, vector<16x512xf32> -> vector<16x512xf32>
    %c0_3 = arith.constant 0 : index
    %c0_4 = arith.constant 0 : index
    %4 = vector.load %arg3[%c0_3, %c0_4] : memref<1x512xf32, #tpu.memory_space<vmem>>, vector<1x512xf32>
    %5 = vector.broadcast %4 : vector<1x512xf32> to vector<16x512xf32>
    %6 = arith.addf %3, %5 : vector<16x512xf32>
    %c0_5 = arith.constant 0 : index
    %c0_6 = arith.constant 0 : index
    %7 = vector.load %arg9[%c0_5, %c0_6] : memref<16x512xf32, #tpu.memory_space<vmem>>, vector<16x512xf32>
    tpu.vector_store %arg9[%c0_5, %c0_6], %6 {strides = array<i32>} : memref<16x512xf32, #tpu.memory_space<vmem>>, vector<16x512xf32>,
    %c0_7 = arith.constant 0 : index
    %c0_8 = arith.constant 0 : index
    %8 = vector.load %arg2[%c0_7, %c0_8] : memref<128x512xbf16, #tpu.memory_space<vmem>>, vector<128x512xbf16>
    %c0_9 = arith.constant 0 : index
    %c0_10 = arith.constant 0 : index
    %9 = vector.load %arg4[%c0_9, %c0_10] : memref<256x512xbf16, #tpu.memory_space<vmem>>, vector<256x512xbf16>
    %c0_11 = arith.constant 0 : index
    %c0_12 = arith.constant 0 : index
    %10 = vector.load %arg5[%c0_11, %c0_12] : memref<1x512xf32, #tpu.memory_space<vmem>>, vector<1x512xf32>
    %cst_13 = arith.constant 0.000000e+00 : f32
    %11 = vector.broadcast %cst_13 : f32 to vector<2x128xf32>
    %cst_14 = arith.constant 0.000000e+00 : f32
    %12 = vector.broadcast %cst_14 : f32 to vector<2x128xf32>
    %cst_15 = arith.constant 0.000000e+00 : f32
    %13 = vector.broadcast %cst_15 : f32 to vector<2x128xf32>
    %cst_16 = arith.constant 0.000000e+00 : f32
    %14 = vector.broadcast %cst_16 : f32 to vector<2x128xf32>
    %c0_17 = arith.constant 0 : index
    %c0_18 = arith.constant 0 : index
    %15 = vector.load %arg9[%c0_17, %c0_18] : memref<16x512xf32, #tpu.memory_space<vmem>>, vector<2x512xf32>
    %16 = arith.truncf %11 : vector<2x128xf32> to vector<2x128xbf16>
    %cst_19 = arith.constant dense<0.000000e+00> : vector<2x512xf32>
    %17 = tpu.matmul %16, %8, %cst_19 {dimension_numbers = #tpu.dot_dimension_numbers<[1], [0], [0], [1], [0, 0, 1, 1], [], []>} : vector<2x128xbf16>, vector<128x512xbf16>, vector<2x512xf32> -> vector<2x512xf32>
    %18 = arith.addf %15, %17 : vector<2x512xf32>
    %19 = vector.extract_strided_slice %18 {offsets = [0, 0], sizes = [2, 128], strides = [1, 1]} : vector<2x512xf32> to vector<2x128xf32>
    %20 = arith.negf %19 : vector<2x128xf32>
    %21 = math.exp %20 : vector<2x128xf32>
    %cst_20 = arith.constant 1.000000e+00 : f32
    %22 = vector.broadcast %cst_20 : f32 to vector<2x128xf32>
    %23 = arith.addf %22, %21 : vector<2x128xf32>
    %24 = arith.divf %22, %23 : vector<2x128xf32>
    %25 = vector.extract_strided_slice %18 {offsets = [0, 128], sizes = [2, 128], strides = [1, 1]} : vector<2x512xf32> to vector<2x128xf32>
    %26 = arith.negf %25 : vector<2x128xf32>
    %27 = math.exp %26 : vector<2x128xf32>
    %cst_21 = arith.constant 1.000000e+00 : f32
    %28 = vector.broadcast %cst_21 : f32 to vector<2x128xf32>
    %29 = arith.addf %28, %27 : vector<2x128xf32>
    %30 = arith.divf %28, %29 : vector<2x128xf32>
    %31 = vector.extract_strided_slice %18 {offsets = [0, 256], sizes = [2, 128], strides = [1, 1]} : vector<2x512xf32> to vector<2x128xf32>
    %32 = math.tanh %31 : vector<2x128xf32>
    %33 = vector.extract_strided_slice %18 {offsets = [0, 384], sizes = [2, 128], strides = [1, 1]} : vector<2x512xf32> to vector<2x128xf32>
    %34 = arith.negf %33 : vector<2x128xf32>
    %35 = math.exp %34 : vector<2x128xf32>
    %cst_22 = arith.constant 1.000000e+00 : f32
    %36 = vector.broadcast %cst_22 : f32 to vector<2x128xf32>
    %37 = arith.addf %36, %35 : vector<2x128xf32>
    %38 = arith.divf %36, %37 : vector<2x128xf32>
    %39 = arith.mulf %30, %13 : vector<2x128xf32>
    %40 = arith.mulf %24, %32 : vector<2x128xf32>
    %41 = arith.addf %39, %40 : vector<2x128xf32>
    %42 = math.tanh %41 : vector<2x128xf32>
    %43 = arith.mulf %38, %42 : vector<2x128xf32>
    %c2 = arith.constant 2 : index
    %c0_23 = arith.constant 0 : index
    %44 = vector.load %arg9[%c2, %c0_23] : memref<16x512xf32, #tpu.memory_space<vmem>>, vector<2x512xf32>
    %45 = arith.truncf %43 : vector<2x128xf32> to vector<2x128xbf16>
    %cst_24 = arith.constant dense<0.000000e+00> : vector<2x512xf32>
    %46 = tpu.matmul %45, %8, %cst_24 {dimension_numbers = #tpu.dot_dimension_numbers<[1], [0], [0], [1], [0, 0, 1, 1], [], []>} : vector<2x128xbf16>, vector<128x512xbf16>, vector<2x512xf32> -> vector<2x512xf32>
    %47 = arith.addf %44, %46 : vector<2x512xf32>
    %48 = vector.extract_strided_slice %47 {offsets = [0, 0], sizes = [2, 128], strides = [1, 1]} : vector<2x512xf32> to vector<2x128xf32>
    %49 = arith.negf %48 : vector<2x128xf32>
    %50 = math.exp %49 : vector<2x128xf32>
    %cst_25 = arith.constant 1.000000e+00 : f32
    %51 = vector.broadcast %cst_25 : f32 to vector<2x128xf32>
    %52 = arith.addf %51, %50 : vector<2x128xf32>
    %53 = arith.divf %51, %52 : vector<2x128xf32>
    %54 = vector.extract_strided_slice %47 {offsets = [0, 128], sizes = [2, 128], strides = [1, 1]} : vector<2x512xf32> to vector<2x128xf32>
    %55 = arith.negf %54 : vector<2x128xf32>
    %56 = math.exp %55 : vector<2x128xf32>
    %cst_26 = arith.constant 1.000000e+00 : f32
    %57 = vector.broadcast %cst_26 : f32 to vector<2x128xf32>
    %58 = arith.addf %57, %56 : vector<2x128xf32>
    %59 = arith.divf %57, %58 : vector<2x128xf32>
    %60 = vector.extract_strided_slice %47 {offsets = [0, 256], sizes = [2, 128], strides = [1, 1]} : vector<2x512xf32> to vector<2x128xf32>
    %61 = math.tanh %60 : vector<2x128xf32>
    %62 = vector.extract_strided_slice %47 {offsets = [0, 384], sizes = [2, 128], strides = [1, 1]} : vector<2x512xf32> to vector<2x128xf32>
    %63 = arith.negf %62 : vector<2x128xf32>
    %64 = math.exp %63 : vector<2x128xf32>
    %cst_27 = arith.constant 1.000000e+00 : f32
    %65 = vector.broadcast %cst_27 : f32 to vector<2x128xf32>
    %66 = arith.addf %65, %64 : vector<2x128xf32>
    %67 = arith.divf %65, %66 : vector<2x128xf32>
    %68 = arith.mulf %59, %41 : vector<2x128xf32>
    %69 = arith.mulf %53, %61 : vector<2x128xf32>
    %70 = arith.addf %68, %69 : vector<2x128xf32>
    %71 = math.tanh %70 : vector<2x128xf32>
    %72 = arith.mulf %67, %71 : vector<2x128xf32>
    %73 = tpu.concatenate %43, %12 in 1 : vector<2x128xf32>, vector<2x128xf32> -> vector<2x256xf32>
    %74 = arith.truncf %73 : vector<2x256xf32> to vector<2x256xbf16>
    %cst_28 = arith.constant dense<0.000000e+00> : vector<2x512xf32>
    %75 = tpu.matmul %74, %9, %cst_28 {dimension_numbers = #tpu.dot_dimension_numbers<[1], [0], [0], [1], [0, 0, 1, 1], [], []>} : vector<2x256xbf16>, vector<256x512xbf16>, vector<2x512xf32> -> vector<2x512xf32>
    %76 = vector.broadcast %10 : vector<1x512xf32> to vector<2x512xf32>
    %77 = arith.addf %75, %76 : vector<2x512xf32>
    %78 = vector.extract_strided_slice %77 {offsets = [0, 0], sizes = [2, 128], strides = [1, 1]} : vector<2x512xf32> to vector<2x128xf32>
    %79 = arith.negf %78 : vector<2x128xf32>
    %80 = math.exp %79 : vector<2x128xf32>
    %cst_29 = arith.constant 1.000000e+00 : f32
    %81 = vector.broadcast %cst_29 : f32 to vector<2x128xf32>
    %82 = arith.addf %81, %80 : vector<2x128xf32>
    %83 = arith.divf %81, %82 : vector<2x128xf32>
    %84 = vector.extract_strided_slice %77 {offsets = [0, 128], sizes = [2, 128], strides = [1, 1]} : vector<2x512xf32> to vector<2x128xf32>
    %85 = arith.negf %84 : vector<2x128xf32>
    %86 = math.exp %85 : vector<2x128xf32>
    %cst_30 = arith.constant 1.000000e+00 : f32
    %87 = vector.broadcast %cst_30 : f32 to vector<2x128xf32>
    %88 = arith.addf %87, %86 : vector<2x128xf32>
    %89 = arith.divf %87, %88 : vector<2x128xf32>
    %90 = vector.extract_strided_slice %77 {offsets = [0, 256], sizes = [2, 128], strides = [1, 1]} : vector<2x512xf32> to vector<2x128xf32>
    %91 = math.tanh %90 : vector<2x128xf32>
    %92 = vector.extract_strided_slice %77 {offsets = [0, 384], sizes = [2, 128], strides = [1, 1]} : vector<2x512xf32> to vector<2x128xf32>
    %93 = arith.negf %92 : vector<2x128xf32>
    %94 = math.exp %93 : vector<2x128xf32>
    %cst_31 = arith.constant 1.000000e+00 : f32
    %95 = vector.broadcast %cst_31 : f32 to vector<2x128xf32>
    %96 = arith.addf %95, %94 : vector<2x128xf32>
    %97 = arith.divf %95, %96 : vector<2x128xf32>
    %98 = arith.mulf %89, %14 : vector<2x128xf32>
    %99 = arith.mulf %83, %91 : vector<2x128xf32>
    %100 = arith.addf %98, %99 : vector<2x128xf32>
    %101 = math.tanh %100 : vector<2x128xf32>
    %102 = arith.mulf %97, %101 : vector<2x128xf32>
    %c4 = arith.constant 4 : index
    %c0_32 = arith.constant 0 : index
    %103 = vector.load %arg9[%c4, %c0_32] : memref<16x512xf32, #tpu.memory_space<vmem>>, vector<2x512xf32>
    %104 = arith.truncf %72 : vector<2x128xf32> to vector<2x128xbf16>
    %cst_33 = arith.constant dense<0.000000e+00> : vector<2x512xf32>
    %105 = tpu.matmul %104, %8, %cst_33 {dimension_numbers = #tpu.dot_dimension_numbers<[1], [0], [0], [1], [0, 0, 1, 1], [], []>} : vector<2x128xbf16>, vector<128x512xbf16>, vector<2x512xf32> -> vector<2x512xf32>
    %106 = arith.addf %103, %105 : vector<2x512xf32>
    %107 = vector.extract_strided_slice %106 {offsets = [0, 0], sizes = [2, 128], strides = [1, 1]} : vector<2x512xf32> to vector<2x128xf32>
    %108 = arith.negf %107 : vector<2x128xf32>
    %109 = math.exp %108 : vector<2x128xf32>
    %cst_34 = arith.constant 1.000000e+00 : f32
    %110 = vector.broadcast %cst_34 : f32 to vector<2x128xf32>
    %111 = arith.addf %110, %109 : vector<2x128xf32>
    %112 = arith.divf %110, %111 : vector<2x128xf32>
    %113 = vector.extract_strided_slice %106 {offsets = [0, 128], sizes = [2, 128], strides = [1, 1]} : vector<2x512xf32> to vector<2x128xf32>
    %114 = arith.negf %113 : vector<2x128xf32>
    %115 = math.exp %114 : vector<2x128xf32>
    %cst_35 = arith.constant 1.000000e+00 : f32
    %116 = vector.broadcast %cst_35 : f32 to vector<2x128xf32>
    %117 = arith.addf %116, %115 : vector<2x128xf32>
    %118 = arith.divf %116, %117 : vector<2x128xf32>
    %119 = vector.extract_strided_slice %106 {offsets = [0, 256], sizes = [2, 128], strides = [1, 1]} : vector<2x512xf32> to vector<2x128xf32>
    %120 = math.tanh %119 : vector<2x128xf32>
    %121 = vector.extract_strided_slice %106 {offsets = [0, 384], sizes = [2, 128], strides = [1, 1]} : vector<2x512xf32> to vector<2x128xf32>
    %122 = arith.negf %121 : vector<2x128xf32>
    %123 = math.exp %122 : vector<2x128xf32>
    %cst_36 = arith.constant 1.000000e+00 : f32
    %124 = vector.broadcast %cst_36 : f32 to vector<2x128xf32>
    %125 = arith.addf %124, %123 : vector<2x128xf32>
    %126 = arith.divf %124, %125 : vector<2x128xf32>
    %127 = arith.mulf %118, %70 : vector<2x128xf32>
    %128 = arith.mulf %112, %120 : vector<2x128xf32>
    %129 = arith.addf %127, %128 : vector<2x128xf32>
    %130 = math.tanh %129 : vector<2x128xf32>
    %131 = arith.mulf %126, %130 : vector<2x128xf32>
    %132 = tpu.concatenate %72, %102 in 1 : vector<2x128xf32>, vector<2x128xf32> -> vector<2x256xf32>
    %133 = arith.truncf %132 : vector<2x256xf32> to vector<2x256xbf16>
    %cst_37 = arith.constant dense<0.000000e+00> : vector<2x512xf32>
    %134 = tpu.matmul %133, %9, %cst_37 {dimension_numbers = #tpu.dot_dimension_numbers<[1], [0], [0], [1], [0, 0, 1, 1], [], []>} : vector<2x256xbf16>, vector<256x512xbf16>, vector<2x512xf32> -> vector<2x512xf32>
    %135 = vector.broadcast %10 : vector<1x512xf32> to vector<2x512xf32>
    %136 = arith.addf %134, %135 : vector<2x512xf32>
    %137 = vector.extract_strided_slice %136 {offsets = [0, 0], sizes = [2, 128], strides = [1, 1]} : vector<2x512xf32> to vector<2x128xf32>
    %138 = arith.negf %137 : vector<2x128xf32>
    %139 = math.exp %138 : vector<2x128xf32>
    %cst_38 = arith.constant 1.000000e+00 : f32
    %140 = vector.broadcast %cst_38 : f32 to vector<2x128xf32>
    %141 = arith.addf %140, %139 : vector<2x128xf32>
    %142 = arith.divf %140, %141 : vector<2x128xf32>
    %143 = vector.extract_strided_slice %136 {offsets = [0, 128], sizes = [2, 128], strides = [1, 1]} : vector<2x512xf32> to vector<2x128xf32>
    %144 = arith.negf %143 : vector<2x128xf32>
    %145 = math.exp %144 : vector<2x128xf32>
    %cst_39 = arith.constant 1.000000e+00 : f32
    %146 = vector.broadcast %cst_39 : f32 to vector<2x128xf32>
    %147 = arith.addf %146, %145 : vector<2x128xf32>
    %148 = arith.divf %146, %147 : vector<2x128xf32>
    %149 = vector.extract_strided_slice %136 {offsets = [0, 256], sizes = [2, 128], strides = [1, 1]} : vector<2x512xf32> to vector<2x128xf32>
    %150 = math.tanh %149 : vector<2x128xf32>
    %151 = vector.extract_strided_slice %136 {offsets = [0, 384], sizes = [2, 128], strides = [1, 1]} : vector<2x512xf32> to vector<2x128xf32>
    %152 = arith.negf %151 : vector<2x128xf32>
    %153 = math.exp %152 : vector<2x128xf32>
    %cst_40 = arith.constant 1.000000e+00 : f32
    %154 = vector.broadcast %cst_40 : f32 to vector<2x128xf32>
    %155 = arith.addf %154, %153 : vector<2x128xf32>
    %156 = arith.divf %154, %155 : vector<2x128xf32>
    %157 = arith.mulf %148, %100 : vector<2x128xf32>
    %158 = arith.mulf %142, %150 : vector<2x128xf32>
    %159 = arith.addf %157, %158 : vector<2x128xf32>
    %160 = math.tanh %159 : vector<2x128xf32>
    %161 = arith.mulf %156, %160 : vector<2x128xf32>
    %c6 = arith.constant 6 : index
    %c0_41 = arith.constant 0 : index
    %162 = vector.load %arg9[%c6, %c0_41] : memref<16x512xf32, #tpu.memory_space<vmem>>, vector<2x512xf32>
    %163 = arith.truncf %131 : vector<2x128xf32> to vector<2x128xbf16>
    %cst_42 = arith.constant dense<0.000000e+00> : vector<2x512xf32>
    %164 = tpu.matmul %163, %8, %cst_42 {dimension_numbers = #tpu.dot_dimension_numbers<[1], [0], [0], [1], [0, 0, 1, 1], [], []>} : vector<2x128xbf16>, vector<128x512xbf16>, vector<2x512xf32> -> vector<2x512xf32>
    %165 = arith.addf %162, %164 : vector<2x512xf32>
    %166 = vector.extract_strided_slice %165 {offsets = [0, 0], sizes = [2, 128], strides = [1, 1]} : vector<2x512xf32> to vector<2x128xf32>
    %167 = arith.negf %166 : vector<2x128xf32>
    %168 = math.exp %167 : vector<2x128xf32>
    %cst_43 = arith.constant 1.000000e+00 : f32
    %169 = vector.broadcast %cst_43 : f32 to vector<2x128xf32>
    %170 = arith.addf %169, %168 : vector<2x128xf32>
    %171 = arith.divf %169, %170 : vector<2x128xf32>
    %172 = vector.extract_strided_slice %165 {offsets = [0, 128], sizes = [2, 128], strides = [1, 1]} : vector<2x512xf32> to vector<2x128xf32>
    %173 = arith.negf %172 : vector<2x128xf32>
    %174 = math.exp %173 : vector<2x128xf32>
    %cst_44 = arith.constant 1.000000e+00 : f32
    %175 = vector.broadcast %cst_44 : f32 to vector<2x128xf32>
    %176 = arith.addf %175, %174 : vector<2x128xf32>
    %177 = arith.divf %175, %176 : vector<2x128xf32>
    %178 = vector.extract_strided_slice %165 {offsets = [0, 256], sizes = [2, 128], strides = [1, 1]} : vector<2x512xf32> to vector<2x128xf32>
    %179 = math.tanh %178 : vector<2x128xf32>
    %180 = vector.extract_strided_slice %165 {offsets = [0, 384], sizes = [2, 128], strides = [1, 1]} : vector<2x512xf32> to vector<2x128xf32>
    %181 = arith.negf %180 : vector<2x128xf32>
    %182 = math.exp %181 : vector<2x128xf32>
    %cst_45 = arith.constant 1.000000e+00 : f32
    %183 = vector.broadcast %cst_45 : f32 to vector<2x128xf32>
    %184 = arith.addf %183, %182 : vector<2x128xf32>
    %185 = arith.divf %183, %184 : vector<2x128xf32>
    %186 = arith.mulf %177, %129 : vector<2x128xf32>
    %187 = arith.mulf %171, %179 : vector<2x128xf32>
    %188 = arith.addf %186, %187 : vector<2x128xf32>
    %189 = math.tanh %188 : vector<2x128xf32>
    %190 = arith.mulf %185, %189 : vector<2x128xf32>
    %191 = tpu.concatenate %131, %161 in 1 : vector<2x128xf32>, vector<2x128xf32> -> vector<2x256xf32>
    %192 = arith.truncf %191 : vector<2x256xf32> to vector<2x256xbf16>
    %cst_46 = arith.constant dense<0.000000e+00> : vector<2x512xf32>
    %193 = tpu.matmul %192, %9, %cst_46 {dimension_numbers = #tpu.dot_dimension_numbers<[1], [0], [0], [1], [0, 0, 1, 1], [], []>} : vector<2x256xbf16>, vector<256x512xbf16>, vector<2x512xf32> -> vector<2x512xf32>
    %194 = vector.broadcast %10 : vector<1x512xf32> to vector<2x512xf32>
    %195 = arith.addf %193, %194 : vector<2x512xf32>
    %196 = vector.extract_strided_slice %195 {offsets = [0, 0], sizes = [2, 128], strides = [1, 1]} : vector<2x512xf32> to vector<2x128xf32>
    %197 = arith.negf %196 : vector<2x128xf32>
    %198 = math.exp %197 : vector<2x128xf32>
    %cst_47 = arith.constant 1.000000e+00 : f32
    %199 = vector.broadcast %cst_47 : f32 to vector<2x128xf32>
    %200 = arith.addf %199, %198 : vector<2x128xf32>
    %201 = arith.divf %199, %200 : vector<2x128xf32>
    %202 = vector.extract_strided_slice %195 {offsets = [0, 128], sizes = [2, 128], strides = [1, 1]} : vector<2x512xf32> to vector<2x128xf32>
    %203 = arith.negf %202 : vector<2x128xf32>
    %204 = math.exp %203 : vector<2x128xf32>
    %cst_48 = arith.constant 1.000000e+00 : f32
    %205 = vector.broadcast %cst_48 : f32 to vector<2x128xf32>
    %206 = arith.addf %205, %204 : vector<2x128xf32>
    %207 = arith.divf %205, %206 : vector<2x128xf32>
    %208 = vector.extract_strided_slice %195 {offsets = [0, 256], sizes = [2, 128], strides = [1, 1]} : vector<2x512xf32> to vector<2x128xf32>
    %209 = math.tanh %208 : vector<2x128xf32>
    %210 = vector.extract_strided_slice %195 {offsets = [0, 384], sizes = [2, 128], strides = [1, 1]} : vector<2x512xf32> to vector<2x128xf32>
    %211 = arith.negf %210 : vector<2x128xf32>
    %212 = math.exp %211 : vector<2x128xf32>
    %cst_49 = arith.constant 1.000000e+00 : f32
    %213 = vector.broadcast %cst_49 : f32 to vector<2x128xf32>
    %214 = arith.addf %213, %212 : vector<2x128xf32>
    %215 = arith.divf %213, %214 : vector<2x128xf32>
    %216 = arith.mulf %207, %159 : vector<2x128xf32>
    %217 = arith.mulf %201, %209 : vector<2x128xf32>
    %218 = arith.addf %216, %217 : vector<2x128xf32>
    %219 = math.tanh %218 : vector<2x128xf32>
    %220 = arith.mulf %215, %219 : vector<2x128xf32>
    %c8 = arith.constant 8 : index
    %c0_50 = arith.constant 0 : index
    %221 = vector.load %arg9[%c8, %c0_50] : memref<16x512xf32, #tpu.memory_space<vmem>>, vector<2x512xf32>
    %222 = arith.truncf %190 : vector<2x128xf32> to vector<2x128xbf16>
    %cst_51 = arith.constant dense<0.000000e+00> : vector<2x512xf32>
    %223 = tpu.matmul %222, %8, %cst_51 {dimension_numbers = #tpu.dot_dimension_numbers<[1], [0], [0], [1], [0, 0, 1, 1], [], []>} : vector<2x128xbf16>, vector<128x512xbf16>, vector<2x512xf32> -> vector<2x512xf32>
    %224 = arith.addf %221, %223 : vector<2x512xf32>
    %225 = vector.extract_strided_slice %224 {offsets = [0, 0], sizes = [2, 128], strides = [1, 1]} : vector<2x512xf32> to vector<2x128xf32>
    %226 = arith.negf %225 : vector<2x128xf32>
    %227 = math.exp %226 : vector<2x128xf32>
    %cst_52 = arith.constant 1.000000e+00 : f32
    %228 = vector.broadcast %cst_52 : f32 to vector<2x128xf32>
    %229 = arith.addf %228, %227 : vector<2x128xf32>
    %230 = arith.divf %228, %229 : vector<2x128xf32>
    %231 = vector.extract_strided_slice %224 {offsets = [0, 128], sizes = [2, 128], strides = [1, 1]} : vector<2x512xf32> to vector<2x128xf32>
    %232 = arith.negf %231 : vector<2x128xf32>
    %233 = math.exp %232 : vector<2x128xf32>
    %cst_53 = arith.constant 1.000000e+00 : f32
    %234 = vector.broadcast %cst_53 : f32 to vector<2x128xf32>
    %235 = arith.addf %234, %233 : vector<2x128xf32>
    %236 = arith.divf %234, %235 : vector<2x128xf32>
    %237 = vector.extract_strided_slice %224 {offsets = [0, 256], sizes = [2, 128], strides = [1, 1]} : vector<2x512xf32> to vector<2x128xf32>
    %238 = math.tanh %237 : vector<2x128xf32>
    %239 = vector.extract_strided_slice %224 {offsets = [0, 384], sizes = [2, 128], strides = [1, 1]} : vector<2x512xf32> to vector<2x128xf32>
    %240 = arith.negf %239 : vector<2x128xf32>
    %241 = math.exp %240 : vector<2x128xf32>
    %cst_54 = arith.constant 1.000000e+00 : f32
    %242 = vector.broadcast %cst_54 : f32 to vector<2x128xf32>
    %243 = arith.addf %242, %241 : vector<2x128xf32>
    %244 = arith.divf %242, %243 : vector<2x128xf32>
    %245 = arith.mulf %236, %188 : vector<2x128xf32>
    %246 = arith.mulf %230, %238 : vector<2x128xf32>
    %247 = arith.addf %245, %246 : vector<2x128xf32>
    %248 = math.tanh %247 : vector<2x128xf32>
    %249 = arith.mulf %244, %248 : vector<2x128xf32>
    %250 = tpu.concatenate %190, %220 in 1 : vector<2x128xf32>, vector<2x128xf32> -> vector<2x256xf32>
    %251 = arith.truncf %250 : vector<2x256xf32> to vector<2x256xbf16>
    %cst_55 = arith.constant dense<0.000000e+00> : vector<2x512xf32>
    %252 = tpu.matmul %251, %9, %cst_55 {dimension_numbers = #tpu.dot_dimension_numbers<[1], [0], [0], [1], [0, 0, 1, 1], [], []>} : vector<2x256xbf16>, vector<256x512xbf16>, vector<2x512xf32> -> vector<2x512xf32>
    %253 = vector.broadcast %10 : vector<1x512xf32> to vector<2x512xf32>
    %254 = arith.addf %252, %253 : vector<2x512xf32>
    %255 = vector.extract_strided_slice %254 {offsets = [0, 0], sizes = [2, 128], strides = [1, 1]} : vector<2x512xf32> to vector<2x128xf32>
    %256 = arith.negf %255 : vector<2x128xf32>
    %257 = math.exp %256 : vector<2x128xf32>
    %cst_56 = arith.constant 1.000000e+00 : f32
    %258 = vector.broadcast %cst_56 : f32 to vector<2x128xf32>
    %259 = arith.addf %258, %257 : vector<2x128xf32>
    %260 = arith.divf %258, %259 : vector<2x128xf32>
    %261 = vector.extract_strided_slice %254 {offsets = [0, 128], sizes = [2, 128], strides = [1, 1]} : vector<2x512xf32> to vector<2x128xf32>
    %262 = arith.negf %261 : vector<2x128xf32>
    %263 = math.exp %262 : vector<2x128xf32>
    %cst_57 = arith.constant 1.000000e+00 : f32
    %264 = vector.broadcast %cst_57 : f32 to vector<2x128xf32>
    %265 = arith.addf %264, %263 : vector<2x128xf32>
    %266 = arith.divf %264, %265 : vector<2x128xf32>
    %267 = vector.extract_strided_slice %254 {offsets = [0, 256], sizes = [2, 128], strides = [1, 1]} : vector<2x512xf32> to vector<2x128xf32>
    %268 = math.tanh %267 : vector<2x128xf32>
    %269 = vector.extract_strided_slice %254 {offsets = [0, 384], sizes = [2, 128], strides = [1, 1]} : vector<2x512xf32> to vector<2x128xf32>
    %270 = arith.negf %269 : vector<2x128xf32>
    %271 = math.exp %270 : vector<2x128xf32>
    %cst_58 = arith.constant 1.000000e+00 : f32
    %272 = vector.broadcast %cst_58 : f32 to vector<2x128xf32>
    %273 = arith.addf %272, %271 : vector<2x128xf32>
    %274 = arith.divf %272, %273 : vector<2x128xf32>
    %275 = arith.mulf %266, %218 : vector<2x128xf32>
    %276 = arith.mulf %260, %268 : vector<2x128xf32>
    %277 = arith.addf %275, %276 : vector<2x128xf32>
    %278 = math.tanh %277 : vector<2x128xf32>
    %279 = arith.mulf %274, %278 : vector<2x128xf32>
    %c10 = arith.constant 10 : index
    %c0_59 = arith.constant 0 : index
    %280 = vector.load %arg9[%c10, %c0_59] : memref<16x512xf32, #tpu.memory_space<vmem>>, vector<2x512xf32>
    %281 = arith.truncf %249 : vector<2x128xf32> to vector<2x128xbf16>
    %cst_60 = arith.constant dense<0.000000e+00> : vector<2x512xf32>
    %282 = tpu.matmul %281, %8, %cst_60 {dimension_numbers = #tpu.dot_dimension_numbers<[1], [0], [0], [1], [0, 0, 1, 1], [], []>} : vector<2x128xbf16>, vector<128x512xbf16>, vector<2x512xf32> -> vector<2x512xf32>
    %283 = arith.addf %280, %282 : vector<2x512xf32>
    %284 = vector.extract_strided_slice %283 {offsets = [0, 0], sizes = [2, 128], strides = [1, 1]} : vector<2x512xf32> to vector<2x128xf32>
    %285 = arith.negf %284 : vector<2x128xf32>
    %286 = math.exp %285 : vector<2x128xf32>
    %cst_61 = arith.constant 1.000000e+00 : f32
    %287 = vector.broadcast %cst_61 : f32 to vector<2x128xf32>
    %288 = arith.addf %287, %286 : vector<2x128xf32>
    %289 = arith.divf %287, %288 : vector<2x128xf32>
    %290 = vector.extract_strided_slice %283 {offsets = [0, 128], sizes = [2, 128], strides = [1, 1]} : vector<2x512xf32> to vector<2x128xf32>
    %291 = arith.negf %290 : vector<2x128xf32>
    %292 = math.exp %291 : vector<2x128xf32>
    %cst_62 = arith.constant 1.000000e+00 : f32
    %293 = vector.broadcast %cst_62 : f32 to vector<2x128xf32>
    %294 = arith.addf %293, %292 : vector<2x128xf32>
    %295 = arith.divf %293, %294 : vector<2x128xf32>
    %296 = vector.extract_strided_slice %283 {offsets = [0, 256], sizes = [2, 128], strides = [1, 1]} : vector<2x512xf32> to vector<2x128xf32>
    %297 = math.tanh %296 : vector<2x128xf32>
    %298 = vector.extract_strided_slice %283 {offsets = [0, 384], sizes = [2, 128], strides = [1, 1]} : vector<2x512xf32> to vector<2x128xf32>
    %299 = arith.negf %298 : vector<2x128xf32>
    %300 = math.exp %299 : vector<2x128xf32>
    %cst_63 = arith.constant 1.000000e+00 : f32
    %301 = vector.broadcast %cst_63 : f32 to vector<2x128xf32>
    %302 = arith.addf %301, %300 : vector<2x128xf32>
    %303 = arith.divf %301, %302 : vector<2x128xf32>
    %304 = arith.mulf %295, %247 : vector<2x128xf32>
    %305 = arith.mulf %289, %297 : vector<2x128xf32>
    %306 = arith.addf %304, %305 : vector<2x128xf32>
    %307 = math.tanh %306 : vector<2x128xf32>
    %308 = arith.mulf %303, %307 : vector<2x128xf32>
    %309 = tpu.concatenate %249, %279 in 1 : vector<2x128xf32>, vector<2x128xf32> -> vector<2x256xf32>
    %310 = arith.truncf %309 : vector<2x256xf32> to vector<2x256xbf16>
    %cst_64 = arith.constant dense<0.000000e+00> : vector<2x512xf32>
    %311 = tpu.matmul %310, %9, %cst_64 {dimension_numbers = #tpu.dot_dimension_numbers<[1], [0], [0], [1], [0, 0, 1, 1], [], []>} : vector<2x256xbf16>, vector<256x512xbf16>, vector<2x512xf32> -> vector<2x512xf32>
    %312 = vector.broadcast %10 : vector<1x512xf32> to vector<2x512xf32>
    %313 = arith.addf %311, %312 : vector<2x512xf32>
    %314 = vector.extract_strided_slice %313 {offsets = [0, 0], sizes = [2, 128], strides = [1, 1]} : vector<2x512xf32> to vector<2x128xf32>
    %315 = arith.negf %314 : vector<2x128xf32>
    %316 = math.exp %315 : vector<2x128xf32>
    %cst_65 = arith.constant 1.000000e+00 : f32
    %317 = vector.broadcast %cst_65 : f32 to vector<2x128xf32>
    %318 = arith.addf %317, %316 : vector<2x128xf32>
    %319 = arith.divf %317, %318 : vector<2x128xf32>
    %320 = vector.extract_strided_slice %313 {offsets = [0, 128], sizes = [2, 128], strides = [1, 1]} : vector<2x512xf32> to vector<2x128xf32>
    %321 = arith.negf %320 : vector<2x128xf32>
    %322 = math.exp %321 : vector<2x128xf32>
    %cst_66 = arith.constant 1.000000e+00 : f32
    %323 = vector.broadcast %cst_66 : f32 to vector<2x128xf32>
    %324 = arith.addf %323, %322 : vector<2x128xf32>
    %325 = arith.divf %323, %324 : vector<2x128xf32>
    %326 = vector.extract_strided_slice %313 {offsets = [0, 256], sizes = [2, 128], strides = [1, 1]} : vector<2x512xf32> to vector<2x128xf32>
    %327 = math.tanh %326 : vector<2x128xf32>
    %328 = vector.extract_strided_slice %313 {offsets = [0, 384], sizes = [2, 128], strides = [1, 1]} : vector<2x512xf32> to vector<2x128xf32>
    %329 = arith.negf %328 : vector<2x128xf32>
    %330 = math.exp %329 : vector<2x128xf32>
    %cst_67 = arith.constant 1.000000e+00 : f32
    %331 = vector.broadcast %cst_67 : f32 to vector<2x128xf32>
    %332 = arith.addf %331, %330 : vector<2x128xf32>
    %333 = arith.divf %331, %332 : vector<2x128xf32>
    %334 = arith.mulf %325, %277 : vector<2x128xf32>
    %335 = arith.mulf %319, %327 : vector<2x128xf32>
    %336 = arith.addf %334, %335 : vector<2x128xf32>
    %337 = math.tanh %336 : vector<2x128xf32>
    %338 = arith.mulf %333, %337 : vector<2x128xf32>
    %c12 = arith.constant 12 : index
    %c0_68 = arith.constant 0 : index
    %339 = vector.load %arg9[%c12, %c0_68] : memref<16x512xf32, #tpu.memory_space<vmem>>, vector<2x512xf32>
    %340 = arith.truncf %308 : vector<2x128xf32> to vector<2x128xbf16>
    %cst_69 = arith.constant dense<0.000000e+00> : vector<2x512xf32>
    %341 = tpu.matmul %340, %8, %cst_69 {dimension_numbers = #tpu.dot_dimension_numbers<[1], [0], [0], [1], [0, 0, 1, 1], [], []>} : vector<2x128xbf16>, vector<128x512xbf16>, vector<2x512xf32> -> vector<2x512xf32>
    %342 = arith.addf %339, %341 : vector<2x512xf32>
    %343 = vector.extract_strided_slice %342 {offsets = [0, 0], sizes = [2, 128], strides = [1, 1]} : vector<2x512xf32> to vector<2x128xf32>
    %344 = arith.negf %343 : vector<2x128xf32>
    %345 = math.exp %344 : vector<2x128xf32>
    %cst_70 = arith.constant 1.000000e+00 : f32
    %346 = vector.broadcast %cst_70 : f32 to vector<2x128xf32>
    %347 = arith.addf %346, %345 : vector<2x128xf32>
    %348 = arith.divf %346, %347 : vector<2x128xf32>
    %349 = vector.extract_strided_slice %342 {offsets = [0, 128], sizes = [2, 128], strides = [1, 1]} : vector<2x512xf32> to vector<2x128xf32>
    %350 = arith.negf %349 : vector<2x128xf32>
    %351 = math.exp %350 : vector<2x128xf32>
    %cst_71 = arith.constant 1.000000e+00 : f32
    %352 = vector.broadcast %cst_71 : f32 to vector<2x128xf32>
    %353 = arith.addf %352, %351 : vector<2x128xf32>
    %354 = arith.divf %352, %353 : vector<2x128xf32>
    %355 = vector.extract_strided_slice %342 {offsets = [0, 256], sizes = [2, 128], strides = [1, 1]} : vector<2x512xf32> to vector<2x128xf32>
    %356 = math.tanh %355 : vector<2x128xf32>
    %357 = vector.extract_strided_slice %342 {offsets = [0, 384], sizes = [2, 128], strides = [1, 1]} : vector<2x512xf32> to vector<2x128xf32>
    %358 = arith.negf %357 : vector<2x128xf32>
    %359 = math.exp %358 : vector<2x128xf32>
    %cst_72 = arith.constant 1.000000e+00 : f32
    %360 = vector.broadcast %cst_72 : f32 to vector<2x128xf32>
    %361 = arith.addf %360, %359 : vector<2x128xf32>
    %362 = arith.divf %360, %361 : vector<2x128xf32>
    %363 = arith.mulf %354, %306 : vector<2x128xf32>
    %364 = arith.mulf %348, %356 : vector<2x128xf32>
    %365 = arith.addf %363, %364 : vector<2x128xf32>
    %366 = math.tanh %365 : vector<2x128xf32>
    %367 = arith.mulf %362, %366 : vector<2x128xf32>
    %368 = tpu.concatenate %308, %338 in 1 : vector<2x128xf32>, vector<2x128xf32> -> vector<2x256xf32>
    %369 = arith.truncf %368 : vector<2x256xf32> to vector<2x256xbf16>
    %cst_73 = arith.constant dense<0.000000e+00> : vector<2x512xf32>
    %370 = tpu.matmul %369, %9, %cst_73 {dimension_numbers = #tpu.dot_dimension_numbers<[1], [0], [0], [1], [0, 0, 1, 1], [], []>} : vector<2x256xbf16>, vector<256x512xbf16>, vector<2x512xf32> -> vector<2x512xf32>
    %371 = vector.broadcast %10 : vector<1x512xf32> to vector<2x512xf32>
    %372 = arith.addf %370, %371 : vector<2x512xf32>
    %373 = vector.extract_strided_slice %372 {offsets = [0, 0], sizes = [2, 128], strides = [1, 1]} : vector<2x512xf32> to vector<2x128xf32>
    %374 = arith.negf %373 : vector<2x128xf32>
    %375 = math.exp %374 : vector<2x128xf32>
    %cst_74 = arith.constant 1.000000e+00 : f32
    %376 = vector.broadcast %cst_74 : f32 to vector<2x128xf32>
    %377 = arith.addf %376, %375 : vector<2x128xf32>
    %378 = arith.divf %376, %377 : vector<2x128xf32>
    %379 = vector.extract_strided_slice %372 {offsets = [0, 128], sizes = [2, 128], strides = [1, 1]} : vector<2x512xf32> to vector<2x128xf32>
    %380 = arith.negf %379 : vector<2x128xf32>
    %381 = math.exp %380 : vector<2x128xf32>
    %cst_75 = arith.constant 1.000000e+00 : f32
    %382 = vector.broadcast %cst_75 : f32 to vector<2x128xf32>
    %383 = arith.addf %382, %381 : vector<2x128xf32>
    %384 = arith.divf %382, %383 : vector<2x128xf32>
    %385 = vector.extract_strided_slice %372 {offsets = [0, 256], sizes = [2, 128], strides = [1, 1]} : vector<2x512xf32> to vector<2x128xf32>
    %386 = math.tanh %385 : vector<2x128xf32>
    %387 = vector.extract_strided_slice %372 {offsets = [0, 384], sizes = [2, 128], strides = [1, 1]} : vector<2x512xf32> to vector<2x128xf32>
    %388 = arith.negf %387 : vector<2x128xf32>
    %389 = math.exp %388 : vector<2x128xf32>
    %cst_76 = arith.constant 1.000000e+00 : f32
    %390 = vector.broadcast %cst_76 : f32 to vector<2x128xf32>
    %391 = arith.addf %390, %389 : vector<2x128xf32>
    %392 = arith.divf %390, %391 : vector<2x128xf32>
    %393 = arith.mulf %384, %336 : vector<2x128xf32>
    %394 = arith.mulf %378, %386 : vector<2x128xf32>
    %395 = arith.addf %393, %394 : vector<2x128xf32>
    %396 = math.tanh %395 : vector<2x128xf32>
    %397 = arith.mulf %392, %396 : vector<2x128xf32>
    %c14 = arith.constant 14 : index
    %c0_77 = arith.constant 0 : index
    %398 = vector.load %arg9[%c14, %c0_77] : memref<16x512xf32, #tpu.memory_space<vmem>>, vector<2x512xf32>
    %399 = arith.truncf %367 : vector<2x128xf32> to vector<2x128xbf16>
    %cst_78 = arith.constant dense<0.000000e+00> : vector<2x512xf32>
    %400 = tpu.matmul %399, %8, %cst_78 {dimension_numbers = #tpu.dot_dimension_numbers<[1], [0], [0], [1], [0, 0, 1, 1], [], []>} : vector<2x128xbf16>, vector<128x512xbf16>, vector<2x512xf32> -> vector<2x512xf32>
    %401 = arith.addf %398, %400 : vector<2x512xf32>
    %402 = vector.extract_strided_slice %401 {offsets = [0, 0], sizes = [2, 128], strides = [1, 1]} : vector<2x512xf32> to vector<2x128xf32>
    %403 = arith.negf %402 : vector<2x128xf32>
    %404 = math.exp %403 : vector<2x128xf32>
    %cst_79 = arith.constant 1.000000e+00 : f32
    %405 = vector.broadcast %cst_79 : f32 to vector<2x128xf32>
    %406 = arith.addf %405, %404 : vector<2x128xf32>
    %407 = arith.divf %405, %406 : vector<2x128xf32>
    %408 = vector.extract_strided_slice %401 {offsets = [0, 128], sizes = [2, 128], strides = [1, 1]} : vector<2x512xf32> to vector<2x128xf32>
    %409 = arith.negf %408 : vector<2x128xf32>
    %410 = math.exp %409 : vector<2x128xf32>
    %cst_80 = arith.constant 1.000000e+00 : f32
    %411 = vector.broadcast %cst_80 : f32 to vector<2x128xf32>
    %412 = arith.addf %411, %410 : vector<2x128xf32>
    %413 = arith.divf %411, %412 : vector<2x128xf32>
    %414 = vector.extract_strided_slice %401 {offsets = [0, 256], sizes = [2, 128], strides = [1, 1]} : vector<2x512xf32> to vector<2x128xf32>
    %415 = math.tanh %414 : vector<2x128xf32>
    %416 = vector.extract_strided_slice %401 {offsets = [0, 384], sizes = [2, 128], strides = [1, 1]} : vector<2x512xf32> to vector<2x128xf32>
    %417 = arith.negf %416 : vector<2x128xf32>
    %418 = math.exp %417 : vector<2x128xf32>
    %cst_81 = arith.constant 1.000000e+00 : f32
    %419 = vector.broadcast %cst_81 : f32 to vector<2x128xf32>
    %420 = arith.addf %419, %418 : vector<2x128xf32>
    %421 = arith.divf %419, %420 : vector<2x128xf32>
    %422 = arith.mulf %413, %365 : vector<2x128xf32>
    %423 = arith.mulf %407, %415 : vector<2x128xf32>
    %424 = arith.addf %422, %423 : vector<2x128xf32>
    %425 = math.tanh %424 : vector<2x128xf32>
    %426 = arith.mulf %421, %425 : vector<2x128xf32>
    %427 = tpu.concatenate %367, %397 in 1 : vector<2x128xf32>, vector<2x128xf32> -> vector<2x256xf32>
    %428 = arith.truncf %427 : vector<2x256xf32> to vector<2x256xbf16>
    %cst_82 = arith.constant dense<0.000000e+00> : vector<2x512xf32>
    %429 = tpu.matmul %428, %9, %cst_82 {dimension_numbers = #tpu.dot_dimension_numbers<[1], [0], [0], [1], [0, 0, 1, 1], [], []>} : vector<2x256xbf16>, vector<256x512xbf16>, vector<2x512xf32> -> vector<2x512xf32>
    %430 = vector.broadcast %10 : vector<1x512xf32> to vector<2x512xf32>
    %431 = arith.addf %429, %430 : vector<2x512xf32>
    %432 = vector.extract_strided_slice %431 {offsets = [0, 0], sizes = [2, 128], strides = [1, 1]} : vector<2x512xf32> to vector<2x128xf32>
    %433 = arith.negf %432 : vector<2x128xf32>
    %434 = math.exp %433 : vector<2x128xf32>
    %cst_83 = arith.constant 1.000000e+00 : f32
    %435 = vector.broadcast %cst_83 : f32 to vector<2x128xf32>
    %436 = arith.addf %435, %434 : vector<2x128xf32>
    %437 = arith.divf %435, %436 : vector<2x128xf32>
    %438 = vector.extract_strided_slice %431 {offsets = [0, 128], sizes = [2, 128], strides = [1, 1]} : vector<2x512xf32> to vector<2x128xf32>
    %439 = arith.negf %438 : vector<2x128xf32>
    %440 = math.exp %439 : vector<2x128xf32>
    %cst_84 = arith.constant 1.000000e+00 : f32
    %441 = vector.broadcast %cst_84 : f32 to vector<2x128xf32>
    %442 = arith.addf %441, %440 : vector<2x128xf32>
    %443 = arith.divf %441, %442 : vector<2x128xf32>
    %444 = vector.extract_strided_slice %431 {offsets = [0, 256], sizes = [2, 128], strides = [1, 1]} : vector<2x512xf32> to vector<2x128xf32>
    %445 = math.tanh %444 : vector<2x128xf32>
    %446 = vector.extract_strided_slice %431 {offsets = [0, 384], sizes = [2, 128], strides = [1, 1]} : vector<2x512xf32> to vector<2x128xf32>
    %447 = arith.negf %446 : vector<2x128xf32>
    %448 = math.exp %447 : vector<2x128xf32>
    %cst_85 = arith.constant 1.000000e+00 : f32
    %449 = vector.broadcast %cst_85 : f32 to vector<2x128xf32>
    %450 = arith.addf %449, %448 : vector<2x128xf32>
    %451 = arith.divf %449, %450 : vector<2x128xf32>
    %452 = arith.mulf %443, %395 : vector<2x128xf32>
    %453 = arith.mulf %437, %445 : vector<2x128xf32>
    %454 = arith.addf %452, %453 : vector<2x128xf32>
    %455 = math.tanh %454 : vector<2x128xf32>
    %456 = arith.mulf %451, %455 : vector<2x128xf32>
    %457 = tpu.concatenate %426, %456 in 1 : vector<2x128xf32>, vector<2x128xf32> -> vector<2x256xf32>
    %458 = arith.truncf %457 : vector<2x256xf32> to vector<2x256xbf16>
    %cst_86 = arith.constant dense<0.000000e+00> : vector<2x512xf32>
    %459 = tpu.matmul %458, %9, %cst_86 {dimension_numbers = #tpu.dot_dimension_numbers<[1], [0], [0], [1], [0, 0, 1, 1], [], []>} : vector<2x256xbf16>, vector<256x512xbf16>, vector<2x512xf32> -> vector<2x512xf32>
    %460 = vector.broadcast %10 : vector<1x512xf32> to vector<2x512xf32>
    %461 = arith.addf %459, %460 : vector<2x512xf32>
    %462 = vector.extract_strided_slice %461 {offsets = [0, 0], sizes = [2, 128], strides = [1, 1]} : vector<2x512xf32> to vector<2x128xf32>
    %463 = arith.negf %462 : vector<2x128xf32>
    %464 = math.exp %463 : vector<2x128xf32>
    %cst_87 = arith.constant 1.000000e+00 : f32
    %465 = vector.broadcast %cst_87 : f32 to vector<2x128xf32>
    %466 = arith.addf %465, %464 : vector<2x128xf32>
    %467 = arith.divf %465, %466 : vector<2x128xf32>
    %468 = vector.extract_strided_slice %461 {offsets = [0, 128], sizes = [2, 128], strides = [1, 1]} : vector<2x512xf32> to vector<2x128xf32>
    %469 = arith.negf %468 : vector<2x128xf32>
    %470 = math.exp %469 : vector<2x128xf32>
    %cst_88 = arith.constant 1.000000e+00 : f32
    %471 = vector.broadcast %cst_88 : f32 to vector<2x128xf32>
    %472 = arith.addf %471, %470 : vector<2x128xf32>
    %473 = arith.divf %471, %472 : vector<2x128xf32>
    %474 = vector.extract_strided_slice %461 {offsets = [0, 256], sizes = [2, 128], strides = [1, 1]} : vector<2x512xf32> to vector<2x128xf32>
    %475 = math.tanh %474 : vector<2x128xf32>
    %476 = vector.extract_strided_slice %461 {offsets = [0, 384], sizes = [2, 128], strides = [1, 1]} : vector<2x512xf32> to vector<2x128xf32>
    %477 = arith.negf %476 : vector<2x128xf32>
    %478 = math.exp %477 : vector<2x128xf32>
    %cst_89 = arith.constant 1.000000e+00 : f32
    %479 = vector.broadcast %cst_89 : f32 to vector<2x128xf32>
    %480 = arith.addf %479, %478 : vector<2x128xf32>
    %481 = arith.divf %479, %480 : vector<2x128xf32>
    %482 = arith.mulf %473, %454 : vector<2x128xf32>
    %483 = arith.mulf %467, %475 : vector<2x128xf32>
    %484 = arith.addf %482, %483 : vector<2x128xf32>
    %485 = math.tanh %484 : vector<2x128xf32>
    %486 = arith.mulf %481, %485 : vector<2x128xf32>
    %c0_90 = arith.constant 0 : index
    %c0_91 = arith.constant 0 : index
    %487 = vector.load %arg6[%c0_90, %c0_91] : memref<1x128xf32, #tpu.memory_space<vmem>>, vector<1x128xf32>
    %488 = vector.broadcast %487 : vector<1x128xf32> to vector<2x128xf32>
    %489 = arith.mulf %486, %488 : vector<2x128xf32>
    %cst_92 = arith.constant dense<0.000000e+00> : vector<2xf32>
    %490 = vector.multi_reduction <add>, %489, %cst_92 [1] : vector<2x128xf32> to vector<2xf32>
    %491 = vector.shape_cast %490 : vector<2xf32> to vector<2x1xf32>
    %c0_93 = arith.constant 0 : index
    %c0_94 = arith.constant 0 : index
    %492 = vector.load %arg7[%c0_93, %c0_94] : memref<1x1xf32, #tpu.memory_space<vmem>>, vector<1x1xf32>
    %493 = vector.broadcast %492 : vector<1x1xf32> to vector<2x1xf32>
    %494 = arith.addf %491, %493 : vector<2x1xf32>
    %c0_95 = arith.constant 0 : index
    %c0_96 = arith.constant 0 : index
    %495 = vector.load %arg8[%c0_95, %c0_96] : memref<2x1xf32, #tpu.memory_space<vmem>>, vector<2x1xf32>
    tpu.vector_store %arg8[%c0_95, %c0_96], %494 {strides = array<i32>} : memref<2x1xf32, #tpu.memory_space<vmem>>, vector<2x1xf32>,
    return
  }
}

</mosaic_0001>

<bundles_post_ra>
// kernel: net_forward.1
= control target key start
LH: loop header
LB: loop body
LE: loop exit
PB: predicated region body
PF: predicated region fallthrough
CT: control target
= control target key end

     0   :  { %s5418_s0 = inlined_call_operand.vmem [shape: f32[16,128], index: 0, kind: input, shape index: {}]   ;;  %s5419_s1 = inlined_call_operand.hbm [shape: bf16[128,512], index: 1, kind: input, shape index: {}]   ;;  %s5420_s2 = inlined_call_operand.hbm [shape: bf16[128,512], index: 2, kind: input, shape index: {}]   ;;  %s5421_s3 = inlined_call_operand.vmem [shape: f32[1,512], index: 3, kind: input, shape index: {}]   ;;  %s5422_s4 = inlined_call_operand.hbm [shape: bf16[256,512], index: 4, kind: input, shape index: {}]   ;;  %s5423_s5 = inlined_call_operand.vmem [shape: f32[1,512], index: 5, kind: input, shape index: {}]   ;;  %s5424_s6 = inlined_call_operand.vmem [shape: f32[1,128], index: 6, kind: input, shape index: {}]   ;;  %s5425_s7 = inlined_call_operand.<no memory space> [shape: f32[1,1], index: 7, kind: input, shape index: {}]   ;;  %s5426_s8 = inlined_call_operand.vmem [shape: f32[2,1], index: 8, kind: output, shape index: {}]  }
   0x1   :  { %v13_v0 = vstv %s5425_s7 }
   0x2   :  { %14 = vst [vmem:[#allocation3] sm:$0x1] %v13_v0 }
   0x3   :  { %15 = vsyncpa [#allocation5], 0 }
   0x4   :  { %16 = vsyncpa [#allocation7], 0  ;;  %s3822_s29 = smov [#allocation6]   ;;  %s3823_s9 = smov [#allocation4]  }
   0x5   :  { %s36_s30 = sshll.u32 %s3822_s29, 4  ;;  %s24_s10 = sshll.u32 %s3823_s9, 4  ;;  %s37_s30 = int_to_ptr.vmem [resolvable:$true] %s36_s30  ;;  %s25_s10 = int_to_ptr.vmem [resolvable:$true] %s24_s10 }
   0x6   :  { %s3766_s11 = scalar_lea.vmem %s37_s30, 4096  ;;  %p3771_p1 = scmp.lt.s32.totalorder %s37_s30, %s37_s30 }
   0x7   :  { %p3767_p0 = scmp.ne.s32.totalorder %s37_s30, %s3766_s11  ;;  %p3772_p2 = scmp.lt.s32.totalorder %s3766_s11, %s3766_s11 }
   0x9   :  { %p3773_p3 = por %p3772_p2, %p3771_p1 }
   0xb   :  { %p3774_p4 = pnand %p3773_p3, %p3767_p0 }
   0xd   :  { %3777 = shalt.err (!%p3774_p4)
}
   0xe   :  { %s3824_s12 = smov 256   ;;  %s3825_s13 = smov 16  }
   0xf   :  { %42 = dma.hbm_to_vmem [thread:$0]  %s5420_s2, 4096, %s37_s30, [#allocation7], %s3824_s12, %s3824_s12, %s3825_s13  }
  0x10   :  { %s3786_s15 = scalar_lea.vmem %s25_s10, 4096  ;;  %p3791_p6 = scmp.lt.s32.totalorder %s25_s10, %s25_s10 }
  0x11   :  { %p3787_p5 = scmp.ne.s32.totalorder %s25_s10, %s3786_s15  ;;  %p3792_p7 = scmp.lt.s32.totalorder %s3786_s15, %s3786_s15 }
  0x13   :  { %p3793_p8 = por %p3792_p7, %p3791_p6 }
  0x15   :  { %p3794_p9 = pnand %p3793_p8, %p3787_p5 }
  0x17   :  { %3797 = shalt.err (!%p3794_p9)
}
  0x18   :  { %30 = dma.hbm_to_vmem [thread:$0]  %s5419_s1, 4096, %s25_s10, [#allocation5], %s3824_s12, %s3824_s12, %s3825_s13  }
  0x19   :  { %s3826_s18 = smov [#allocation8]  }
  0x1a   :  { %s50_s19 = sshll.u32 %s3826_s18, 4  ;;  %s51_s19 = int_to_ptr.vmem [resolvable:$true] %s50_s19 }
  0x1b   :  { %s3806_s20 = scalar_lea.vmem %s51_s19, 8192  ;;  %p3811_p11 = scmp.lt.s32.totalorder %s51_s19, %s51_s19 }
  0x1c   :  { %p3807_p10 = scmp.ne.s32.totalorder %s51_s19, %s3806_s20  ;;  %p3812_p12 = scmp.lt.s32.totalorder %s3806_s20, %s3806_s20 }
  0x1e   :  { %p3813_p13 = por %p3812_p12, %p3811_p11 }
  0x20   :  { %p3814_p0 = pnand %p3813_p13, %p3807_p10 }
  0x22   :  { %3817 = shalt.err (!%p3814_p0)
}
  0x23   :  { %56 = dma.hbm_to_vmem [thread:$0]  %s5422_s4, 8192, %s51_s19, [#allocation7], %s3824_s12, %s3824_s12, %s3825_s13  }
  0x24   :  { %3818 = dma.done.wait [#allocation5], 4096  }
  0x25   :  { %3819 = vsyncadd [#allocation5], 4294963200 }
  0x26   :  { %3820 = dma.done.wait [#allocation7], 12288  }
  0x27   :  { %3821 = vsyncadd [#allocation7], 4294955008  ;;  %v5431_v1 = vmov 0   ;;  %v3118_v2 = vld [vmem:[#allocation4 + $0xe4] ss:$16 sps:$4 sm:$0xff]   ;;  %vm2913_vm0 = vcmask 1041408  }
  0x28   :  { %322 = vmatprep.mubr.bf16.mxu0 %v5431_v1  ;;  %365 = vmatprep.mubr.bf16.mxu1 %v5431_v1  ;;  %v3120_v3 = vld [vmem:[#allocation4 + $0xec] ss:$16 sps:$4 sm:$0xff]   ;;  %v3122_v4 = vld [vmem:[#allocation4 + $0xe0] ss:$16 sps:$4 sm:$0xff]   ;;  %v3123_v5 = vld [vmem:[#allocation4 + $0xe8] ss:$16 sps:$4 sm:$0xff]  }
  0x29   :  { %290 = vmatprep.subr.bf16.mxu0 %v3118_v2  ;;  %333 = vmatprep.subr.bf16.mxu1 %v3120_v3  ;;  %v3124_v6 = vld [vmem:[#allocation4 + $0xc4] ss:$16 sps:$4 sm:$0xff]   ;;  %v3126_v7 = vld [vmem:[#allocation4 + $0xcc] ss:$16 sps:$4 sm:$0xff]   ;;  %v3128_v8 = vld [vmem:[#allocation4 + $0xc0] ss:$16 sps:$4 sm:$0xff]  }
  0x2a   :  { %291 = vmatpush1.bf16.msra.mxu0 %v3122_v4  ;;  %334 = vmatpush1.bf16.msra.mxu1 %v3123_v5  ;;  %v3129_v9 = vld [vmem:[#allocation4 + $0xc8] ss:$16 sps:$4 sm:$0xff]   ;;  %v3130_v10 = vld [vmem:[#allocation4 + $0xa4] ss:$16 sps:$4 sm:$0xff]   ;;  %v3132_v11 = vld [vmem:[#allocation4 + $0xac] ss:$16 sps:$4 sm:$0xff]  }
  0x2b   :  { %292 = vmatprep.subr.bf16.mxu0 %v3124_v6  ;;  %335 = vmatprep.subr.bf16.mxu1 %v3126_v7  ;;  %v3134_v12 = vld [vmem:[#allocation4 + $0xa0] ss:$16 sps:$4 sm:$0xff]   ;;  %v3135_v13 = vld [vmem:[#allocation4 + $0xa8] ss:$16 sps:$4 sm:$0xff]   ;;  %v3136_v14 = vld [vmem:[#allocation4 + $0x84] ss:$16 sps:$4 sm:$0xff]  }
  0x2c   :  { %v3138_v15 = vld [vmem:[#allocation4 + $0x8c] ss:$16 sps:$4 sm:$0xff]   ;;  %v3140_v16 = vld [vmem:[#allocation4 + $0x80] ss:$16 sps:$4 sm:$0xff]   ;;  %v3141_v17 = vld [vmem:[#allocation4 + $0x88] ss:$16 sps:$4 sm:$0xff]  }
  0x2d   :  { %v3142_v18 = vld [vmem:[#allocation4 + $0x64] ss:$16 sps:$4 sm:$0xff]   ;;  %v3144_v19 = vld [vmem:[#allocation4 + $0x6c] ss:$16 sps:$4 sm:$0xff]   ;;  %v3146_v20 = vld [vmem:[#allocation4 + $0x60] ss:$16 sps:$4 sm:$0xff]  }
  0x2e   :  { %293 = vmatpush1.bf16.msra.mxu0 %v3128_v8  ;;  %336 = vmatpush1.bf16.msra.mxu1 %v3129_v9  ;;  %v3147_v21 = vld [vmem:[#allocation4 + $0x68] ss:$16 sps:$4 sm:$0xff]   ;;  %v3148_v22 = vld [vmem:[#allocation4 + $0x44] ss:$16 sps:$4 sm:$0xff]   ;;  %v3150_v23 = vld [vmem:[#allocation4 + $0x4c] ss:$16 sps:$4 sm:$0xff]   ;;  %v110_v8 = vlaneseq }
  0x2f   :  { %294 = vmatprep.subr.bf16.mxu0 %v3130_v10  ;;  %337 = vmatprep.subr.bf16.mxu1 %v3132_v11  ;;  %v3152_v24 = vld [vmem:[#allocation4 + $0x40] ss:$16 sps:$4 sm:$0xff]   ;;  %v3153_v25 = vld [vmem:[#allocation4 + $0x48] ss:$16 sps:$4 sm:$0xff]   ;;  %v3154_v26 = vld [vmem:[#allocation4 + $0x24] ss:$16 sps:$4 sm:$0xff]  }
  0x30   :  { %v3156_v27 = vld [vmem:[#allocation4 + $0x2c] ss:$16 sps:$4 sm:$0xff]   ;;  %v3158_v28 = vld [vmem:[#allocation4 + $0x20] ss:$16 sps:$4 sm:$0xff]   ;;  %v3159_v29 = vld [vmem:[#allocation4 + $0x28] ss:$16 sps:$4 sm:$0xff]  }
  0x31   :  { %v3160_v30 = vld [vmem:[#allocation4 + $0x4] ss:$16 sps:$4 sm:$0xff]   ;;  %v3162_v31 = vld [vmem:[#allocation4 + $0xc] ss:$16 sps:$4 sm:$0xff]   ;;  %v3164_v32 = vld [vmem:[#allocation4] ss:$16 sps:$4 sm:$0xff]  }
  0x32   :  { %295 = vmatpush1.bf16.msra.mxu0 %v3134_v12  ;;  %338 = vmatpush1.bf16.msra.mxu1 %v3135_v13  ;;  %v3165_v33 = vld [vmem:[#allocation4 + $0x8] ss:$16 sps:$4 sm:$0xff]   ;;  %v73_v34 = vld [vmem:[%s5418_s0] sm:$0xff]  ;;  %v4034_v9 = vshrl.u32 %v110_v8, 7  ;;  %vm2925_vm1 = vcmask 1024  }
  0x33   :  { %296 = vmatprep.subr.bf16.mxu0 %v3136_v14  ;;  %339 = vmatprep.subr.bf16.mxu1 %v3138_v15  ;;  %v74_v35 = vld [vmem:[%s5418_s0 + $0x8] sm:$0xff]  ;;  %v3898_v39 = vld [vmem:[#allocation6 + $0xe0] ss:$16 sps:$4 sm:$0xff]  }
  0x34   :  { %v3894_v36 = vld [vmem:[#allocation6 + $0xe4] ss:$16 sps:$4 sm:$0xff]   ;;  %v3896_v37 = vld [vmem:[#allocation6 + $0xec] ss:$16 sps:$4 sm:$0xff]   ;;  %v75_v38 = vpack.c.bf16 %v74_v35, %v73_v34  ;;  %v3900_v40 = vld [vmem:[#allocation6 + $0xe8] ss:$16 sps:$4 sm:$0xff]  }
  0x35   :  { %v3902_v41 = vld [vmem:[#allocation6 + $0xc4] ss:$16 sps:$4 sm:$0xff]   ;;  %v3906_v42 = vld [vmem:[#allocation6 + $0xcc] ss:$16 sps:$4 sm:$0xff]   ;;  %v3908_v43 = vld [vmem:[#allocation6 + $0xc0] ss:$16 sps:$4 sm:$0xff]  }
  0x36   :  { %297 = vmatpush1.bf16.msra.mxu0 %v3140_v16  ;;  %340 = vmatpush1.bf16.msra.mxu1 %v3141_v17  ;;  %v3912_v44 = vld [vmem:[#allocation6 + $0xc8] ss:$16 sps:$4 sm:$0xff]   ;;  %v3916_v45 = vld [vmem:[#allocation6 + $0xa4] ss:$16 sps:$4 sm:$0xff]   ;;  %v3918_v46 = vld [vmem:[#allocation6 + $0xac] ss:$16 sps:$4 sm:$0xff]  }
  0x37   :  { %298 = vmatprep.subr.bf16.mxu0 %v3142_v18  ;;  %341 = vmatprep.subr.bf16.mxu1 %v3144_v19  ;;  %v3922_v47 = vld [vmem:[#allocation6 + $0xa0] ss:$16 sps:$4 sm:$0xff]   ;;  %v3926_v48 = vld [vmem:[#allocation6 + $0xa8] ss:$16 sps:$4 sm:$0xff]   ;;  %v3928_v49 = vld [vmem:[#allocation6 + $0x84] ss:$16 sps:$4 sm:$0xff]  }
  0x38   :  { %v3932_v50 = vld [vmem:[#allocation6 + $0x8c] ss:$16 sps:$4 sm:$0xff]   ;;  %v3934_v51 = vld [vmem:[#allocation6 + $0x80] ss:$16 sps:$4 sm:$0xff]   ;;  %v3936_v52 = vld [vmem:[#allocation6 + $0x88] ss:$16 sps:$4 sm:$0xff]  }
  0x39   :  { %v3938_v53 = vld [vmem:[#allocation6 + $0x64] ss:$16 sps:$4 sm:$0xff]   ;;  %v3940_v54 = vld [vmem:[#allocation6 + $0x6c] ss:$16 sps:$4 sm:$0xff]   ;;  %v3946_v55 = vld [vmem:[#allocation6 + $0x60] ss:$16 sps:$4 sm:$0xff]  }
  0x3a   :  { %299 = vmatpush1.bf16.msra.mxu0 %v3146_v20  ;;  %342 = vmatpush1.bf16.msra.mxu1 %v3147_v21  ;;  %v3948_v56 = vld [vmem:[#allocation6 + $0x68] ss:$16 sps:$4 sm:$0xff]   ;;  %v3950_v57 = vld [vmem:[#allocation6 + $0x44] ss:$16 sps:$4 sm:$0xff]   ;;  %v3952_v58 = vld [vmem:[#allocation6 + $0x4c] ss:$16 sps:$4 sm:$0xff]  }
  0x3b   :  { %300 = vmatprep.subr.bf16.mxu0 %v3148_v22  ;;  %343 = vmatprep.subr.bf16.mxu1 %v3150_v23  ;;  %v3958_v59 = vld [vmem:[#allocation6 + $0x40] ss:$16 sps:$4 sm:$0xff]   ;;  %v3960_v60 = vld [vmem:[#allocation6 + $0x48] ss:$16 sps:$4 sm:$0xff]   ;;  %v3962_v61 = vld [vmem:[#allocation6 + $0x24] ss:$16 sps:$4 sm:$0xff]  }
  0x3c   :  { %v3964_v62 = vld [vmem:[#allocation6 + $0x2c] ss:$16 sps:$4 sm:$0xff]   ;;  %v3970_v63 = vld [vmem:[#allocation6 + $0x20] ss:$16 sps:$4 sm:$0xff]   ;;  %v3972_v0 = vld [vmem:[#allocation6 + $0x28] ss:$16 sps:$4 sm:$0xff]  }
  0x3d   :  { %v3974_v2 = vld [vmem:[#allocation6 + $0x4] ss:$16 sps:$4 sm:$0xff]   ;;  %v3976_v3 = vld [vmem:[#allocation6 + $0xc] ss:$16 sps:$4 sm:$0xff]   ;;  %v3982_v4 = vld [vmem:[#allocation6] ss:$16 sps:$4 sm:$0xff]  }
  0x3e   :  { %301 = vmatpush1.bf16.msra.mxu0 %v3152_v24  ;;  %344 = vmatpush1.bf16.msra.mxu1 %v3153_v25  ;;  %v3984_v5 = vld [vmem:[#allocation6 + $0x8] ss:$16 sps:$4 sm:$0xff]   ;;  %v4028_v6 = vld [vmem:[#allocation8 + $0xe4] ss:$16 sps:$4 sm:$0xff]   ;;  %v4030_v7 = vld [vmem:[#allocation8 + $0xec] ss:$16 sps:$4 sm:$0xff]  }
  0x3f   :  { %302 = vmatprep.subr.bf16.mxu0 %v3154_v26  ;;  %345 = vmatprep.subr.bf16.mxu1 %v3156_v27  ;;  %v5430_v10 = vsub.s32 0, %v4034_v9  ;;  %v5427_v11 = vsub.s32 2, %v4034_v9  ;;  %v108_v12 = vld [vmem:[%s5421_s3] sm:$0xf]  ;;  %v5429_v13 = vsub.s32 1, %v4034_v9  ;;  %v5428_v14 = vsub.s32 3, %v4034_v9 }
  0x41   :  { %v113_v15 = vrot.slane %v108_v12, %v5430_v10  ;;  %v121_v16 = vrot.slane %v108_v12, %v5427_v11  ;;  %v117_v17 = vrot.slane %v108_v12, %v5429_v13  ;;  %v125_v18 = vrot.slane %v108_v12, %v5428_v14  ;;  %v4122_v11 = vld [vmem:[#allocation8 + $0x24] ss:$16 sps:$4 sm:$0xff]   ;;  %v4124_v14 = vld [vmem:[#allocation8 + $0x2c] ss:$16 sps:$4 sm:$0xff]   ;;  %v4128_v13 = vld [vmem:[#allocation8 + $0x20] ss:$16 sps:$4 sm:$0xff]  }
  0x42   :  { %303 = vmatpush1.bf16.msra.mxu0 %v3158_v28  ;;  %346 = vmatpush1.bf16.msra.mxu1 %v3159_v29  ;;  %5722 = vst [vmem:[#allocation15_spill] sm:$0xff] %v4122_v11  ;;  %5723 = vst [vmem:[#allocation16_spill] sm:$0xff] %v4124_v14  ;;  %v4130_v10 = vld [vmem:[#allocation8 + $0x28] ss:$16 sps:$4 sm:$0xff]  }
  0x43   :  { %304 = vmatprep.subr.bf16.mxu0 %v3160_v30  ;;  %347 = vmatprep.subr.bf16.mxu1 %v3162_v31  ;;  %5724 = vst [vmem:[#allocation17_spill] sm:$0xff] %v4128_v13  ;;  %5725 = vst [vmem:[#allocation18_spill] sm:$0xff] %v4130_v10 }
  0x46   :  { %305 = vmatpush1.bf16.msra.mxu0 %v3164_v32  ;;  %348 = vmatpush1.bf16.msra.mxu1 %v3165_v33 }
  0x47   :  { %645 = vmatprep.subr.bf16.mxu0 %v3894_v36  ;;  %686 = vmatprep.subr.bf16.mxu1 %v3896_v37 }
  0x49   :  { %323 = vmatmul.mubr.bf16.vlgmr.msra.gmra.mxu0 %v75_v38  ;;  %366 = vmatmul.mubr.bf16.vlgmr.msra.gmra.mxu1 %v75_v38 }
  0x4a   :  { %646 = vmatpush1.bf16.msra.mxu0 %v3898_v39  ;;  %687 = vmatpush1.bf16.msra.mxu1 %v3900_v40 }
  0x4b   :  { %647 = vmatprep.subr.bf16.mxu0 %v3902_v41  ;;  %688 = vmatprep.subr.bf16.mxu1 %v3906_v42 }
  0x4c   :  { %677 = vmatprep.mubr.bf16.mxu0 %v5431_v1  ;;  %718 = vmatprep.mubr.bf16.mxu1 %v5431_v1 }
  0x4e   :  { %648 = vmatpush1.bf16.msra.mxu0 %v3908_v43  ;;  %689 = vmatpush1.bf16.msra.mxu1 %v3912_v44 }
  0x4f   :  { %649 = vmatprep.subr.bf16.mxu0 %v3916_v45  ;;  %690 = vmatprep.subr.bf16.mxu1 %v3918_v46 }
  0x52   :  { %650 = vmatpush1.bf16.msra.mxu0 %v3922_v47  ;;  %691 = vmatpush1.bf16.msra.mxu1 %v3926_v48 }
  0x53   :  { %651 = vmatprep.subr.bf16.mxu0 %v3928_v49  ;;  %692 = vmatprep.subr.bf16.mxu1 %v3932_v50 }
  0x56   :  { %652 = vmatpush1.bf16.msra.mxu0 %v3934_v51  ;;  %693 = vmatpush1.bf16.msra.mxu1 %v3936_v52 }
  0x57   :  { %653 = vmatprep.subr.bf16.mxu0 %v3938_v53  ;;  %694 = vmatprep.subr.bf16.mxu1 %v3940_v54 }
  0x5a   :  { %654 = vmatpush1.bf16.msra.mxu0 %v3946_v55  ;;  %695 = vmatpush1.bf16.msra.mxu1 %v3948_v56 }
  0x5b   :  { %655 = vmatprep.subr.bf16.mxu0 %v3950_v57  ;;  %696 = vmatprep.subr.bf16.mxu1 %v3952_v58 }
  0x5e   :  { %656 = vmatpush1.bf16.msra.mxu0 %v3958_v59  ;;  %697 = vmatpush1.bf16.msra.mxu1 %v3960_v60 }
  0x5f   :  { %657 = vmatprep.subr.bf16.mxu0 %v3962_v61  ;;  %698 = vmatprep.subr.bf16.mxu1 %v3964_v62 }
  0x62   :  { %658 = vmatpush1.bf16.msra.mxu0 %v3970_v63  ;;  %699 = vmatpush1.bf16.msra.mxu1 %v3972_v0 }
  0x63   :  { %659 = vmatprep.subr.bf16.mxu0 %v3974_v2  ;;  %700 = vmatprep.subr.bf16.mxu1 %v3976_v3 }
  0x66   :  { %660 = vmatpush1.bf16.msra.mxu0 %v3982_v4  ;;  %701 = vmatpush1.bf16.msra.mxu1 %v3984_v5 }
  0x67   :  { %760 = vmatprep.subr.bf16.mxu0 %v3894_v36  ;;  %801 = vmatprep.subr.bf16.mxu1 %v3896_v37 }
  0x69   :  { %678 = vmatmul.mubr.bf16.vlgmr.msra.gmra.mxu0 %v5431_v1  ;;  %719 = vmatmul.mubr.bf16.vlgmr.msra.gmra.mxu1 %v5431_v1 }
  0x6a   :  { %761 = vmatpush1.bf16.msra.mxu0 %v3898_v39  ;;  %802 = vmatpush1.bf16.msra.mxu1 %v3900_v40 }
  0x6b   :  { %762 = vmatprep.subr.bf16.mxu0 %v3902_v41  ;;  %803 = vmatprep.subr.bf16.mxu1 %v3906_v42 }
  0x6c   :  { %792 = vmatprep.mubr.bf16.mxu0 %v5431_v1  ;;  %833 = vmatprep.mubr.bf16.mxu1 %v5431_v1  ;;  %v4134_v1 = vld [vmem:[#allocation8 + $0x4] ss:$16 sps:$4 sm:$0xff]  }
  0x6d   :  { %5726 = vst [vmem:[#allocation19_spill] sm:$0xff] %v4134_v1 }
  0x6e   :  { %763 = vmatpush1.bf16.msra.mxu0 %v3908_v43  ;;  %804 = vmatpush1.bf16.msra.mxu1 %v3912_v44 }
  0x6f   :  { %764 = vmatprep.subr.bf16.mxu0 %v3916_v45  ;;  %805 = vmatprep.subr.bf16.mxu1 %v3918_v46 }
  0x72   :  { %765 = vmatpush1.bf16.msra.mxu0 %v3922_v47  ;;  %806 = vmatpush1.bf16.msra.mxu1 %v3926_v48 }
  0x73   :  { %766 = vmatprep.subr.bf16.mxu0 %v3928_v49  ;;  %807 = vmatprep.subr.bf16.mxu1 %v3932_v50 }
  0x76   :  { %767 = vmatpush1.bf16.msra.mxu0 %v3934_v51  ;;  %808 = vmatpush1.bf16.msra.mxu1 %v3936_v52 }
  0x77   :  { %768 = vmatprep.subr.bf16.mxu0 %v3938_v53  ;;  %809 = vmatprep.subr.bf16.mxu1 %v3940_v54 }
  0x7a   :  { %769 = vmatpush1.bf16.msra.mxu0 %v3946_v55  ;;  %810 = vmatpush1.bf16.msra.mxu1 %v3948_v56 }
  0x7b   :  { %770 = vmatprep.subr.bf16.mxu0 %v3950_v57  ;;  %811 = vmatprep.subr.bf16.mxu1 %v3952_v58 }
  0x7e   :  { %771 = vmatpush1.bf16.msra.mxu0 %v3958_v59  ;;  %812 = vmatpush1.bf16.msra.mxu1 %v3960_v60 }
  0x7f   :  { %772 = vmatprep.subr.bf16.mxu0 %v3962_v61  ;;  %813 = vmatprep.subr.bf16.mxu1 %v3964_v62 }
  0x82   :  { %773 = vmatpush1.bf16.msra.mxu0 %v3970_v63  ;;  %814 = vmatpush1.bf16.msra.mxu1 %v3972_v0 }
  0x83   :  { %774 = vmatprep.subr.bf16.mxu0 %v3974_v2  ;;  %815 = vmatprep.subr.bf16.mxu1 %v3976_v3 }
  0x86   :  { %775 = vmatpush1.bf16.msra.mxu0 %v3982_v4  ;;  %816 = vmatpush1.bf16.msra.mxu1 %v3984_v5 }
  0x87   :  { %1227 = vmatprep.subr.bf16.mxu0 %v4028_v6  ;;  %1268 = vmatprep.subr.bf16.mxu1 %v4030_v7 }
 0x109   :  { %v324_v19 = vpop.f32.mrf.mxu0  ;;  %v367_v20 = vpop.f32.mrf.mxu1 }
 0x10a   :  { %v325_v21 = vadd.f32 %v324_v19, %v113_v15  ;;  %v368_v22 = vadd.f32 %v367_v20, %v121_v16 }
 0x10b   :  { %v326_v23 = vpop.f32.mrf.mxu0  ;;  %v369_v24 = vpop.f32.mrf.mxu1 }
 0x10c   :  { %376 = vst [vmem:[#allocation2 + $0x30] sm:$0xff] %v325_v21  ;;  %v327_v25 = vadd.f32 %v326_v23, %v117_v17  ;;  %378 = vst [vmem:[#allocation2 + $0x18] sm:$0xff] %v368_v22  ;;  %v370_v26 = vadd.f32 %v369_v24, %v125_v18 }
 0x10d   :  { %v328_v27 = vpop.f32.mrf.mxu0  ;;  %v371_v28 = vpop.f32.mrf.mxu1 }
 0x10e   :  { %377 = vst [vmem:[#allocation2] sm:$0xff] %v327_v25  ;;  %v329_v29 = vadd.f32 %v328_v27, %v113_v15  ;;  %379 = vst [vmem:[#allocation2 + $0x10] sm:$0xff] %v370_v26  ;;  %v372_v30 = vadd.f32 %v371_v28, %v121_v16 }
 0x10f   :  { %v330_v31 = vpop.f32.mrf.mxu0  ;;  %v373_v32 = vpop.f32.mrf.mxu1 }
 0x110   :  { %380 = vst [vmem:[#allocation2 + $0x8] sm:$0xff] %v329_v29  ;;  %v331_v33 = vadd.f32 %v330_v31, %v117_v17  ;;  %382 = vst [vmem:[#allocation2 + $0x28] sm:$0xff] %v372_v30  ;;  %v374_v34 = vadd.f32 %v373_v32, %v125_v18 }
 0x112   :  { %381 = vst [vmem:[#allocation2 + $0x20] sm:$0xff] %v331_v33  ;;  %383 = vst [vmem:[#allocation2 + $0x38] sm:$0xff] %v374_v34 }
 0x113   :  { %v481_v35 = vld [vmem:[#allocation2 + $0x30] sm:$0x3]  ;;  %v483_v28 = vld [vmem:[#allocation2 + $0x18] sm:$0x3] }
 0x115   :  { %v482_v19 = vld [vmem:[#allocation2] sm:$0x3]  ;;  %v484_v17 = vld [vmem:[#allocation2 + $0x10] sm:$0x3] }
 0x129   :  { %v679_v38 = vpop.f32.mrf.mxu0  ;;  %v720_v8 = vpop.f32.mrf.mxu1 }
 0x12a   :  { %v727_v12 = vadd.f32 %v679_v38, %v481_v35  ;;  %v729_v30 = vadd.f32 %v720_v8, %v483_v28  ;;  %v4074_v28 = vld [vmem:[#allocation8 + $0xa4] ss:$16 sps:$4 sm:$0xff]  }
 0x12b   :  { %v681_v20 = vpop.f32.mrf.mxu0  ;;  %v722_v21 = vpop.f32.mrf.mxu1 }
 0x12c   :  { %v2997_v22 = vmul.f32 -1.442695, %v727_v12  ;;  %v728_v23 = vadd.f32 %v681_v20, %v482_v19  ;;  %v730_v18 = vadd.f32 %v722_v21, %v484_v17  ;;  %v4062_v17 = vld [vmem:[#allocation8 + $0xcc] ss:$16 sps:$4 sm:$0xff]  }
 0x12d   :  { %v683_v15 = vpop.f32.mrf.mxu0  ;;  %v724_v24 = vpop.f32.mrf.mxu1 }
 0x12e   :  { %3310 = vpow2.f32 %v2997_v22  ;;  %v2998_v16 = vmul.f32 -1.442695, %v728_v23  ;;  %v2999_v27 = vmul.f32 -1.442695, %v730_v18  ;;  %v4054_v24 = vld [vmem:[#allocation8 + $0xe0] ss:$16 sps:$4 sm:$0xff]  }
 0x12f   :  { %v684_v25 = vpop.f32.mrf.mxu0  ;;  %v725_v26 = vpop.f32.mrf.mxu1  ;;  %v4068_v18 = vld [vmem:[#allocation8 + $0xc0] ss:$16 sps:$4 sm:$0xff]  }
 0x130   :  { %3312 = vpow2.f32 %v2998_v16  ;;  %v4056_v16 = vld [vmem:[#allocation8 + $0xe8] ss:$16 sps:$4 sm:$0xff]   ;;  %v4060_v26 = vld [vmem:[#allocation8 + $0xc4] ss:$16 sps:$4 sm:$0xff]  }
 0x131   :  { %3314 = vpow2.f32 %v2999_v27  ;;  %v4070_v27 = vld [vmem:[#allocation8 + $0xc8] ss:$16 sps:$4 sm:$0xff]  }
 0x13b   :  { %v3311_v29 = vpop.eup %3310 }
 0x13c   :  { %v734_v31 = vadd.f32 1.0, %v3311_v29  ;;  %v4076_v29 = vld [vmem:[#allocation8 + $0xac] ss:$16 sps:$4 sm:$0xff]  }
 0x13d   :  { %v3313_v32 = vpop.eup %3312 }
 0x13e   :  { %3316 = vrcp.f32 %v734_v31  ;;  %v740_v33 = vadd.f32 1.0, %v3313_v32  ;;  %v3315_v34 = vpop.eup %3314  ;;  %v4080_v31 = vld [vmem:[#allocation8 + $0xa0] ss:$16 sps:$4 sm:$0xff]   ;;  %v4082_v32 = vld [vmem:[#allocation8 + $0xa8] ss:$16 sps:$4 sm:$0xff]  }
 0x13f   :  { %3318 = vtanh.f32 %v729_v30  ;;  %v747_v19 = vadd.f32 1.0, %v3315_v34  ;;  %v3828_v30 = vmov 0.0|0.0   ;;  %v4088_v34 = vld [vmem:[#allocation8 + $0x8c] ss:$16 sps:$4 sm:$0xff]  }
 0x140   :  { %3320 = vrcp.f32 %v740_v33  ;;  %v4086_v33 = vld [vmem:[#allocation8 + $0x84] ss:$16 sps:$4 sm:$0xff]  }
 0x141   :  { %3322 = vrcp.f32 %v747_v19  ;;  %v4100_v19 = vld [vmem:[#allocation8 + $0x6c] ss:$16 sps:$4 sm:$0xff]  }
 0x14b   :  { %v3317_v35 = vpop.eup %3316 }
 0x14c   :  { %v3319_v38 = vpop.eup %3318 }
 0x14d   :  { %v3321_v12 = vpop.eup %3320  ;;  %v751_v22 = vmul.f32 %v3319_v38, %v3317_v35  ;;  %v4092_v35 = vld [vmem:[#allocation8 + $0x80] ss:$16 sps:$4 sm:$0xff]   ;;  %v4094_v38 = vld [vmem:[#allocation8 + $0x88] ss:$16 sps:$4 sm:$0xff]  }
 0x14e   :  { %v750_v20 = vmul.f32 0.0, %v3321_v12  ;;  %v3323_v8 = vpop.eup %3322  ;;  %v4098_v12 = vld [vmem:[#allocation8 + $0x64] ss:$16 sps:$4 sm:$0xff]  }
 0x150   :  { %v4051_v23 = vadd.f32 %v751_v22, %v750_v20  ;;  %v4104_v20 = vld [vmem:[#allocation8 + $0x60] ss:$16 sps:$4 sm:$0xff]   ;;  %v4106_v22 = vld [vmem:[#allocation8 + $0x68] ss:$16 sps:$4 sm:$0xff]  }
 0x152   :  { %3324 = vtanh.f32 %v4051_v23 }
 0x15f   :  { %v3325_v21 = vpop.eup %3324 }
 0x160   :  { %v754_v15 = vmul.f32 %v3325_v21, %v3323_v8  ;;  %v4110_v8 = vld [vmem:[#allocation8 + $0x44] ss:$16 sps:$4 sm:$0xff]   ;;  %v4112_v21 = vld [vmem:[#allocation8 + $0x4c] ss:$16 sps:$4 sm:$0xff]  }
 0x161   :  { %5718 = vst [vmem:[#allocation11_spill] sm:$0xff] %v4110_v8  ;;  %5719 = vst [vmem:[#allocation12_spill] sm:$0xff] %v4112_v21 }
 0x162   :  { %v4058_v25 = vpack.c.bf16 %v754_v15, %v754_v15  ;;  %v4116_v15 = vld [vmem:[#allocation8 + $0x40] ss:$16 sps:$4 sm:$0xff]  }
 0x163   :  { %5720 = vst [vmem:[#allocation13_spill] sm:$0xff] %v4116_v15 }
 0x164   :  { %793 = vmatmul.mubr.bf16.vlgmr.msra.gmra.mxu0 %v4058_v25  ;;  %834 = vmatmul.mubr.bf16.vlgmr.msra.gmra.mxu1 %v4058_v25 }
 0x165   :  { %1228 = vmatpush1.bf16.msra.mxu0 %v4054_v24  ;;  %1269 = vmatpush1.bf16.msra.mxu1 %v4056_v16 }
 0x166   :  { %1229 = vmatprep.subr.bf16.mxu0 %v4060_v26  ;;  %1270 = vmatprep.subr.bf16.mxu1 %v4062_v17 }
 0x167   :  { %1259 = vmatprep.mubr.bf16.mxu0 %v3828_v30  ;;  %1300 = vmatprep.mubr.bf16.mxu1 %v3828_v30  ;;  %v4118_v30 = vld [vmem:[#allocation8 + $0x48] ss:$16 sps:$4 sm:$0xff]  }
 0x168   :  { %5721 = vst [vmem:[#allocation14_spill] sm:$0xff] %v4118_v30 }
 0x169   :  { %1230 = vmatpush1.bf16.msra.mxu0 %v4068_v18  ;;  %1271 = vmatpush1.bf16.msra.mxu1 %v4070_v27 }
 0x16a   :  { %1231 = vmatprep.subr.bf16.mxu0 %v4074_v28  ;;  %1272 = vmatprep.subr.bf16.mxu1 %v4076_v29 }
 0x16d   :  { %1232 = vmatpush1.bf16.msra.mxu0 %v4080_v31  ;;  %1273 = vmatpush1.bf16.msra.mxu1 %v4082_v32 }
 0x16e   :  { %1233 = vmatprep.subr.bf16.mxu0 %v4086_v33  ;;  %1274 = vmatprep.subr.bf16.mxu1 %v4088_v34 }
 0x171   :  { %1234 = vmatpush1.bf16.msra.mxu0 %v4092_v35  ;;  %1275 = vmatpush1.bf16.msra.mxu1 %v4094_v38 }
 0x172   :  { %1235 = vmatprep.subr.bf16.mxu0 %v4098_v12  ;;  %1276 = vmatprep.subr.bf16.mxu1 %v4100_v19 }
 0x175   :  { %1236 = vmatpush1.bf16.msra.mxu0 %v4104_v20  ;;  %1277 = vmatpush1.bf16.msra.mxu1 %v4106_v22 }
 0x176   :  { %1237 = vmatprep.subr.bf16.mxu0 %v4110_v8  ;;  %1278 = vmatprep.subr.bf16.mxu1 %v4112_v21  ;;  %v4136_v8 = vld [vmem:[#allocation8 + $0xc] ss:$16 sps:$4 sm:$0xff]   ;;  %v4140_v21 = vld [vmem:[#allocation8] ss:$16 sps:$4 sm:$0xff]  }
 0x177   :  { %5727 = vst [vmem:[#allocation20_spill] sm:$0xff] %v4136_v8  ;;  %5728 = vst [vmem:[#allocation21_spill] sm:$0xff] %v4140_v21 }
 0x179   :  { %1238 = vmatpush1.bf16.msra.mxu0 %v4116_v15  ;;  %1279 = vmatpush1.bf16.msra.mxu1 %v4118_v30  ;;  %v4142_v15 = vld [vmem:[#allocation8 + $0x8] ss:$16 sps:$4 sm:$0xff]   ;;  %v4146_v30 = vld [vmem:[#allocation8 + $0x1e4] ss:$16 sps:$4 sm:$0xff]  }
 0x17a   :  { %1239 = vmatprep.subr.bf16.mxu0 %v4122_v11  ;;  %1280 = vmatprep.subr.bf16.mxu1 %v4124_v14  ;;  %5729 = vst [vmem:[#allocation22_spill] sm:$0xff] %v4142_v15  ;;  %5730 = vst [vmem:[#allocation23_spill] sm:$0xff] %v4146_v30  ;;  %v4148_v11 = vld [vmem:[#allocation8 + $0x1ec] ss:$16 sps:$4 sm:$0xff]   ;;  %v4152_v14 = vld [vmem:[#allocation8 + $0x1e0] ss:$16 sps:$4 sm:$0xff]  }
 0x17b   :  { %5731 = vst [vmem:[#allocation24_spill] sm:$0xff] %v4148_v11  ;;  %5732 = vst [vmem:[#allocation25_spill] sm:$0xff] %v4152_v14 }
 0x17d   :  { %1240 = vmatpush1.bf16.msra.mxu0 %v4128_v13  ;;  %1281 = vmatpush1.bf16.msra.mxu1 %v4130_v10  ;;  %v4154_v13 = vld [vmem:[#allocation8 + $0x1e8] ss:$16 sps:$4 sm:$0xff]   ;;  %v4158_v10 = vld [vmem:[#allocation8 + $0x1c4] ss:$16 sps:$4 sm:$0xff]  }
 0x17e   :  { %1241 = vmatprep.subr.bf16.mxu0 %v4134_v1  ;;  %1282 = vmatprep.subr.bf16.mxu1 %v4136_v8  ;;  %5733 = vst [vmem:[#allocation26_spill] sm:$0xff] %v4154_v13  ;;  %5734 = vst [vmem:[#allocation27_spill] sm:$0xff] %v4158_v10  ;;  %v4160_v1 = vld [vmem:[#allocation8 + $0x1cc] ss:$16 sps:$4 sm:$0xff]   ;;  %v4164_v8 = vld [vmem:[#allocation8 + $0x1c0] ss:$16 sps:$4 sm:$0xff]  }
 0x17f   :  { %5735 = vst [vmem:[#allocation28_spill] sm:$0xff] %v4160_v1  ;;  %5736 = vst [vmem:[#allocation29_spill] sm:$0xff] %v4164_v8 }
 0x181   :  { %1242 = vmatpush1.bf16.msra.mxu0 %v4140_v21  ;;  %1283 = vmatpush1.bf16.msra.mxu1 %v4142_v15  ;;  %v4166_v21 = vld [vmem:[#allocation8 + $0x1c8] ss:$16 sps:$4 sm:$0xff]   ;;  %v4170_v15 = vld [vmem:[#allocation8 + $0x1a4] ss:$16 sps:$4 sm:$0xff]  }
 0x182   :  { %1243 = vmatprep.subr.bf16.mxu0 %v4146_v30  ;;  %1284 = vmatprep.subr.bf16.mxu1 %v4148_v11  ;;  %5737 = vst [vmem:[#allocation30_spill] sm:$0xff] %v4166_v21  ;;  %5738 = vst [vmem:[#allocation31_spill] sm:$0xff] %v4170_v15  ;;  %v4172_v30 = vld [vmem:[#allocation8 + $0x1ac] ss:$16 sps:$4 sm:$0xff]   ;;  %v4176_v11 = vld [vmem:[#allocation8 + $0x1a0] ss:$16 sps:$4 sm:$0xff]  }
 0x183   :  { %5739 = vst [vmem:[#allocation32_spill] sm:$0xff] %v4172_v30  ;;  %5740 = vst [vmem:[#allocation33_spill] sm:$0xff] %v4176_v11 }
 0x185   :  { %1244 = vmatpush2.bf16.msra.mxu0 %v4152_v14  ;;  %1285 = vmatpush2.bf16.msra.mxu1 %v4154_v13  ;;  %v4178_v14 = vld [vmem:[#allocation8 + $0x1a8] ss:$16 sps:$4 sm:$0xff]   ;;  %v4182_v13 = vld [vmem:[#allocation8 + $0x184] ss:$16 sps:$4 sm:$0xff]  }
 0x186   :  { %1245 = vmatprep.subr.bf16.mxu0 %v4158_v10  ;;  %1286 = vmatprep.subr.bf16.mxu1 %v4160_v1  ;;  %5741 = vst [vmem:[#allocation34_spill] sm:$0xff] %v4178_v14  ;;  %5742 = vst [vmem:[#allocation35_spill] sm:$0xff] %v4182_v13  ;;  %v4184_v10 = vld [vmem:[#allocation8 + $0x18c] ss:$16 sps:$4 sm:$0xff]   ;;  %v4188_v1 = vld [vmem:[#allocation8 + $0x180] ss:$16 sps:$4 sm:$0xff]  }
 0x187   :  { %5743 = vst [vmem:[#allocation36_spill] sm:$0xff] %v4184_v10  ;;  %5744 = vst [vmem:[#allocation37_spill] sm:$0xff] %v4188_v1 }
 0x189   :  { %1246 = vmatpush2.bf16.msra.mxu0 %v4164_v8  ;;  %1287 = vmatpush2.bf16.msra.mxu1 %v4166_v21  ;;  %v4190_v8 = vld [vmem:[#allocation8 + $0x188] ss:$16 sps:$4 sm:$0xff]   ;;  %v4194_v21 = vld [vmem:[#allocation8 + $0x164] ss:$16 sps:$4 sm:$0xff]  }
 0x18a   :  { %1247 = vmatprep.subr.bf16.mxu0 %v4170_v15  ;;  %1288 = vmatprep.subr.bf16.mxu1 %v4172_v30  ;;  %5745 = vst [vmem:[#allocation38_spill] sm:$0xff] %v4190_v8  ;;  %5746 = vst [vmem:[#allocation39_spill] sm:$0xff] %v4194_v21  ;;  %v4196_v15 = vld [vmem:[#allocation8 + $0x16c] ss:$16 sps:$4 sm:$0xff]   ;;  %v4200_v30 = vld [vmem:[#allocation8 + $0x160] ss:$16 sps:$4 sm:$0xff]  }
 0x18b   :  { %5747 = vst [vmem:[#allocation40_spill] sm:$0xff] %v4196_v15  ;;  %5748 = vst [vmem:[#allocation41_spill] sm:$0xff] %v4200_v30 }
 0x18d   :  { %1248 = vmatpush2.bf16.msra.mxu0 %v4176_v11  ;;  %1289 = vmatpush2.bf16.msra.mxu1 %v4178_v14  ;;  %v4202_v11 = vld [vmem:[#allocation8 + $0x168] ss:$16 sps:$4 sm:$0xff]   ;;  %v4206_v14 = vld [vmem:[#allocation8 + $0x144] ss:$16 sps:$4 sm:$0xff]  }
 0x18e   :  { %1249 = vmatprep.subr.bf16.mxu0 %v4182_v13  ;;  %1290 = vmatprep.subr.bf16.mxu1 %v4184_v10  ;;  %5749 = vst [vmem:[#allocation42_spill] sm:$0xff] %v4202_v11  ;;  %5750 = vst [vmem:[#allocation43_spill] sm:$0xff] %v4206_v14  ;;  %v4208_v13 = vld [vmem:[#allocation8 + $0x14c] ss:$16 sps:$4 sm:$0xff]   ;;  %v4212_v10 = vld [vmem:[#allocation8 + $0x140] ss:$16 sps:$4 sm:$0xff]  }
 0x18f   :  { %5751 = vst [vmem:[#allocation44_spill] sm:$0xff] %v4208_v13  ;;  %5752 = vst [vmem:[#allocation45_spill] sm:$0xff] %v4212_v10 }
 0x191   :  { %1250 = vmatpush2.bf16.msra.mxu0 %v4188_v1  ;;  %1291 = vmatpush2.bf16.msra.mxu1 %v4190_v8  ;;  %v4214_v1 = vld [vmem:[#allocation8 + $0x148] ss:$16 sps:$4 sm:$0xff]   ;;  %v4218_v8 = vld [vmem:[#allocation8 + $0x124] ss:$16 sps:$4 sm:$0xff]  }
 0x192   :  { %1251 = vmatprep.subr.bf16.mxu0 %v4194_v21  ;;  %1292 = vmatprep.subr.bf16.mxu1 %v4196_v15  ;;  %5753 = vst [vmem:[#allocation46_spill] sm:$0xff] %v4214_v1  ;;  %5754 = vst [vmem:[#allocation47_spill] sm:$0xff] %v4218_v8  ;;  %v4220_v21 = vld [vmem:[#allocation8 + $0x12c] ss:$16 sps:$4 sm:$0xff]   ;;  %v4224_v15 = vld [vmem:[#allocation8 + $0x120] ss:$16 sps:$4 sm:$0xff]  }
 0x193   :  { %5755 = vst [vmem:[#allocation48_spill] sm:$0xff] %v4220_v21  ;;  %5756 = vst [vmem:[#allocation49_spill] sm:$0xff] %v4224_v15 }
 0x195   :  { %1252 = vmatpush2.bf16.msra.mxu0 %v4200_v30  ;;  %1293 = vmatpush2.bf16.msra.mxu1 %v4202_v11  ;;  %v4226_v30 = vld [vmem:[#allocation8 + $0x128] ss:$16 sps:$4 sm:$0xff]   ;;  %v4230_v11 = vld [vmem:[#allocation8 + $0x104] ss:$16 sps:$4 sm:$0xff]  }
 0x196   :  { %1253 = vmatprep.subr.bf16.mxu0 %v4206_v14  ;;  %1294 = vmatprep.subr.bf16.mxu1 %v4208_v13  ;;  %5757 = vst [vmem:[#allocation50_spill] sm:$0xff] %v4226_v30  ;;  %5758 = vst [vmem:[#allocation51_spill] sm:$0xff] %v4230_v11  ;;  %v4232_v14 = vld [vmem:[#allocation8 + $0x10c] ss:$16 sps:$4 sm:$0xff]   ;;  %v4236_v13 = vld [vmem:[#allocation8 + $0x100] ss:$16 sps:$4 sm:$0xff]  }
 0x197   :  { %5759 = vst [vmem:[#allocation52_spill] sm:$0xff] %v4232_v14  ;;  %5760 = vst [vmem:[#allocation53_spill] sm:$0xff] %v4236_v13 }
 0x199   :  { %1254 = vmatpush2.bf16.msra.mxu0 %v4212_v10  ;;  %1295 = vmatpush2.bf16.msra.mxu1 %v4214_v1  ;;  %v4238_v10 = vld [vmem:[#allocation8 + $0x108] ss:$16 sps:$4 sm:$0xff]  }
 0x19a   :  { %1255 = vmatprep.subr.bf16.mxu0 %v4218_v8  ;;  %1296 = vmatprep.subr.bf16.mxu1 %v4220_v21  ;;  %5761 = vst [vmem:[#allocation54_spill] sm:$0xff] %v4238_v10 }
 0x19d   :  { %1256 = vmatpush2.bf16.msra.mxu0 %v4224_v15  ;;  %1297 = vmatpush2.bf16.msra.mxu1 %v4226_v30 }
 0x19e   :  { %1257 = vmatprep.subr.bf16.mxu0 %v4230_v11  ;;  %1298 = vmatprep.subr.bf16.mxu1 %v4232_v14  ;;  %v5762_v14 = vmov 0  }
 0x1a1   :  { %1258 = vmatpush2.bf16.msra.mxu0 %v4236_v13  ;;  %1299 = vmatpush2.bf16.msra.mxu1 %v4238_v10 }
 0x1a2   :  { %1341 = vmatprep.subr.bf16.mxu0 %v3894_v36  ;;  %1382 = vmatprep.subr.bf16.mxu1 %v3896_v37 }
 0x1a4   :  { %1260 = vmatmul.mubr.bf16.vlgmr.msra.gmra.mxu0 %v4058_v25  ;;  %1301 = vmatmul.mubr.bf16.vlgmr.msra.gmra.mxu1 %v4058_v25  ;;  %v878_v25 = vrot.slane %v4051_v23, 6 }
 0x1a5   :  { %1342 = vmatpush1.bf16.msra.mxu0 %v3898_v39  ;;  %1383 = vmatpush1.bf16.msra.mxu1 %v3900_v40  ;;  %v755_v40 = vld [vmem:[#allocation2 + $0x30] sm:$0xc] }
 0x1a6   :  { %1343 = vmatprep.subr.bf16.mxu0 %v3902_v41  ;;  %1384 = vmatprep.subr.bf16.mxu1 %v3906_v42 }
 0x1a7   :  { %1373 = vmatprep.mubr.bf16.mxu0 %v5762_v14  ;;  %1414 = vmatprep.mubr.bf16.mxu1 %v5762_v14 }
 0x1a9   :  { %1344 = vmatpush1.bf16.msra.mxu0 %v3908_v43  ;;  %1385 = vmatpush1.bf16.msra.mxu1 %v3912_v44 }
 0x1aa   :  { %1345 = vmatprep.subr.bf16.mxu0 %v3916_v45  ;;  %1386 = vmatprep.subr.bf16.mxu1 %v3918_v46  ;;  %v756_v45 = vld [vmem:[#allocation2] sm:$0xc] }
 0x1ad   :  { %1346 = vmatpush1.bf16.msra.mxu0 %v3922_v47  ;;  %1387 = vmatpush1.bf16.msra.mxu1 %v3926_v48 }
 0x1ae   :  { %1347 = vmatprep.subr.bf16.mxu0 %v3928_v49  ;;  %1388 = vmatprep.subr.bf16.mxu1 %v3932_v50 }
 0x1b1   :  { %1348 = vmatpush1.bf16.msra.mxu0 %v3934_v51  ;;  %1389 = vmatpush1.bf16.msra.mxu1 %v3936_v52 }
 0x1b2   :  { %1349 = vmatprep.subr.bf16.mxu0 %v3938_v53  ;;  %1390 = vmatprep.subr.bf16.mxu1 %v3940_v54  ;;  %v758_v54 = vld [vmem:[#allocation2 + $0x10] sm:$0xc] }
 0x1b5   :  { %1350 = vmatpush1.bf16.msra.mxu0 %v3946_v55  ;;  %1391 = vmatpush1.bf16.msra.mxu1 %v3948_v56 }
 0x1b6   :  { %1351 = vmatprep.subr.bf16.mxu0 %v3950_v57  ;;  %1392 = vmatprep.subr.bf16.mxu1 %v3952_v58  ;;  %v757_v58 = vld [vmem:[#allocation2 + $0x18] sm:$0xc] }
 0x1b9   :  { %1352 = vmatpush1.bf16.msra.mxu0 %v3958_v59  ;;  %1393 = vmatpush1.bf16.msra.mxu1 %v3960_v60 }
 0x1ba   :  { %1353 = vmatprep.subr.bf16.mxu0 %v3962_v61  ;;  %1394 = vmatprep.subr.bf16.mxu1 %v3964_v62 }
 0x1bd   :  { %1354 = vmatpush1.bf16.msra.mxu0 %v3970_v63  ;;  %1395 = vmatpush1.bf16.msra.mxu1 %v3972_v0 }
 0x1be   :  { %1355 = vmatprep.subr.bf16.mxu0 %v3974_v2  ;;  %1396 = vmatprep.subr.bf16.mxu1 %v3976_v3 }
 0x1c1   :  { %1356 = vmatpush1.bf16.msra.mxu0 %v3982_v4  ;;  %1397 = vmatpush1.bf16.msra.mxu1 %v3984_v5 }
 0x1c2   :  { %1473 = vmatprep.subr.bf16.mxu0 %v4028_v6  ;;  %1514 = vmatprep.subr.bf16.mxu1 %v4030_v7 }
 0x224   :  { %v794_v36 = vpop.f32.mrf.mxu0  ;;  %v835_v37 = vpop.f32.mrf.mxu1 }
 0x225   :  { %v846_v39 = vrot.slane %v794_v36, 6  ;;  %v848_v56 = vrot.slane %v835_v37, 6 }
 0x226   :  { %v796_v41 = vpop.f32.mrf.mxu0  ;;  %v837_v42 = vpop.f32.mrf.mxu1 }
 0x227   :  { %v854_v43 = vadd.f32 %v846_v39, %v755_v40  ;;  %v847_v44 = vrot.slane %v796_v41, 6  ;;  %v849_v53 = vrot.slane %v837_v42, 6  ;;  %v856_v60 = vadd.f32 %v848_v56, %v757_v58 }
 0x228   :  { %v798_v46 = vpop.f32.mrf.mxu0  ;;  %v839_v47 = vpop.f32.mrf.mxu1 }
 0x229   :  { %v3000_v48 = vmul.f32 -1.442695, %v854_v43  ;;  %v855_v49 = vadd.f32 %v847_v44, %v756_v45  ;;  %v857_v55 = vadd.f32 %v849_v53, %v758_v54  ;;  %v480_v45 = vld [vmem:[%s5423_s5] sm:$0xf]  ;;  %v5763_v47 = vsub.s32 0, %v4034_v9 }
 0x22a   :  { %v799_v50 = vpop.f32.mrf.mxu0  ;;  %v840_v51 = vpop.f32.mrf.mxu1 }
 0x22b   :  { %3326 = vpow2.f32 %v3000_v48  ;;  %v3001_v52 = vmul.f32 -1.442695, %v855_v49  ;;  %v3002_v57 = vmul.f32 -1.442695, %v857_v55  ;;  %v4291_v23 = vrot.slane %v480_v45, %v5763_v47  ;;  %v5775_v47 = vld [vmem:[#allocation15_spill] sm:$0xff] }
 0x22c   :  { %v5765_v49 = vsub.s32 1, %v4034_v9 }
 0x22d   :  { %3328 = vpow2.f32 %v3001_v52  ;;  %5764 = vst [vmem:[#allocation55_spill] sm:$0xff] %v4291_v23 }
 0x22e   :  { %3330 = vpow2.f32 %v3002_v57  ;;  %v4297_v50 = vrot.slane %v480_v45, %v5765_v49  ;;  %v5776_v49 = vld [vmem:[#allocation16_spill] sm:$0xff] }
 0x230   :  { %5766 = vst [vmem:[#allocation56_spill] sm:$0xff] %v4297_v50 }
 0x238   :  { %v3327_v59 = vpop.eup %3326 }
 0x239   :  { %v861_v61 = vadd.f32 1.0, %v3327_v59 }
 0x23a   :  { %v3329_v62 = vpop.eup %3328 }
 0x23b   :  { %3332 = vrcp.f32 %v861_v61  ;;  %v867_v63 = vadd.f32 1.0, %v3329_v62  ;;  %v3331_v0 = vpop.eup %3330 }
 0x23c   :  { %3334 = vtanh.f32 %v856_v60  ;;  %v874_v39 = vadd.f32 1.0, %v3331_v0 }
 0x23d   :  { %3336 = vrcp.f32 %v867_v63  ;;  %v5767_v63 = vsub.s32 3, %v4034_v9 }
 0x23e   :  { %3338 = vrcp.f32 %v874_v39  ;;  %v5771_v39 = vld [vmem:[#allocation11_spill] sm:$0xff] }
 0x23f   :  { %v4313_v0 = vrot.slane %v480_v45, %v5767_v63  ;;  %v5788_v63 = vld [vmem:[#allocation28_spill] sm:$0xff] }
 0x241   :  { %5768 = vst [vmem:[#allocation57_spill] sm:$0xff] %v4313_v0 }
 0x248   :  { %v3333_v2 = vpop.eup %3332 }
 0x249   :  { %v3335_v3 = vpop.eup %3334 }
 0x24a   :  { %v3337_v36 = vpop.eup %3336  ;;  %v881_v40 = vmul.f32 %v3335_v3, %v3333_v2  ;;  %v5769_v3 = vsub.s32 2, %v4034_v9  ;;  %v5774_v9 = vld [vmem:[#allocation14_spill] sm:$0xff] }
 0x24b   :  { %v880_v37 = vmul.f32 %v3337_v36, %v878_v25  ;;  %v3339_v42 = vpop.eup %3338 }
 0x24c   :  { %v4326_v25 = vrot.slane %v480_v45, %v5769_v3 }
 0x24d   :  { %v4283_v41 = vadd.f32 %v881_v40, %v880_v37  ;;  %v5772_v40 = vld [vmem:[#allocation12_spill] sm:$0xff] }
 0x24e   :  { %5770 = vst [vmem:[#allocation58_spill] sm:$0xff] %v4326_v25 }
 0x24f   :  { %3340 = vtanh.f32 %v4283_v41 }
 0x25c   :  { %v3341_v43 = vpop.eup %3340 }
 0x25d   :  { %v884_v44 = vmul.f32 %v3341_v43, %v3339_v42 }
 0x25f   :  { %v1337_v46 = vpack.c.bf16 %v884_v44, %v884_v44 }
 0x261   :  { %v4293_v48 = vrot.slane %v1337_v46, 1  ;;  %v5773_v46 = vld [vmem:[#allocation13_spill] sm:$0xff] }
 0x263   :  { %1374 = vmatmul.mubr.bf16.vlgmr.msra.gmra.mxu0 %v4293_v48  ;;  %1415 = vmatmul.mubr.bf16.vlgmr.msra.gmra.mxu1 %v4293_v48 }
 0x264   :  { %v1261_v51 = vpop.f32.mrf.mxu0  ;;  %v1302_v52 = vpop.f32.mrf.mxu1  ;;  %1474 = vmatpush1.bf16.msra.mxu0 %v4054_v24  ;;  %1515 = vmatpush1.bf16.msra.mxu1 %v4056_v16 }
 0x265   :  { %v1262_v53 = vadd.f32 %v1261_v51, %v4291_v23  ;;  %1475 = vmatprep.subr.bf16.mxu0 %v4060_v26  ;;  %1516 = vmatprep.subr.bf16.mxu1 %v4062_v17  ;;  %v1303_v42 = vadd.f32 %v1302_v52, %v4326_v25  ;;  %v5777_v51 = vld [vmem:[#allocation17_spill] sm:$0xff]  ;;  %v5779_v52 = vld [vmem:[#allocation19_spill] sm:$0xff] }
 0x266   :  { %v1263_v54 = vpop.f32.mrf.mxu0  ;;  %v1304_v55 = vpop.f32.mrf.mxu1 }
 0x267   :  { %v3067_v56 = vmul.f32 -1.442695, %v1262_v53  ;;  %v1264_v57 = vadd.f32 %v1263_v54, %v4297_v50  ;;  %v1305_v2 = vadd.f32 %v1304_v55, %v4313_v0  ;;  %v5778_v53 = vld [vmem:[#allocation18_spill] sm:$0xff]  ;;  %v5780_v54 = vld [vmem:[#allocation20_spill] sm:$0xff]  ;;  %v5781_v55 = vld [vmem:[#allocation21_spill] sm:$0xff] }
 0x268   :  { %v1265_v58 = vpop.f32.mrf.mxu0  ;;  %v1306_v59 = vpop.f32.mrf.mxu1  ;;  %1476 = vmatpush1.bf16.msra.mxu0 %v4068_v18  ;;  %1517 = vmatpush1.bf16.msra.mxu1 %v4070_v27 }
 0x269   :  { %3342 = vpow2.f32 %v3067_v56  ;;  %v3068_v60 = vmul.f32 -1.442695, %v1264_v57  ;;  %1477 = vmatprep.subr.bf16.mxu0 %v4074_v28  ;;  %1518 = vmatprep.subr.bf16.mxu1 %v4076_v29  ;;  %v3069_v36 = vmul.f32 -1.442695, %v1305_v2  ;;  %v5782_v56 = vld [vmem:[#allocation22_spill] sm:$0xff]  ;;  %v5783_v57 = vld [vmem:[#allocation23_spill] sm:$0xff] }
 0x26a   :  { %v1266_v61 = vpop.f32.mrf.mxu0  ;;  %v1307_v62 = vpop.f32.mrf.mxu1  ;;  %v5784_v58 = vld [vmem:[#allocation24_spill] sm:$0xff]  ;;  %v5785_v59 = vld [vmem:[#allocation25_spill] sm:$0xff] }
 0x26b   :  { %3344 = vpow2.f32 %v3068_v60  ;;  %v5786_v60 = vld [vmem:[#allocation26_spill] sm:$0xff]  ;;  %v5787_v62 = vld [vmem:[#allocation27_spill] sm:$0xff] }
 0x26c   :  { %1478 = vmatpush1.bf16.msra.mxu0 %v4080_v31  ;;  %1519 = vmatpush1.bf16.msra.mxu1 %v4082_v32  ;;  %3346 = vpow2.f32 %v3069_v36 }
 0x26d   :  { %1479 = vmatprep.subr.bf16.mxu0 %v4086_v33  ;;  %1520 = vmatprep.subr.bf16.mxu1 %v4088_v34 }
 0x270   :  { %1480 = vmatpush1.bf16.msra.mxu0 %v4092_v35  ;;  %1521 = vmatpush1.bf16.msra.mxu1 %v4094_v38 }
 0x271   :  { %1481 = vmatprep.subr.bf16.mxu0 %v4098_v12  ;;  %1522 = vmatprep.subr.bf16.mxu1 %v4100_v19 }
 0x274   :  { %1482 = vmatpush1.bf16.msra.mxu0 %v4104_v20  ;;  %1523 = vmatpush1.bf16.msra.mxu1 %v4106_v22 }
 0x275   :  { %1483 = vmatprep.subr.bf16.mxu0 %v5771_v39  ;;  %1524 = vmatprep.subr.bf16.mxu1 %v5772_v40 }
 0x276   :  { %v3343_v37 = vpop.eup %3342 }
 0x277   :  { %v1312_v43 = vadd.f32 1.0, %v3343_v37 }
 0x278   :  { %v3345_v44 = vpop.eup %3344  ;;  %1484 = vmatpush1.bf16.msra.mxu0 %v5773_v46  ;;  %1525 = vmatpush1.bf16.msra.mxu1 %v5774_v9 }
 0x279   :  { %3348 = vrcp.f32 %v1312_v43  ;;  %v1318_v45 = vadd.f32 1.0, %v3345_v44  ;;  %1485 = vmatprep.subr.bf16.mxu0 %v5775_v47  ;;  %1526 = vmatprep.subr.bf16.mxu1 %v5776_v49  ;;  %v3347_v61 = vpop.eup %3346  ;;  %v5790_v43 = vld [vmem:[#allocation30_spill] sm:$0xff] }
 0x27a   :  { %3350 = vtanh.f32 %v1303_v42  ;;  %v1325_v37 = vadd.f32 1.0, %v3347_v61  ;;  %v5789_v42 = vld [vmem:[#allocation29_spill] sm:$0xff]  ;;  %v5795_v61 = vld [vmem:[#allocation35_spill] sm:$0xff] }
 0x27b   :  { %3352 = vrcp.f32 %v1318_v45 }
 0x27c   :  { %1486 = vmatpush1.bf16.msra.mxu0 %v5777_v51  ;;  %1527 = vmatpush1.bf16.msra.mxu1 %v5778_v53  ;;  %3354 = vrcp.f32 %v1325_v37  ;;  %v5802_v37 = vld [vmem:[#allocation42_spill] sm:$0xff] }
 0x27d   :  { %1487 = vmatprep.subr.bf16.mxu0 %v5779_v52  ;;  %1528 = vmatprep.subr.bf16.mxu1 %v5780_v54 }
 0x280   :  { %1488 = vmatpush1.bf16.msra.mxu0 %v5781_v55  ;;  %1529 = vmatpush1.bf16.msra.mxu1 %v5782_v56 }
 0x281   :  { %1489 = vmatprep.subr.bf16.mxu0 %v5783_v57  ;;  %1530 = vmatprep.subr.bf16.mxu1 %v5784_v58  ;;  %v5791_v58 = vld [vmem:[#allocation31_spill] sm:$0xff] }
 0x284   :  { %1490 = vmatpush2.bf16.msra.mxu0 %v5785_v59  ;;  %1531 = vmatpush2.bf16.msra.mxu1 %v5786_v60  ;;  %v5792_v59 = vld [vmem:[#allocation32_spill] sm:$0xff] }
 0x285   :  { %1491 = vmatprep.subr.bf16.mxu0 %v5787_v62  ;;  %1532 = vmatprep.subr.bf16.mxu1 %v5788_v63  ;;  %v5793_v62 = vld [vmem:[#allocation33_spill] sm:$0xff]  ;;  %v5794_v63 = vld [vmem:[#allocation34_spill] sm:$0xff] }
 0x286   :  { %v3349_v2 = vpop.eup %3348 }
 0x287   :  { %v3351_v3 = vpop.eup %3350 }
 0x288   :  { %v3353_v36 = vpop.eup %3352  ;;  %1492 = vmatpush2.bf16.msra.mxu0 %v5789_v42  ;;  %1533 = vmatpush2.bf16.msra.mxu1 %v5790_v43  ;;  %v1329_v45 = vmul.f32 %v3351_v3, %v3349_v2  ;;  %v5796_v42 = vld [vmem:[#allocation36_spill] sm:$0xff]  ;;  %v5797_v43 = vld [vmem:[#allocation37_spill] sm:$0xff]  ;;  %v5798_v2 = vld [vmem:[#allocation38_spill] sm:$0xff] }
 0x289   :  { %v1328_v44 = vmul.f32 0.0, %v3353_v36  ;;  %1493 = vmatprep.subr.bf16.mxu0 %v5791_v58  ;;  %1534 = vmatprep.subr.bf16.mxu1 %v5792_v59  ;;  %v5799_v3 = vld [vmem:[#allocation39_spill] sm:$0xff]  ;;  %v5800_v36 = vld [vmem:[#allocation40_spill] sm:$0xff] }
 0x28b   :  { %v4353_v60 = vadd.f32 %v1329_v45, %v1328_v44  ;;  %v5801_v44 = vld [vmem:[#allocation41_spill] sm:$0xff]  ;;  %v5803_v45 = vld [vmem:[#allocation43_spill] sm:$0xff] }
 0x28c   :  { %1494 = vmatpush2.bf16.msra.mxu0 %v5793_v62  ;;  %1535 = vmatpush2.bf16.msra.mxu1 %v5794_v63  ;;  %v5804_v63 = vld [vmem:[#allocation44_spill] sm:$0xff]  ;;  %v5805_v62 = vld [vmem:[#allocation45_spill] sm:$0xff] }
 0x28d   :  { %3356 = vtanh.f32 %v4353_v60  ;;  %1495 = vmatprep.subr.bf16.mxu0 %v5795_v61  ;;  %1536 = vmatprep.subr.bf16.mxu1 %v5796_v42  ;;  %v3355_v42 = vpop.eup %3354 }
 0x290   :  { %1496 = vmatpush2.bf16.msra.mxu0 %v5797_v43  ;;  %1537 = vmatpush2.bf16.msra.mxu1 %v5798_v2 }
 0x291   :  { %1497 = vmatprep.subr.bf16.mxu0 %v5799_v3  ;;  %1538 = vmatprep.subr.bf16.mxu1 %v5800_v36 }
 0x294   :  { %1498 = vmatpush2.bf16.msra.mxu0 %v5801_v44  ;;  %1539 = vmatpush2.bf16.msra.mxu1 %v5802_v37 }
 0x295   :  { %1499 = vmatprep.subr.bf16.mxu0 %v5803_v45  ;;  %1540 = vmatprep.subr.bf16.mxu1 %v5804_v63  ;;  %v5806_v45 = vld [vmem:[#allocation52_spill] sm:$0xff] }
 0x298   :  { %1500 = vmatpush2.bf16.msra.mxu0 %v5805_v62  ;;  %1541 = vmatpush2.bf16.msra.mxu1 %v4214_v1  ;;  %v1335_v62 = vld [vmem:[#allocation2 + $0x18] sm:$0x30] }
 0x299   :  { %1501 = vmatprep.subr.bf16.mxu0 %v4218_v8  ;;  %1542 = vmatprep.subr.bf16.mxu1 %v4220_v21  ;;  %v4378_v8 = vld [vmem:[#allocation6 + $0xe4] ss:$16 sps:$4 sm:$0xff]  }
 0x29a   :  { %v3357_v3 = vpop.eup %3356  ;;  %5807 = vst [vmem:[#allocation11_spill] sm:$0xff] %v4378_v8 }
 0x29b   :  { %v1332_v2 = vmul.f32 %v3357_v3, %v3355_v42  ;;  %v4381_v42 = vld [vmem:[#allocation6 + $0xec] ss:$16 sps:$4 sm:$0xff]   ;;  %v4392_v3 = vld [vmem:[#allocation6 + $0xc4] ss:$16 sps:$4 sm:$0xff]  }
 0x29c   :  { %1502 = vmatpush2.bf16.msra.mxu0 %v4224_v15  ;;  %1543 = vmatpush2.bf16.msra.mxu1 %v4226_v30  ;;  %5808 = vst [vmem:[#allocation12_spill] sm:$0xff] %v4381_v42  ;;  %5811 = vst [vmem:[#allocation15_spill] sm:$0xff] %v4392_v3 }
 0x29d   :  { %1503 = vmatprep.subr.bf16.mxu0 %v4230_v11  ;;  %1544 = vmatprep.subr.bf16.mxu1 %v5806_v45  ;;  %v1467_v63 = vrot.slane %v1332_v2, 6  ;;  %v4389_v2 = vld [vmem:[#allocation6 + $0xe8] ss:$16 sps:$4 sm:$0xff]  }
 0x29e   :  { %5810 = vst [vmem:[#allocation14_spill] sm:$0xff] %v4389_v2 }
 0x29f   :  { %v1469_v37 = vpack.c.bf16 %v1467_v63, %v1467_v63  ;;  %v4386_v63 = vld [vmem:[#allocation6 + $0xe0] ss:$16 sps:$4 sm:$0xff]  }
 0x2a0   :  { %1504 = vmatpush2.bf16.msra.mxu0 %v4236_v13  ;;  %1545 = vmatpush2.bf16.msra.mxu1 %v4238_v10  ;;  %5809 = vst [vmem:[#allocation13_spill] sm:$0xff] %v4386_v63  ;;  %v1334_v10 = vld [vmem:[#allocation2] sm:$0x30] }
 0x2a1   :  { %v1471_v1 = vrot.slane %v1469_v37, 1  ;;  %1587 = vmatprep.subr.bf16.mxu0 %v4378_v8  ;;  %1628 = vmatprep.subr.bf16.mxu1 %v4381_v42  ;;  %v4395_v37 = vld [vmem:[#allocation6 + $0xcc] ss:$16 sps:$4 sm:$0xff]  }
 0x2a2   :  { %5812 = vst [vmem:[#allocation16_spill] sm:$0xff] %v4395_v37 }
 0x2a3   :  { %1505 = vmatprep.mubr.bf16.mxu0 %v1471_v1  ;;  %1546 = vmatprep.mubr.bf16.mxu1 %v1471_v1  ;;  %v4400_v1 = vld [vmem:[#allocation6 + $0xc0] ss:$16 sps:$4 sm:$0xff]  }
 0x2a4   :  { %1506 = vmatmul.mubr.bf16.vlgmr.msra.gmra.mxu0 %v4293_v48  ;;  %1547 = vmatmul.mubr.bf16.vlgmr.msra.gmra.mxu1 %v4293_v48  ;;  %5813 = vst [vmem:[#allocation17_spill] sm:$0xff] %v4400_v1  ;;  %v4403_v48 = vld [vmem:[#allocation6 + $0xc8] ss:$16 sps:$4 sm:$0xff]  }
 0x2a5   :  { %1588 = vmatpush1.bf16.msra.mxu0 %v4386_v63  ;;  %1629 = vmatpush1.bf16.msra.mxu1 %v4389_v2  ;;  %5814 = vst [vmem:[#allocation18_spill] sm:$0xff] %v4403_v48  ;;  %v4406_v2 = vld [vmem:[#allocation6 + $0xa4] ss:$16 sps:$4 sm:$0xff]  }
 0x2a6   :  { %1589 = vmatprep.subr.bf16.mxu0 %v4392_v3  ;;  %1630 = vmatprep.subr.bf16.mxu1 %v4395_v37  ;;  %5815 = vst [vmem:[#allocation19_spill] sm:$0xff] %v4406_v2  ;;  %v4409_v3 = vld [vmem:[#allocation6 + $0xac] ss:$16 sps:$4 sm:$0xff]   ;;  %v4412_v37 = vld [vmem:[#allocation6 + $0xa0] ss:$16 sps:$4 sm:$0xff]  }
 0x2a7   :  { %1619 = vmatprep.mubr.bf16.mxu0 %v5762_v14  ;;  %1660 = vmatprep.mubr.bf16.mxu1 %v5762_v14  ;;  %5816 = vst [vmem:[#allocation20_spill] sm:$0xff] %v4409_v3  ;;  %5817 = vst [vmem:[#allocation21_spill] sm:$0xff] %v4412_v37  ;;  %v4415_v14 = vld [vmem:[#allocation6 + $0xa8] ss:$16 sps:$4 sm:$0xff]  }
 0x2a8   :  { %5818 = vst [vmem:[#allocation22_spill] sm:$0xff] %v4415_v14 }
 0x2a9   :  { %1590 = vmatpush1.bf16.msra.mxu0 %v4400_v1  ;;  %1631 = vmatpush1.bf16.msra.mxu1 %v4403_v48  ;;  %v4418_v1 = vld [vmem:[#allocation6 + $0x84] ss:$16 sps:$4 sm:$0xff]   ;;  %v4421_v48 = vld [vmem:[#allocation6 + $0x8c] ss:$16 sps:$4 sm:$0xff]  }
 0x2aa   :  { %1591 = vmatprep.subr.bf16.mxu0 %v4406_v2  ;;  %1632 = vmatprep.subr.bf16.mxu1 %v4409_v3  ;;  %5819 = vst [vmem:[#allocation23_spill] sm:$0xff] %v4418_v1  ;;  %5820 = vst [vmem:[#allocation31_spill] sm:$0xff] %v4421_v48  ;;  %v4424_v2 = vld [vmem:[#allocation6 + $0x80] ss:$16 sps:$4 sm:$0xff]   ;;  %v4427_v3 = vld [vmem:[#allocation6 + $0x88] ss:$16 sps:$4 sm:$0xff]  }
 0x2ab   :  { %5821 = vst [vmem:[#allocation32_spill] sm:$0xff] %v4424_v2  ;;  %5822 = vst [vmem:[#allocation35_spill] sm:$0xff] %v4427_v3 }
 0x2ad   :  { %1592 = vmatpush1.bf16.msra.mxu0 %v4412_v37  ;;  %1633 = vmatpush1.bf16.msra.mxu1 %v4415_v14  ;;  %v4430_v37 = vld [vmem:[#allocation6 + $0x64] ss:$16 sps:$4 sm:$0xff]   ;;  %v4433_v14 = vld [vmem:[#allocation6 + $0x6c] ss:$16 sps:$4 sm:$0xff]  }
 0x2ae   :  { %1593 = vmatprep.subr.bf16.mxu0 %v4418_v1  ;;  %1634 = vmatprep.subr.bf16.mxu1 %v4421_v48  ;;  %5823 = vst [vmem:[#allocation37_spill] sm:$0xff] %v4430_v37  ;;  %5824 = vst [vmem:[#allocation59_spill] sm:$0xff] %v4433_v14  ;;  %v4436_v1 = vld [vmem:[#allocation6 + $0x60] ss:$16 sps:$4 sm:$0xff]   ;;  %v4439_v48 = vld [vmem:[#allocation6 + $0x68] ss:$16 sps:$4 sm:$0xff]  }
 0x2af   :  { %5825 = vst [vmem:[#allocation60_spill] sm:$0xff] %v4436_v1  ;;  %5826 = vst [vmem:[#allocation61_spill] sm:$0xff] %v4439_v48 }
 0x2b1   :  { %1594 = vmatpush1.bf16.msra.mxu0 %v4424_v2  ;;  %1635 = vmatpush1.bf16.msra.mxu1 %v4427_v3  ;;  %v4442_v2 = vld [vmem:[#allocation6 + $0x44] ss:$16 sps:$4 sm:$0xff]   ;;  %v4445_v3 = vld [vmem:[#allocation6 + $0x4c] ss:$16 sps:$4 sm:$0xff]  }
 0x2b2   :  { %1595 = vmatprep.subr.bf16.mxu0 %v4430_v37  ;;  %1636 = vmatprep.subr.bf16.mxu1 %v4433_v14  ;;  %5827 = vst [vmem:[#allocation62_spill] sm:$0xff] %v4442_v2  ;;  %5828 = vst [vmem:[#allocation63_spill] sm:$0xff] %v4445_v3  ;;  %v4448_v37 = vld [vmem:[#allocation6 + $0x40] ss:$16 sps:$4 sm:$0xff]   ;;  %v4451_v14 = vld [vmem:[#allocation6 + $0x48] ss:$16 sps:$4 sm:$0xff]  }
 0x2b3   :  { %5829 = vst [vmem:[#allocation64_spill] sm:$0xff] %v4448_v37  ;;  %5830 = vst [vmem:[#allocation65_spill] sm:$0xff] %v4451_v14 }
 0x2b5   :  { %1596 = vmatpush1.bf16.msra.mxu0 %v4436_v1  ;;  %1637 = vmatpush1.bf16.msra.mxu1 %v4439_v48  ;;  %v4454_v1 = vld [vmem:[#allocation6 + $0x24] ss:$16 sps:$4 sm:$0xff]   ;;  %v4457_v48 = vld [vmem:[#allocation6 + $0x2c] ss:$16 sps:$4 sm:$0xff]  }
 0x2b6   :  { %1597 = vmatprep.subr.bf16.mxu0 %v4442_v2  ;;  %1638 = vmatprep.subr.bf16.mxu1 %v4445_v3  ;;  %5831 = vst [vmem:[#allocation66_spill] sm:$0xff] %v4454_v1  ;;  %5832 = vst [vmem:[#allocation67_spill] sm:$0xff] %v4457_v48  ;;  %v4460_v2 = vld [vmem:[#allocation6 + $0x20] ss:$16 sps:$4 sm:$0xff]   ;;  %v4463_v3 = vld [vmem:[#allocation6 + $0x28] ss:$16 sps:$4 sm:$0xff]  }
 0x2b7   :  { %5833 = vst [vmem:[#allocation68_spill] sm:$0xff] %v4460_v2  ;;  %5834 = vst [vmem:[#allocation69_spill] sm:$0xff] %v4463_v3 }
 0x2b9   :  { %1598 = vmatpush1.bf16.msra.mxu0 %v4448_v37  ;;  %1639 = vmatpush1.bf16.msra.mxu1 %v4451_v14  ;;  %v4466_v37 = vld [vmem:[#allocation6 + $0x4] ss:$16 sps:$4 sm:$0xff]   ;;  %v4469_v14 = vld [vmem:[#allocation6 + $0xc] ss:$16 sps:$4 sm:$0xff]  }
 0x2ba   :  { %1599 = vmatprep.subr.bf16.mxu0 %v4454_v1  ;;  %1640 = vmatprep.subr.bf16.mxu1 %v4457_v48  ;;  %5835 = vst [vmem:[#allocation70_spill] sm:$0xff] %v4466_v37  ;;  %5836 = vst [vmem:[#allocation71_spill] sm:$0xff] %v4469_v14 }
 0x2bd   :  { %1600 = vmatpush1.bf16.msra.mxu0 %v4460_v2  ;;  %1641 = vmatpush1.bf16.msra.mxu1 %v4463_v3  ;;  %v1333_v3 = vld [vmem:[#allocation2 + $0x30] sm:$0x30] }
 0x2be   :  { %1601 = vmatprep.subr.bf16.mxu0 %v4466_v37  ;;  %1642 = vmatprep.subr.bf16.mxu1 %v4469_v14 }
 0x2c1   :  { %1602 = vmatpush1.bf16.msra.mxu0 %v3982_v4  ;;  %1643 = vmatpush1.bf16.msra.mxu1 %v3984_v5 }
 0x2c2   :  { %1719 = vmatprep.subr.bf16.mxu0 %v4028_v6  ;;  %1760 = vmatprep.subr.bf16.mxu1 %v4030_v7  ;;  %v1336_v7 = vld [vmem:[#allocation2 + $0x10] sm:$0x30] }
 0x323   :  { %v1375_v2 = vpop.f32.mrf.mxu0  ;;  %v1416_v48 = vpop.f32.mrf.mxu1 }
 0x324   :  { %v1427_v1 = vrot.slane %v1375_v2, 4  ;;  %v1429_v21 = vrot.slane %v1416_v48, 4 }
 0x325   :  { %v1377_v63 = vpop.f32.mrf.mxu0  ;;  %v1418_v42 = vpop.f32.mrf.mxu1 }
 0x326   :  { %v1435_v8 = vadd.f32 %v1427_v1, %v1333_v3  ;;  %v1428_v37 = vrot.slane %v1377_v63, 4  ;;  %v1430_v6 = vrot.slane %v1418_v42, 4  ;;  %v1437_v36 = vadd.f32 %v1429_v21, %v1335_v62 }
 0x327   :  { %v1379_v13 = vpop.f32.mrf.mxu0  ;;  %v1420_v45 = vpop.f32.mrf.mxu1 }
 0x328   :  { %v3070_v14 = vmul.f32 -1.442695, %v1435_v8  ;;  %v1436_v11 = vadd.f32 %v1428_v37, %v1334_v10  ;;  %v1438_v15 = vadd.f32 %v1430_v6, %v1336_v7 }
 0x329   :  { %v1380_v4 = vpop.f32.mrf.mxu0  ;;  %v1421_v30 = vpop.f32.mrf.mxu1 }
 0x32a   :  { %3358 = vpow2.f32 %v3070_v14  ;;  %v3071_v5 = vmul.f32 -1.442695, %v1436_v11  ;;  %v3072_v2 = vmul.f32 -1.442695, %v1438_v15  ;;  %v1459_v11 = vrot.slane %v4283_v41, 6 }
 0x32c   :  { %3360 = vpow2.f32 %v3071_v5 }
 0x32d   :  { %3362 = vpow2.f32 %v3072_v2 }
 0x337   :  { %v3359_v44 = vpop.eup %3358 }
 0x338   :  { %v1442_v3 = vadd.f32 1.0, %v3359_v44 }
 0x339   :  { %v3361_v63 = vpop.eup %3360 }
 0x33a   :  { %3364 = vrcp.f32 %v1442_v3  ;;  %v1448_v13 = vadd.f32 1.0, %v3361_v63  ;;  %v3363_v10 = vpop.eup %3362  ;;  %v5852_v63 = vld [vmem:[#allocation43_spill] sm:$0xff] }
 0x33b   :  { %3366 = vtanh.f32 %v1437_v36  ;;  %v1455_v45 = vadd.f32 1.0, %v3363_v10  ;;  %v5855_v10 = vld [vmem:[#allocation46_spill] sm:$0xff] }
 0x33c   :  { %3368 = vrcp.f32 %v1448_v13  ;;  %v5853_v13 = vld [vmem:[#allocation44_spill] sm:$0xff] }
 0x33d   :  { %3370 = vrcp.f32 %v1455_v45  ;;  %v5859_v45 = vld [vmem:[#allocation50_spill] sm:$0xff] }
 0x347   :  { %v3365_v8 = vpop.eup %3364 }
 0x348   :  { %v3367_v14 = vpop.eup %3366 }
 0x349   :  { %v3369_v30 = vpop.eup %3368  ;;  %v1462_v42 = vmul.f32 %v3367_v14, %v3365_v8  ;;  %v5856_v8 = vld [vmem:[#allocation47_spill] sm:$0xff] }
 0x34a   :  { %v1461_v37 = vmul.f32 %v3369_v30, %v1459_v11  ;;  %v3371_v21 = vpop.eup %3370  ;;  %v5858_v30 = vld [vmem:[#allocation49_spill] sm:$0xff] }
 0x34c   :  { %v4477_v15 = vadd.f32 %v1462_v42, %v1461_v37  ;;  %v5860_v37 = vld [vmem:[#allocation51_spill] sm:$0xff] }
 0x34e   :  { %3372 = vtanh.f32 %v4477_v15 }
 0x35b   :  { %v3373_v62 = vpop.eup %3372 }
 0x35c   :  { %v1465_v44 = vmul.f32 %v3373_v62, %v3371_v21  ;;  %v5861_v21 = vld [vmem:[#allocation52_spill] sm:$0xff] }
 0x35e   :  { %v1583_v1 = vpack.c.bf16 %v1465_v44, %v1465_v44  ;;  %v5862_v44 = vld [vmem:[#allocation53_spill] sm:$0xff] }
 0x360   :  { %v4480_v36 = vrot.slane %v1583_v1, 2  ;;  %v5863_v1 = vld [vmem:[#allocation54_spill] sm:$0xff] }
 0x362   :  { %1620 = vmatmul.mubr.bf16.vlgmr.msra.gmra.mxu0 %v4480_v36  ;;  %1661 = vmatmul.mubr.bf16.vlgmr.msra.gmra.mxu1 %v4480_v36 }
 0x363   :  { %1720 = vmatpush1.bf16.msra.mxu0 %v4054_v24  ;;  %1761 = vmatpush1.bf16.msra.mxu1 %v4056_v16 }
 0x364   :  { %v1507_v41 = vpop.f32.mrf.mxu0  ;;  %v1548_v48 = vpop.f32.mrf.mxu1  ;;  %1721 = vmatprep.subr.bf16.mxu0 %v4060_v26  ;;  %1762 = vmatprep.subr.bf16.mxu1 %v4062_v17 }
 0x365   :  { %v1508_v4 = vadd.f32 %v1507_v41, %v4291_v23 }
 0x366   :  { %v1509_v5 = vpop.f32.mrf.mxu0  ;;  %v1550_v6 = vpop.f32.mrf.mxu1 }
 0x367   :  { %v3073_v7 = vmul.f32 -1.442695, %v1508_v4  ;;  %v1510_v2 = vadd.f32 %v1509_v5, %v4297_v50  ;;  %1722 = vmatpush1.bf16.msra.mxu0 %v4068_v18  ;;  %1763 = vmatpush1.bf16.msra.mxu1 %v4070_v27  ;;  %v1551_v18 = vadd.f32 %v1550_v6, %v4313_v0  ;;  %v5865_v4 = vld [vmem:[#allocation12_spill] sm:$0xff]  ;;  %v5866_v6 = vld [vmem:[#allocation13_spill] sm:$0xff] }
 0x368   :  { %v1511_v24 = vpop.f32.mrf.mxu0  ;;  %v1552_v3 = vpop.f32.mrf.mxu1  ;;  %1723 = vmatprep.subr.bf16.mxu0 %v4074_v28  ;;  %1764 = vmatprep.subr.bf16.mxu1 %v4076_v29  ;;  %v1549_v29 = vadd.f32 %v1548_v48, %v4326_v25  ;;  %v5864_v48 = vld [vmem:[#allocation11_spill] sm:$0xff] }
 0x369   :  { %3374 = vpow2.f32 %v3073_v7  ;;  %v3074_v16 = vmul.f32 -1.442695, %v1510_v2  ;;  %v3075_v27 = vmul.f32 -1.442695, %v1551_v18  ;;  %v5867_v7 = vld [vmem:[#allocation14_spill] sm:$0xff]  ;;  %v5868_v2 = vld [vmem:[#allocation15_spill] sm:$0xff] }
 0x36a   :  { %v1512_v26 = vpop.f32.mrf.mxu0  ;;  %v1553_v17 = vpop.f32.mrf.mxu1  ;;  %v5869_v24 = vld [vmem:[#allocation16_spill] sm:$0xff]  ;;  %v5870_v3 = vmov 0  }
 0x36b   :  { %3376 = vpow2.f32 %v3074_v16  ;;  %1724 = vmatpush1.bf16.msra.mxu0 %v4080_v31  ;;  %1765 = vmatpush1.bf16.msra.mxu1 %v4082_v32  ;;  %v5871_v16 = vld [vmem:[#allocation17_spill] sm:$0xff]  ;;  %v5872_v26 = vld [vmem:[#allocation18_spill] sm:$0xff]  ;;  %v5873_v17 = vld [vmem:[#allocation19_spill] sm:$0xff] }
 0x36c   :  { %1725 = vmatprep.subr.bf16.mxu0 %v4086_v33  ;;  %1766 = vmatprep.subr.bf16.mxu1 %v4088_v34  ;;  %3378 = vpow2.f32 %v3075_v27  ;;  %v5837_v34 = vld [vmem:[#allocation24_spill] sm:$0xff]  ;;  %v5876_v27 = vld [vmem:[#allocation22_spill] sm:$0xff] }
 0x36d   :  { %v5874_v18 = vld [vmem:[#allocation20_spill] sm:$0xff] }
 0x36f   :  { %1726 = vmatpush1.bf16.msra.mxu0 %v4092_v35  ;;  %1767 = vmatpush1.bf16.msra.mxu1 %v4094_v38  ;;  %v5838_v35 = vld [vmem:[#allocation25_spill] sm:$0xff]  ;;  %v5839_v38 = vld [vmem:[#allocation26_spill] sm:$0xff] }
 0x370   :  { %1727 = vmatprep.subr.bf16.mxu0 %v4098_v12  ;;  %1768 = vmatprep.subr.bf16.mxu1 %v4100_v19  ;;  %v5840_v12 = vld [vmem:[#allocation27_spill] sm:$0xff]  ;;  %v5841_v19 = vld [vmem:[#allocation28_spill] sm:$0xff] }
 0x373   :  { %1728 = vmatpush1.bf16.msra.mxu0 %v4104_v20  ;;  %1769 = vmatpush1.bf16.msra.mxu1 %v4106_v22 }
 0x374   :  { %1729 = vmatprep.subr.bf16.mxu0 %v5771_v39  ;;  %1770 = vmatprep.subr.bf16.mxu1 %v5772_v40  ;;  %v5842_v40 = vld [vmem:[#allocation29_spill] sm:$0xff] }
 0x376   :  { %v3375_v28 = vpop.eup %3374 }
 0x377   :  { %v1558_v31 = vadd.f32 1.0, %v3375_v28  ;;  %1730 = vmatpush1.bf16.msra.mxu0 %v5773_v46  ;;  %1771 = vmatpush1.bf16.msra.mxu1 %v5774_v9  ;;  %v5843_v46 = vld [vmem:[#allocation30_spill] sm:$0xff]  ;;  %v5877_v28 = vld [vmem:[#allocation23_spill] sm:$0xff] }
 0x378   :  { %v3377_v32 = vpop.eup %3376  ;;  %1731 = vmatprep.subr.bf16.mxu0 %v5775_v47  ;;  %1772 = vmatprep.subr.bf16.mxu1 %v5776_v49 }
 0x379   :  { %3380 = vrcp.f32 %v1558_v31  ;;  %v1564_v33 = vadd.f32 1.0, %v3377_v32  ;;  %v3379_v20 = vpop.eup %3378  ;;  %v5879_v31 = vld [vmem:[#allocation32_spill] sm:$0xff]  ;;  %v5880_v32 = vld [vmem:[#allocation35_spill] sm:$0xff] }
 0x37a   :  { %3382 = vtanh.f32 %v1549_v29  ;;  %v1571_v47 = vadd.f32 1.0, %v3379_v20  ;;  %v5878_v29 = vld [vmem:[#allocation31_spill] sm:$0xff]  ;;  %v5887_v20 = vld [vmem:[#allocation64_spill] sm:$0xff] }
 0x37b   :  { %3384 = vrcp.f32 %v1564_v33  ;;  %1732 = vmatpush1.bf16.msra.mxu0 %v5777_v51  ;;  %1773 = vmatpush1.bf16.msra.mxu1 %v5778_v53  ;;  %v5844_v53 = vld [vmem:[#allocation33_spill] sm:$0xff] }
 0x37c   :  { %1733 = vmatprep.subr.bf16.mxu0 %v5779_v52  ;;  %1774 = vmatprep.subr.bf16.mxu1 %v5780_v54  ;;  %v5845_v52 = vld [vmem:[#allocation34_spill] sm:$0xff]  ;;  %3386 = vrcp.f32 %v1571_v47  ;;  %v5881_v33 = vld [vmem:[#allocation37_spill] sm:$0xff] }
 0x37d   :  { %v5893_v47 = vld [vmem:[#allocation70_spill] sm:$0xff] }
 0x37f   :  { %1734 = vmatpush1.bf16.msra.mxu0 %v5781_v55  ;;  %1775 = vmatpush1.bf16.msra.mxu1 %v5782_v56  ;;  %v5846_v55 = vld [vmem:[#allocation36_spill] sm:$0xff]  ;;  %v5847_v56 = vld [vmem:[#allocation38_spill] sm:$0xff] }
 0x380   :  { %1735 = vmatprep.subr.bf16.mxu0 %v5783_v57  ;;  %1776 = vmatprep.subr.bf16.mxu1 %v5837_v34  ;;  %v5848_v57 = vld [vmem:[#allocation39_spill] sm:$0xff] }
 0x381   :  { %v5882_v34 = vld [vmem:[#allocation59_spill] sm:$0xff] }
 0x383   :  { %1736 = vmatpush2.bf16.msra.mxu0 %v5838_v35  ;;  %1777 = vmatpush2.bf16.msra.mxu1 %v5839_v38  ;;  %v5883_v35 = vld [vmem:[#allocation60_spill] sm:$0xff]  ;;  %v5884_v38 = vld [vmem:[#allocation61_spill] sm:$0xff] }
 0x384   :  { %1737 = vmatprep.subr.bf16.mxu0 %v5840_v12  ;;  %1778 = vmatprep.subr.bf16.mxu1 %v5841_v19  ;;  %v5885_v12 = vld [vmem:[#allocation62_spill] sm:$0xff]  ;;  %v5886_v19 = vld [vmem:[#allocation63_spill] sm:$0xff] }
 0x386   :  { %v3381_v22 = vpop.eup %3380 }
 0x387   :  { %v3383_v39 = vpop.eup %3382  ;;  %1738 = vmatpush2.bf16.msra.mxu0 %v5842_v40  ;;  %1779 = vmatpush2.bf16.msra.mxu1 %v5843_v46  ;;  %v5890_v40 = vld [vmem:[#allocation67_spill] sm:$0xff]  ;;  %v5891_v46 = vld [vmem:[#allocation68_spill] sm:$0xff] }
 0x388   :  { %v3385_v9 = vpop.eup %3384  ;;  %1739 = vmatprep.subr.bf16.mxu0 %v5791_v58  ;;  %1780 = vmatprep.subr.bf16.mxu1 %v5792_v59  ;;  %v1575_v49 = vmul.f32 %v3383_v39, %v3381_v22  ;;  %v5849_v58 = vld [vmem:[#allocation40_spill] sm:$0xff]  ;;  %v5850_v59 = vld [vmem:[#allocation41_spill] sm:$0xff]  ;;  %v5889_v39 = vld [vmem:[#allocation66_spill] sm:$0xff] }
 0x389   :  { %v1574_v51 = vmul.f32 %v3385_v9, %v4353_v60  ;;  %v5851_v60 = vld [vmem:[#allocation42_spill] sm:$0xff]  ;;  %v3387_v14 = vpop.eup %3386  ;;  %v5888_v22 = vld [vmem:[#allocation65_spill] sm:$0xff] }
 0x38a   :  { %v5892_v9 = vld [vmem:[#allocation69_spill] sm:$0xff] }
 0x38b   :  { %1740 = vmatpush2.bf16.msra.mxu0 %v5844_v53  ;;  %1781 = vmatpush2.bf16.msra.mxu1 %v5845_v52  ;;  %v4531_v54 = vadd.f32 %v1575_v49, %v1574_v51  ;;  %v5894_v49 = vld [vmem:[#allocation71_spill] sm:$0xff]  ;;  %v4591_v53 = vld [vmem:[#allocation6 + $0x8] ss:$16 sps:$4 sm:$0xff]  }
 0x38c   :  { %1741 = vmatprep.subr.bf16.mxu0 %v5795_v61  ;;  %1782 = vmatprep.subr.bf16.mxu1 %v5846_v55  ;;  %v5854_v61 = vld [vmem:[#allocation45_spill] sm:$0xff]  ;;  %v4597_v55 = vld [vmem:[#allocation8 + $0xec] ss:$16 sps:$4 sm:$0xff]  }
 0x38d   :  { %3388 = vtanh.f32 %v4531_v54  ;;  %v4588_v51 = vld [vmem:[#allocation6] ss:$16 sps:$4 sm:$0xff]   ;;  %v4594_v52 = vld [vmem:[#allocation8 + $0xe4] ss:$16 sps:$4 sm:$0xff]  }
 0x38f   :  { %1742 = vmatpush2.bf16.msra.mxu0 %v5797_v43  ;;  %1783 = vmatpush2.bf16.msra.mxu1 %v5847_v56  ;;  %v5857_v43 = vld [vmem:[#allocation48_spill] sm:$0xff] }
 0x390   :  { %1743 = vmatprep.subr.bf16.mxu0 %v5848_v57  ;;  %1784 = vmatprep.subr.bf16.mxu1 %v5849_v58 }
 0x393   :  { %1744 = vmatpush2.bf16.msra.mxu0 %v5850_v59  ;;  %1785 = vmatpush2.bf16.msra.mxu1 %v5851_v60  ;;  %v1579_v59 = vld [vmem:[#allocation2 + $0x30] sm:$0xc0] }
 0x394   :  { %1745 = vmatprep.subr.bf16.mxu0 %v5852_v63  ;;  %1786 = vmatprep.subr.bf16.mxu1 %v5853_v13 }
 0x397   :  { %1746 = vmatpush2.bf16.msra.mxu0 %v5854_v61  ;;  %1787 = vmatpush2.bf16.msra.mxu1 %v5855_v10  ;;  %v1580_v10 = vld [vmem:[#allocation2] sm:$0xc0] }
 0x398   :  { %1747 = vmatprep.subr.bf16.mxu0 %v5856_v8  ;;  %1788 = vmatprep.subr.bf16.mxu1 %v5857_v43 }
 0x39a   :  { %v3389_v11 = vpop.eup %3388 }
 0x39b   :  { %1748 = vmatpush2.bf16.msra.mxu0 %v5858_v30  ;;  %1789 = vmatpush2.bf16.msra.mxu1 %v5859_v45  ;;  %v1578_v42 = vmul.f32 %v3389_v11, %v3387_v14 }
 0x39c   :  { %1749 = vmatprep.subr.bf16.mxu0 %v5860_v37  ;;  %1790 = vmatprep.subr.bf16.mxu1 %v5861_v21  ;;  %v1582_v21 = vld [vmem:[#allocation2 + $0x10] sm:$0xc0] }
 0x39d   :  { %v1713_v62 = vrot.slane %v1578_v42, 4 }
 0x39f   :  { %1750 = vmatpush2.bf16.msra.mxu0 %v5862_v44  ;;  %1791 = vmatpush2.bf16.msra.mxu1 %v5863_v1  ;;  %v1715_v41 = vpack.c.bf16 %v1713_v62, %v1713_v62 }
 0x3a0   :  { %1833 = vmatprep.subr.bf16.mxu0 %v5864_v48  ;;  %1874 = vmatprep.subr.bf16.mxu1 %v5865_v4 }
 0x3a1   :  { %v1717_v5 = vrot.slane %v1715_v41, 2  ;;  %v1581_v41 = vld [vmem:[#allocation2 + $0x18] sm:$0xc0] }
 0x3a3   :  { %1751 = vmatprep.mubr.bf16.mxu0 %v1717_v5  ;;  %1792 = vmatprep.mubr.bf16.mxu1 %v1717_v5 }
 0x3a4   :  { %1752 = vmatmul.mubr.bf16.vlgmr.msra.gmra.mxu0 %v4480_v36  ;;  %1793 = vmatmul.mubr.bf16.vlgmr.msra.gmra.mxu1 %v4480_v36  ;;  %v5875_v36 = vld [vmem:[#allocation21_spill] sm:$0xff] }
 0x3a5   :  { %1834 = vmatpush1.bf16.msra.mxu0 %v5866_v6  ;;  %1875 = vmatpush1.bf16.msra.mxu1 %v5867_v7 }
 0x3a6   :  { %1835 = vmatprep.subr.bf16.mxu0 %v5868_v2  ;;  %1876 = vmatprep.subr.bf16.mxu1 %v5869_v24 }
 0x3a7   :  { %1865 = vmatprep.mubr.bf16.mxu0 %v5870_v3  ;;  %1906 = vmatprep.mubr.bf16.mxu1 %v5870_v3 }
 0x3a9   :  { %1836 = vmatpush1.bf16.msra.mxu0 %v5871_v16  ;;  %1877 = vmatpush1.bf16.msra.mxu1 %v5872_v26 }
 0x3aa   :  { %1837 = vmatprep.subr.bf16.mxu0 %v5873_v17  ;;  %1878 = vmatprep.subr.bf16.mxu1 %v5874_v18 }
 0x3ad   :  { %1838 = vmatpush1.bf16.msra.mxu0 %v5875_v36  ;;  %1879 = vmatpush1.bf16.msra.mxu1 %v5876_v27 }
 0x3ae   :  { %1839 = vmatprep.subr.bf16.mxu0 %v5877_v28  ;;  %1880 = vmatprep.subr.bf16.mxu1 %v5878_v29 }
 0x3b1   :  { %1840 = vmatpush1.bf16.msra.mxu0 %v5879_v31  ;;  %1881 = vmatpush1.bf16.msra.mxu1 %v5880_v32 }
 0x3b2   :  { %1841 = vmatprep.subr.bf16.mxu0 %v5881_v33  ;;  %1882 = vmatprep.subr.bf16.mxu1 %v5882_v34 }
 0x3b5   :  { %1842 = vmatpush1.bf16.msra.mxu0 %v5883_v35  ;;  %1883 = vmatpush1.bf16.msra.mxu1 %v5884_v38 }
 0x3b6   :  { %1843 = vmatprep.subr.bf16.mxu0 %v5885_v12  ;;  %1884 = vmatprep.subr.bf16.mxu1 %v5886_v19 }
 0x3b9   :  { %1844 = vmatpush1.bf16.msra.mxu0 %v5887_v20  ;;  %1885 = vmatpush1.bf16.msra.mxu1 %v5888_v22 }
 0x3ba   :  { %1845 = vmatprep.subr.bf16.mxu0 %v5889_v39  ;;  %1886 = vmatprep.subr.bf16.mxu1 %v5890_v40 }
 0x3bd   :  { %1846 = vmatpush1.bf16.msra.mxu0 %v5891_v46  ;;  %1887 = vmatpush1.bf16.msra.mxu1 %v5892_v9 }
 0x3be   :  { %1847 = vmatprep.subr.bf16.mxu0 %v5893_v47  ;;  %1888 = vmatprep.subr.bf16.mxu1 %v5894_v49 }
 0x3c1   :  { %1848 = vmatpush1.bf16.msra.mxu0 %v4588_v51  ;;  %1889 = vmatpush1.bf16.msra.mxu1 %v4591_v53 }
 0x3c2   :  { %1953 = vmatprep.subr.bf16.mxu0 %v4594_v52  ;;  %1994 = vmatprep.subr.bf16.mxu1 %v4597_v55 }
 0x422   :  { %v1621_v56 = vpop.f32.mrf.mxu0  ;;  %v1662_v57 = vpop.f32.mrf.mxu1 }
 0x423   :  { %v1673_v58 = vrot.slane %v1621_v56, 2  ;;  %v1675_v44 = vrot.slane %v1662_v57, 2 }
 0x424   :  { %v1623_v60 = vpop.f32.mrf.mxu0  ;;  %v1664_v63 = vpop.f32.mrf.mxu1 }
 0x425   :  { %v1681_v13 = vadd.f32 %v1673_v58, %v1579_v59  ;;  %v1674_v61 = vrot.slane %v1623_v60, 2  ;;  %v1676_v37 = vrot.slane %v1664_v63, 2  ;;  %v1683_v56 = vadd.f32 %v1675_v44, %v1581_v41  ;;  %v4614_v44 = vld [vmem:[#allocation8 + $0xc4] ss:$16 sps:$4 sm:$0xff]  }
 0x426   :  { %v1625_v8 = vpop.f32.mrf.mxu0  ;;  %v1666_v43 = vpop.f32.mrf.mxu1 }
 0x427   :  { %v3076_v14 = vmul.f32 -1.442695, %v1681_v13  ;;  %v1682_v11 = vadd.f32 %v1674_v61, %v1580_v10  ;;  %v1684_v62 = vadd.f32 %v1676_v37, %v1582_v21  ;;  %v1705_v8 = vrot.slane %v4477_v15, 6  ;;  %v4608_v15 = vld [vmem:[#allocation8 + $0xe0] ss:$16 sps:$4 sm:$0xff]  }
 0x428   :  { %v1626_v30 = vpop.f32.mrf.mxu0  ;;  %v1667_v45 = vpop.f32.mrf.mxu1 }
 0x429   :  { %3390 = vpow2.f32 %v3076_v14  ;;  %v3077_v42 = vmul.f32 -1.442695, %v1682_v11  ;;  %v3078_v1 = vmul.f32 -1.442695, %v1684_v62  ;;  %v4611_v62 = vld [vmem:[#allocation8 + $0xe8] ss:$16 sps:$4 sm:$0xff]  }
 0x42b   :  { %3392 = vpow2.f32 %v3077_v42 }
 0x42c   :  { %3394 = vpow2.f32 %v3078_v1  ;;  %v4617_v1 = vld [vmem:[#allocation8 + $0xcc] ss:$16 sps:$4 sm:$0xff]  }
 0x436   :  { %v3391_v5 = vpop.eup %3390 }
 0x437   :  { %v1688_v58 = vadd.f32 1.0, %v3391_v5 }
 0x438   :  { %v3393_v59 = vpop.eup %3392 }
 0x439   :  { %3396 = vrcp.f32 %v1688_v58  ;;  %v1694_v60 = vadd.f32 1.0, %v3393_v59  ;;  %v3395_v13 = vpop.eup %3394 }
 0x43a   :  { %3398 = vtanh.f32 %v1683_v56  ;;  %v1701_v43 = vadd.f32 1.0, %v3395_v13  ;;  %v4624_v13 = vld [vmem:[#allocation8 + $0xc8] ss:$16 sps:$4 sm:$0xff]  }
 0x43b   :  { %3400 = vrcp.f32 %v1694_v60  ;;  %v4621_v60 = vld [vmem:[#allocation8 + $0xc0] ss:$16 sps:$4 sm:$0xff]  }
 0x43c   :  { %3402 = vrcp.f32 %v1701_v43 }
 0x446   :  { %v3397_v61 = vpop.eup %3396 }
 0x447   :  { %v3399_v10 = vpop.eup %3398 }
 0x448   :  { %v3401_v63 = vpop.eup %3400  ;;  %v1708_v14 = vmul.f32 %v3399_v10, %v3397_v61 }
 0x449   :  { %v1707_v57 = vmul.f32 %v3401_v63, %v1705_v8  ;;  %v3403_v30 = vpop.eup %3402  ;;  %v4628_v8 = vld [vmem:[#allocation8 + $0xa4] ss:$16 sps:$4 sm:$0xff]   ;;  %v4631_v63 = vld [vmem:[#allocation8 + $0xac] ss:$16 sps:$4 sm:$0xff]  }
 0x44b   :  { %v4601_v11 = vadd.f32 %v1708_v14, %v1707_v57 }
 0x44d   :  { %3404 = vtanh.f32 %v4601_v11 }
 0x45a   :  { %v3405_v45 = vpop.eup %3404 }
 0x45b   :  { %v1711_v42 = vmul.f32 %v3405_v45, %v3403_v30 }
 0x45d   :  { %v1829_v37 = vpack.c.bf16 %v1711_v42, %v1711_v42  ;;  %v4634_v42 = vld [vmem:[#allocation8 + $0xa0] ss:$16 sps:$4 sm:$0xff]  }
 0x45f   :  { %v4604_v21 = vrot.slane %v1829_v37, 3  ;;  %v4637_v37 = vld [vmem:[#allocation8 + $0xa8] ss:$16 sps:$4 sm:$0xff]  }
 0x461   :  { %1866 = vmatmul.mubr.bf16.vlgmr.msra.gmra.mxu0 %v4604_v21  ;;  %1907 = vmatmul.mubr.bf16.vlgmr.msra.gmra.mxu1 %v4604_v21 }
 0x462   :  { %1954 = vmatpush1.bf16.msra.mxu0 %v4608_v15  ;;  %1995 = vmatpush1.bf16.msra.mxu1 %v4611_v62 }
 0x463   :  { %1955 = vmatprep.subr.bf16.mxu0 %v4614_v44  ;;  %1996 = vmatprep.subr.bf16.mxu1 %v4617_v1 }
 0x464   :  { %v1753_v41 = vpop.f32.mrf.mxu0  ;;  %v1794_v5 = vpop.f32.mrf.mxu1 }
 0x465   :  { %v1754_v56 = vadd.f32 %v1753_v41, %v4291_v23  ;;  %v4640_v41 = vld [vmem:[#allocation8 + $0x84] ss:$16 sps:$4 sm:$0xff]  }
 0x466   :  { %v1755_v58 = vpop.f32.mrf.mxu0  ;;  %v1796_v59 = vpop.f32.mrf.mxu1  ;;  %1956 = vmatpush1.bf16.msra.mxu0 %v4621_v60  ;;  %1997 = vmatpush1.bf16.msra.mxu1 %v4624_v13 }
 0x467   :  { %v3079_v61 = vmul.f32 -1.442695, %v1754_v56  ;;  %v1756_v10 = vadd.f32 %v1755_v58, %v4297_v50  ;;  %1957 = vmatprep.subr.bf16.mxu0 %v4628_v8  ;;  %1998 = vmatprep.subr.bf16.mxu1 %v4631_v63  ;;  %v4643_v56 = vld [vmem:[#allocation8 + $0x8c] ss:$16 sps:$4 sm:$0xff]   ;;  %v4646_v58 = vld [vmem:[#allocation8 + $0x80] ss:$16 sps:$4 sm:$0xff]  }
 0x468   :  { %v1757_v43 = vpop.f32.mrf.mxu0  ;;  %v1798_v14 = vpop.f32.mrf.mxu1  ;;  %5895 = vst [vmem:[#allocation24_spill] sm:$0xff] %v4646_v58 }
 0x469   :  { %3406 = vpow2.f32 %v3079_v61  ;;  %v3080_v57 = vmul.f32 -1.442695, %v1756_v10  ;;  %v4649_v61 = vld [vmem:[#allocation8 + $0x88] ss:$16 sps:$4 sm:$0xff]   ;;  %v4652_v10 = vld [vmem:[#allocation8 + $0x64] ss:$16 sps:$4 sm:$0xff]   ;;  %v1797_v14 = vadd.f32 %v1796_v59, %v4313_v0  ;;  %v1795_v59 = vadd.f32 %v1794_v5, %v4326_v25 }
 0x46a   :  { %v1758_v30 = vpop.f32.mrf.mxu0  ;;  %v1799_v45 = vpop.f32.mrf.mxu1  ;;  %1958 = vmatpush1.bf16.msra.mxu0 %v4634_v42  ;;  %1999 = vmatpush1.bf16.msra.mxu1 %v4637_v37  ;;  %5896 = vst [vmem:[#allocation25_spill] sm:$0xff] %v4649_v61  ;;  %5897 = vst [vmem:[#allocation26_spill] sm:$0xff] %v4652_v10  ;;  %v4655_v43 = vld [vmem:[#allocation8 + $0x6c] ss:$16 sps:$4 sm:$0xff]   ;;  %v4672_v0 = vld [vmem:[#allocation8 + $0x40] ss:$16 sps:$4 sm:$0xff]  }
 0x46b   :  { %3408 = vpow2.f32 %v3080_v57  ;;  %1959 = vmatprep.subr.bf16.mxu0 %v4640_v41  ;;  %2000 = vmatprep.subr.bf16.mxu1 %v4643_v56  ;;  %5898 = vst [vmem:[#allocation27_spill] sm:$0xff] %v4655_v43  ;;  %v4659_v57 = vld [vmem:[#allocation8 + $0x60] ss:$16 sps:$4 sm:$0xff]   ;;  %v4662_v30 = vld [vmem:[#allocation8 + $0x68] ss:$16 sps:$4 sm:$0xff]   ;;  %5903 = vst [vmem:[#allocation34_spill] sm:$0xff] %v4672_v0 }
 0x46c   :  { %5899 = vst [vmem:[#allocation28_spill] sm:$0xff] %v4659_v57  ;;  %5900 = vst [vmem:[#allocation29_spill] sm:$0xff] %v4662_v30  ;;  %v4665_v45 = vld [vmem:[#allocation8 + $0x44] ss:$16 sps:$4 sm:$0xff]   ;;  %v4684_v25 = vld [vmem:[#allocation8 + $0x20] ss:$16 sps:$4 sm:$0xff]  }
 0x46d   :  { %5901 = vst [vmem:[#allocation30_spill] sm:$0xff] %v4665_v45  ;;  %5907 = vst [vmem:[#allocation40_spill] sm:$0xff] %v4684_v25 }
 0x46e   :  { %1960 = vmatpush1.bf16.msra.mxu0 %v4646_v58  ;;  %2001 = vmatpush1.bf16.msra.mxu1 %v4649_v61  ;;  %v4668_v61 = vld [vmem:[#allocation8 + $0x4c] ss:$16 sps:$4 sm:$0xff]   ;;  %v4678_v58 = vld [vmem:[#allocation8 + $0x24] ss:$16 sps:$4 sm:$0xff]  }
 0x46f   :  { %1961 = vmatprep.subr.bf16.mxu0 %v4652_v10  ;;  %2002 = vmatprep.subr.bf16.mxu1 %v4655_v43  ;;  %5902 = vst [vmem:[#allocation33_spill] sm:$0xff] %v4668_v61  ;;  %v3081_v10 = vmul.f32 -1.442695, %v1797_v14  ;;  %5905 = vst [vmem:[#allocation38_spill] sm:$0xff] %v4678_v58 }
 0x471   :  { %3410 = vpow2.f32 %v3081_v10  ;;  %v4696_v10 = vld [vmem:[#allocation8] ss:$16 sps:$4 sm:$0xff]  }
 0x472   :  { %1962 = vmatpush1.bf16.msra.mxu0 %v4659_v57  ;;  %2003 = vmatpush1.bf16.msra.mxu1 %v4662_v30  ;;  %v4675_v57 = vld [vmem:[#allocation8 + $0x48] ss:$16 sps:$4 sm:$0xff]   ;;  %5911 = vst [vmem:[#allocation44_spill] sm:$0xff] %v4696_v10 }
 0x473   :  { %1963 = vmatprep.subr.bf16.mxu0 %v4665_v45  ;;  %2004 = vmatprep.subr.bf16.mxu1 %v4668_v61  ;;  %5904 = vst [vmem:[#allocation36_spill] sm:$0xff] %v4675_v57  ;;  %v4681_v45 = vld [vmem:[#allocation8 + $0x2c] ss:$16 sps:$4 sm:$0xff]   ;;  %v4733_v61 = vld [vmem:[#allocation8 + $0x1a0] ss:$16 sps:$4 sm:$0xff]  }
 0x474   :  { %5906 = vst [vmem:[#allocation39_spill] sm:$0xff] %v4681_v45  ;;  %5923 = vst [vmem:[#allocation12_spill] sm:$0xff] %v4733_v61 }
 0x476   :  { %v3407_v43 = vpop.eup %3406  ;;  %1964 = vmatpush1.bf16.msra.mxu0 %v4672_v0  ;;  %2005 = vmatpush1.bf16.msra.mxu1 %v4675_v57  ;;  %v4687_v0 = vld [vmem:[#allocation8 + $0x28] ss:$16 sps:$4 sm:$0xff]  }
 0x477   :  { %v1804_v30 = vadd.f32 1.0, %v3407_v43  ;;  %1965 = vmatprep.subr.bf16.mxu0 %v4678_v58  ;;  %2006 = vmatprep.subr.bf16.mxu1 %v4681_v45  ;;  %5908 = vst [vmem:[#allocation41_spill] sm:$0xff] %v4687_v0  ;;  %v4690_v43 = vld [vmem:[#allocation8 + $0x4] ss:$16 sps:$4 sm:$0xff]   ;;  %v4693_v58 = vld [vmem:[#allocation8 + $0xc] ss:$16 sps:$4 sm:$0xff]  }
 0x478   :  { %v3409_v14 = vpop.eup %3408  ;;  %5909 = vst [vmem:[#allocation42_spill] sm:$0xff] %v4690_v43  ;;  %5910 = vst [vmem:[#allocation43_spill] sm:$0xff] %v4693_v58 }
 0x479   :  { %3412 = vrcp.f32 %v1804_v30  ;;  %v1810_v5 = vadd.f32 1.0, %v3409_v14  ;;  %v4699_v30 = vld [vmem:[#allocation8 + $0x8] ss:$16 sps:$4 sm:$0xff]   ;;  %v4705_v14 = vld [vmem:[#allocation8 + $0x1ec] ss:$16 sps:$4 sm:$0xff]  }
 0x47a   :  { %3414 = vtanh.f32 %v1795_v59  ;;  %1966 = vmatpush1.bf16.msra.mxu0 %v4684_v25  ;;  %2007 = vmatpush1.bf16.msra.mxu1 %v4687_v0  ;;  %5912 = vst [vmem:[#allocation45_spill] sm:$0xff] %v4699_v30  ;;  %v4702_v59 = vld [vmem:[#allocation8 + $0x1e4] ss:$16 sps:$4 sm:$0xff]   ;;  %5914 = vst [vmem:[#allocation47_spill] sm:$0xff] %v4705_v14  ;;  %v4720_v0 = vld [vmem:[#allocation8 + $0x1c0] ss:$16 sps:$4 sm:$0xff]  }
 0x47b   :  { %3416 = vrcp.f32 %v1810_v5  ;;  %1967 = vmatprep.subr.bf16.mxu0 %v4690_v43  ;;  %2008 = vmatprep.subr.bf16.mxu1 %v4693_v58  ;;  %5913 = vst [vmem:[#allocation46_spill] sm:$0xff] %v4702_v59  ;;  %v4708_v5 = vld [vmem:[#allocation8 + $0x1e0] ss:$16 sps:$4 sm:$0xff]   ;;  %v4711_v58 = vld [vmem:[#allocation8 + $0x1e8] ss:$16 sps:$4 sm:$0xff]   ;;  %5919 = vst [vmem:[#allocation52_spill] sm:$0xff] %v4720_v0 }
 0x47c   :  { %5915 = vst [vmem:[#allocation48_spill] sm:$0xff] %v4708_v5  ;;  %5916 = vst [vmem:[#allocation49_spill] sm:$0xff] %v4711_v58 }
 0x47e   :  { %1968 = vmatpush1.bf16.msra.mxu0 %v4696_v10  ;;  %2009 = vmatpush1.bf16.msra.mxu1 %v4699_v30  ;;  %v4714_v10 = vld [vmem:[#allocation8 + $0x1c4] ss:$16 sps:$4 sm:$0xff]   ;;  %v4717_v30 = vld [vmem:[#allocation8 + $0x1cc] ss:$16 sps:$4 sm:$0xff]  }
 0x47f   :  { %1969 = vmatprep.subr.bf16.mxu0 %v4702_v59  ;;  %2010 = vmatprep.subr.bf16.mxu1 %v4705_v14  ;;  %5917 = vst [vmem:[#allocation50_spill] sm:$0xff] %v4714_v10  ;;  %5918 = vst [vmem:[#allocation51_spill] sm:$0xff] %v4717_v30  ;;  %v3411_v59 = vpop.eup %3410  ;;  %v4723_v14 = vld [vmem:[#allocation8 + $0x1c8] ss:$16 sps:$4 sm:$0xff]  }
 0x480   :  { %5920 = vst [vmem:[#allocation53_spill] sm:$0xff] %v4723_v14  ;;  %v1817_v25 = vadd.f32 1.0, %v3411_v59 }
 0x482   :  { %1970 = vmatpush2.bf16.msra.mxu0 %v4708_v5  ;;  %2011 = vmatpush2.bf16.msra.mxu1 %v4711_v58  ;;  %v4726_v58 = vld [vmem:[#allocation8 + $0x1a4] ss:$16 sps:$4 sm:$0xff]   ;;  %3418 = vrcp.f32 %v1817_v25  ;;  %v4763_v25 = vld [vmem:[#allocation8 + $0x168] ss:$16 sps:$4 sm:$0xff]  }
 0x483   :  { %1971 = vmatprep.subr.bf16.mxu0 %v4714_v10  ;;  %2012 = vmatprep.subr.bf16.mxu1 %v4717_v30  ;;  %5921 = vst [vmem:[#allocation54_spill] sm:$0xff] %v4726_v58  ;;  %v4729_v10 = vld [vmem:[#allocation8 + $0x1ac] ss:$16 sps:$4 sm:$0xff]   ;;  %5933 = vst [vmem:[#allocation22_spill] sm:$0xff] %v4763_v25 }
 0x484   :  { %5922 = vst [vmem:[#allocation11_spill] sm:$0xff] %v4729_v10 }
 0x486   :  { %v3413_v43 = vpop.eup %3412  ;;  %1972 = vmatpush2.bf16.msra.mxu0 %v4720_v0  ;;  %2013 = vmatpush2.bf16.msra.mxu1 %v4723_v14  ;;  %v4736_v0 = vld [vmem:[#allocation8 + $0x1a8] ss:$16 sps:$4 sm:$0xff]   ;;  %v4739_v14 = vld [vmem:[#allocation8 + $0x184] ss:$16 sps:$4 sm:$0xff]  }
 0x487   :  { %v3415_v5 = vpop.eup %3414  ;;  %1973 = vmatprep.subr.bf16.mxu0 %v4726_v58  ;;  %2014 = vmatprep.subr.bf16.mxu1 %v4729_v10  ;;  %5924 = vst [vmem:[#allocation13_spill] sm:$0xff] %v4736_v0  ;;  %5925 = vst [vmem:[#allocation14_spill] sm:$0xff] %v4739_v14  ;;  %v4742_v58 = vld [vmem:[#allocation8 + $0x18c] ss:$16 sps:$4 sm:$0xff]  }
 0x488   :  { %v3417_v30 = vpop.eup %3416  ;;  %v1821_v45 = vmul.f32 %v3415_v5, %v3413_v43  ;;  %5926 = vst [vmem:[#allocation15_spill] sm:$0xff] %v4742_v58  ;;  %v4751_v43 = vld [vmem:[#allocation8 + $0x188] ss:$16 sps:$4 sm:$0xff]   ;;  %v4757_v5 = vld [vmem:[#allocation8 + $0x16c] ss:$16 sps:$4 sm:$0xff]  }
 0x489   :  { %v1820_v57 = vmul.f32 %v3417_v30, %v4531_v54  ;;  %v4748_v54 = vld [vmem:[#allocation8 + $0x180] ss:$16 sps:$4 sm:$0xff]   ;;  %5929 = vst [vmem:[#allocation18_spill] sm:$0xff] %v4751_v43  ;;  %v4754_v30 = vld [vmem:[#allocation8 + $0x164] ss:$16 sps:$4 sm:$0xff]   ;;  %5931 = vst [vmem:[#allocation20_spill] sm:$0xff] %v4757_v5 }
 0x48a   :  { %1974 = vmatpush2.bf16.msra.mxu0 %v4733_v61  ;;  %2015 = vmatpush2.bf16.msra.mxu1 %v4736_v0  ;;  %5928 = vst [vmem:[#allocation17_spill] sm:$0xff] %v4748_v54  ;;  %5930 = vst [vmem:[#allocation19_spill] sm:$0xff] %v4754_v30 }
 0x48b   :  { %1975 = vmatprep.subr.bf16.mxu0 %v4739_v14  ;;  %2016 = vmatprep.subr.bf16.mxu1 %v4742_v58  ;;  %v4745_v59 = vadd.f32 %v1821_v45, %v1820_v57  ;;  %v4760_v57 = vld [vmem:[#allocation8 + $0x160] ss:$16 sps:$4 sm:$0xff]   ;;  %v4766_v45 = vld [vmem:[#allocation8 + $0x144] ss:$16 sps:$4 sm:$0xff]   ;;  %v4799_v14 = vld [vmem:[#allocation8 + $0x108] ss:$16 sps:$4 sm:$0xff]  }
 0x48c   :  { %5932 = vst [vmem:[#allocation21_spill] sm:$0xff] %v4760_v57  ;;  %5934 = vst [vmem:[#allocation23_spill] sm:$0xff] %v4766_v45  ;;  %v4796_v58 = vld [vmem:[#allocation8 + $0x100] ss:$16 sps:$4 sm:$0xff]  }
 0x48d   :  { %5927 = vst [vmem:[#allocation16_spill] sm:$0xff] %v4745_v59  ;;  %3420 = vtanh.f32 %v4745_v59  ;;  %v4784_v59 = vld [vmem:[#allocation8 + $0x120] ss:$16 sps:$4 sm:$0xff]   ;;  %5944 = vst [vmem:[#allocation64_spill] sm:$0xff] %v4796_v58 }
 0x48e   :  { %1976 = vmatpush2.bf16.msra.mxu0 %v4748_v54  ;;  %2017 = vmatpush2.bf16.msra.mxu1 %v4751_v43  ;;  %v4769_v43 = vld [vmem:[#allocation8 + $0x14c] ss:$16 sps:$4 sm:$0xff]   ;;  %5940 = vst [vmem:[#allocation60_spill] sm:$0xff] %v4784_v59  ;;  %5945 = vst [vmem:[#allocation65_spill] sm:$0xff] %v4799_v14 }
 0x48f   :  { %1977 = vmatprep.subr.bf16.mxu0 %v4754_v30  ;;  %2018 = vmatprep.subr.bf16.mxu1 %v4757_v5  ;;  %5935 = vst [vmem:[#allocation31_spill] sm:$0xff] %v4769_v43  ;;  %v4772_v30 = vld [vmem:[#allocation8 + $0x140] ss:$16 sps:$4 sm:$0xff]   ;;  %v4775_v5 = vld [vmem:[#allocation8 + $0x148] ss:$16 sps:$4 sm:$0xff]  }
 0x490   :  { %5936 = vst [vmem:[#allocation32_spill] sm:$0xff] %v4772_v30  ;;  %5937 = vst [vmem:[#allocation35_spill] sm:$0xff] %v4775_v5 }
 0x492   :  { %1978 = vmatpush2.bf16.msra.mxu0 %v4760_v57  ;;  %2019 = vmatpush2.bf16.msra.mxu1 %v4763_v25  ;;  %v4778_v57 = vld [vmem:[#allocation8 + $0x124] ss:$16 sps:$4 sm:$0xff]   ;;  %v4781_v25 = vld [vmem:[#allocation8 + $0x12c] ss:$16 sps:$4 sm:$0xff]  }
 0x493   :  { %1979 = vmatprep.subr.bf16.mxu0 %v4766_v45  ;;  %2020 = vmatprep.subr.bf16.mxu1 %v4769_v43  ;;  %5938 = vst [vmem:[#allocation37_spill] sm:$0xff] %v4778_v57  ;;  %5939 = vst [vmem:[#allocation59_spill] sm:$0xff] %v4781_v25  ;;  %v3419_v45 = vpop.eup %3418  ;;  %v4787_v43 = vld [vmem:[#allocation8 + $0x128] ss:$16 sps:$4 sm:$0xff]  }
 0x494   :  { %5941 = vst [vmem:[#allocation61_spill] sm:$0xff] %v4787_v43 }
 0x496   :  { %1980 = vmatpush2.bf16.msra.mxu0 %v4772_v30  ;;  %2021 = vmatpush2.bf16.msra.mxu1 %v4775_v5  ;;  %v4790_v30 = vld [vmem:[#allocation8 + $0x104] ss:$16 sps:$4 sm:$0xff]   ;;  %v4793_v5 = vld [vmem:[#allocation8 + $0x10c] ss:$16 sps:$4 sm:$0xff]  }
 0x497   :  { %1981 = vmatprep.subr.bf16.mxu0 %v4778_v57  ;;  %2022 = vmatprep.subr.bf16.mxu1 %v4781_v25  ;;  %5942 = vst [vmem:[#allocation62_spill] sm:$0xff] %v4790_v30  ;;  %5943 = vst [vmem:[#allocation63_spill] sm:$0xff] %v4793_v5 }
 0x49a   :  { %v3421_v54 = vpop.eup %3420  ;;  %1982 = vmatpush2.bf16.msra.mxu0 %v4784_v59  ;;  %2023 = vmatpush2.bf16.msra.mxu1 %v4787_v43 }
 0x49b   :  { %1983 = vmatprep.subr.bf16.mxu0 %v4790_v30  ;;  %2024 = vmatprep.subr.bf16.mxu1 %v4793_v5  ;;  %v1824_v57 = vmul.f32 %v3421_v54, %v3419_v45 }
 0x49d   :  { %v1947_v25 = vrot.slane %v1824_v57, 2 }
 0x49e   :  { %1984 = vmatpush2.bf16.msra.mxu0 %v4796_v58  ;;  %2025 = vmatpush2.bf16.msra.mxu1 %v4799_v14 }
 0x49f   :  { %v1949_v59 = vpack.c.bf16 %v1947_v25, %v1947_v25  ;;  %2064 = vmatprep.subr.bf16.mxu0 %v5864_v48  ;;  %2105 = vmatprep.subr.bf16.mxu1 %v5865_v4  ;;  %v1825_v48 = vld [vmem:[#allocation2 + $0x8] sm:$0x3] }
 0x4a1   :  { %v1951_v30 = vrot.slane %v1949_v59, 3 }
 0x4a3   :  { %1985 = vmatprep.mubr.bf16.mxu0 %v1951_v30  ;;  %2026 = vmatprep.mubr.bf16.mxu1 %v1951_v30 }
 0x4a4   :  { %1986 = vmatmul.mubr.bf16.vlgmr.msra.gmra.mxu0 %v4604_v21  ;;  %2027 = vmatmul.mubr.bf16.vlgmr.msra.gmra.mxu1 %v4604_v21 }
 0x4a5   :  { %2065 = vmatpush1.bf16.msra.mxu0 %v5866_v6  ;;  %2106 = vmatpush1.bf16.msra.mxu1 %v5867_v7 }
 0x4a6   :  { %2066 = vmatprep.subr.bf16.mxu0 %v5868_v2  ;;  %2107 = vmatprep.subr.bf16.mxu1 %v5869_v24  ;;  %v1826_v2 = vld [vmem:[#allocation2 + $0x20] sm:$0x3] }
 0x4a7   :  { %2096 = vmatprep.mubr.bf16.mxu0 %v5870_v3  ;;  %2137 = vmatprep.mubr.bf16.mxu1 %v5870_v3 }
 0x4a9   :  { %2067 = vmatpush1.bf16.msra.mxu0 %v5871_v16  ;;  %2108 = vmatpush1.bf16.msra.mxu1 %v5872_v26 }
 0x4aa   :  { %2068 = vmatprep.subr.bf16.mxu0 %v5873_v17  ;;  %2109 = vmatprep.subr.bf16.mxu1 %v5874_v18 }
 0x4ad   :  { %2069 = vmatpush1.bf16.msra.mxu0 %v5875_v36  ;;  %2110 = vmatpush1.bf16.msra.mxu1 %v5876_v27 }
 0x4ae   :  { %2070 = vmatprep.subr.bf16.mxu0 %v5877_v28  ;;  %2111 = vmatprep.subr.bf16.mxu1 %v5878_v29 }
 0x4b1   :  { %2071 = vmatpush1.bf16.msra.mxu0 %v5879_v31  ;;  %2112 = vmatpush1.bf16.msra.mxu1 %v5880_v32  ;;  %v1828_v31 = vld [vmem:[#allocation2 + $0x38] sm:$0x3] }
 0x4b2   :  { %2072 = vmatprep.subr.bf16.mxu0 %v5881_v33  ;;  %2113 = vmatprep.subr.bf16.mxu1 %v5882_v34  ;;  %v1827_v34 = vld [vmem:[#allocation2 + $0x28] sm:$0x3] }
 0x4b5   :  { %2073 = vmatpush1.bf16.msra.mxu0 %v5883_v35  ;;  %2114 = vmatpush1.bf16.msra.mxu1 %v5884_v38 }
 0x4b6   :  { %2074 = vmatprep.subr.bf16.mxu0 %v5885_v12  ;;  %2115 = vmatprep.subr.bf16.mxu1 %v5886_v19 }
 0x4b9   :  { %2075 = vmatpush1.bf16.msra.mxu0 %v5887_v20  ;;  %2116 = vmatpush1.bf16.msra.mxu1 %v5888_v22 }
 0x4ba   :  { %2076 = vmatprep.subr.bf16.mxu0 %v5889_v39  ;;  %2117 = vmatprep.subr.bf16.mxu1 %v5890_v40 }
 0x4bd   :  { %2077 = vmatpush1.bf16.msra.mxu0 %v5891_v46  ;;  %2118 = vmatpush1.bf16.msra.mxu1 %v5892_v9  ;;  %v1939_v46 = vrot.slane %v4601_v11, 6 }
 0x4be   :  { %2078 = vmatprep.subr.bf16.mxu0 %v5893_v47  ;;  %2119 = vmatprep.subr.bf16.mxu1 %v5894_v49 }
 0x4c1   :  { %2079 = vmatpush1.bf16.msra.mxu0 %v4588_v51  ;;  %2120 = vmatpush1.bf16.msra.mxu1 %v4591_v53 }
 0x4c2   :  { %2190 = vmatprep.subr.bf16.mxu0 %v4594_v52  ;;  %2231 = vmatprep.subr.bf16.mxu1 %v4597_v55 }
 0x521   :  { %v1867_v4 = vpop.f32.mrf.mxu0  ;;  %v1908_v6 = vpop.f32.mrf.mxu1 }
 0x522   :  { %v1915_v7 = vadd.f32 %v1867_v4, %v1825_v48  ;;  %v1917_v38 = vadd.f32 %v1908_v6, %v1827_v34  ;;  %v5953_v34 = vld [vmem:[#allocation33_spill] sm:$0xff] }
 0x523   :  { %v1869_v24 = vpop.f32.mrf.mxu0  ;;  %v1910_v16 = vpop.f32.mrf.mxu1 }
 0x524   :  { %v3082_v26 = vmul.f32 -1.442695, %v1915_v7  ;;  %v1916_v17 = vadd.f32 %v1869_v24, %v1826_v2  ;;  %v1918_v32 = vadd.f32 %v1910_v16, %v1828_v31  ;;  %v5950_v31 = vld [vmem:[#allocation28_spill] sm:$0xff] }
 0x525   :  { %v1871_v18 = vpop.f32.mrf.mxu0  ;;  %v1912_v36 = vpop.f32.mrf.mxu1 }
 0x526   :  { %3422 = vpow2.f32 %v3082_v26  ;;  %v3083_v27 = vmul.f32 -1.442695, %v1916_v17  ;;  %v3084_v33 = vmul.f32 -1.442695, %v1918_v32  ;;  %v5946_v17 = vld [vmem:[#allocation24_spill] sm:$0xff]  ;;  %v5947_v18 = vld [vmem:[#allocation25_spill] sm:$0xff] }
 0x527   :  { %v1872_v28 = vpop.f32.mrf.mxu0  ;;  %v1913_v29 = vpop.f32.mrf.mxu1  ;;  %v5951_v32 = vld [vmem:[#allocation29_spill] sm:$0xff] }
 0x528   :  { %3424 = vpow2.f32 %v3083_v27  ;;  %v5948_v28 = vld [vmem:[#allocation26_spill] sm:$0xff]  ;;  %v5949_v29 = vld [vmem:[#allocation27_spill] sm:$0xff] }
 0x529   :  { %3426 = vpow2.f32 %v3084_v33  ;;  %v5952_v33 = vld [vmem:[#allocation30_spill] sm:$0xff] }
 0x533   :  { %v3423_v35 = vpop.eup %3422 }
 0x534   :  { %v1922_v12 = vadd.f32 1.0, %v3423_v35  ;;  %v5954_v35 = vld [vmem:[#allocation57_spill] sm:$0xff] }
 0x535   :  { %v3425_v19 = vpop.eup %3424 }
 0x536   :  { %3428 = vrcp.f32 %v1922_v12  ;;  %v1928_v20 = vadd.f32 1.0, %v3425_v19  ;;  %v3427_v22 = vpop.eup %3426  ;;  %v5955_v12 = vld [vmem:[#allocation34_spill] sm:$0xff]  ;;  %v5956_v19 = vld [vmem:[#allocation36_spill] sm:$0xff] }
 0x537   :  { %3430 = vtanh.f32 %v1917_v38  ;;  %v1935_v47 = vadd.f32 1.0, %v3427_v22  ;;  %v5958_v22 = vld [vmem:[#allocation39_spill] sm:$0xff] }
 0x538   :  { %3432 = vrcp.f32 %v1928_v20  ;;  %v5957_v20 = vld [vmem:[#allocation38_spill] sm:$0xff] }
 0x539   :  { %3434 = vrcp.f32 %v1935_v47  ;;  %v5961_v47 = vld [vmem:[#allocation58_spill] sm:$0xff] }
 0x543   :  { %v3429_v39 = vpop.eup %3428 }
 0x544   :  { %v3431_v40 = vpop.eup %3430 }
 0x545   :  { %v3433_v9 = vpop.eup %3432  ;;  %v1942_v49 = vmul.f32 %v3431_v40, %v3429_v39  ;;  %v5959_v40 = vld [vmem:[#allocation40_spill] sm:$0xff] }
 0x546   :  { %v1941_v21 = vmul.f32 %v3433_v9, %v1939_v46  ;;  %v3435_v54 = vpop.eup %3434  ;;  %v5960_v46 = vld [vmem:[#allocation41_spill] sm:$0xff] }
 0x548   :  { %v4841_v59 = vadd.f32 %v1942_v49, %v1941_v21  ;;  %v5962_v21 = vld [vmem:[#allocation42_spill] sm:$0xff] }
 0x54a   :  { %3436 = vtanh.f32 %v4841_v59 }
 0x557   :  { %v3437_v30 = vpop.eup %3436 }
 0x558   :  { %v1945_v57 = vmul.f32 %v3437_v30, %v3435_v54  ;;  %v5963_v54 = vld [vmem:[#allocation43_spill] sm:$0xff] }
 0x55a   :  { %v4844_v25 = vpack.c.bf16 %v1945_v57, %v1945_v57 }
 0x55c   :  { %2097 = vmatmul.mubr.bf16.vlgmr.msra.gmra.mxu0 %v4844_v25  ;;  %2138 = vmatmul.mubr.bf16.vlgmr.msra.gmra.mxu1 %v4844_v25 }
 0x55d   :  { %2191 = vmatpush1.bf16.msra.mxu0 %v4608_v15  ;;  %2232 = vmatpush1.bf16.msra.mxu1 %v4611_v62 }
 0x55e   :  { %2192 = vmatprep.subr.bf16.mxu0 %v4614_v44  ;;  %2233 = vmatprep.subr.bf16.mxu1 %v4617_v1 }
 0x561   :  { %2193 = vmatpush1.bf16.msra.mxu0 %v4621_v60  ;;  %2234 = vmatpush1.bf16.msra.mxu1 %v4624_v13 }
 0x562   :  { %2194 = vmatprep.subr.bf16.mxu0 %v4628_v8  ;;  %2235 = vmatprep.subr.bf16.mxu1 %v4631_v63 }
 0x564   :  { %v1987_v11 = vpop.f32.mrf.mxu0  ;;  %v2028_v45 = vpop.f32.mrf.mxu1 }
 0x565   :  { %v1988_v48 = vadd.f32 %v1987_v11, %v4291_v23  ;;  %2195 = vmatpush1.bf16.msra.mxu0 %v4634_v42  ;;  %2236 = vmatpush1.bf16.msra.mxu1 %v4637_v37  ;;  %v2029_v49 = vadd.f32 %v2028_v45, %v5961_v47  ;;  %v5968_v45 = vld [vmem:[#allocation48_spill] sm:$0xff] }
 0x566   :  { %v1989_v4 = vpop.f32.mrf.mxu0  ;;  %v2030_v6 = vpop.f32.mrf.mxu1  ;;  %2196 = vmatprep.subr.bf16.mxu0 %v4640_v41  ;;  %2237 = vmatprep.subr.bf16.mxu1 %v4643_v56 }
 0x567   :  { %v3085_v7 = vmul.f32 -1.442695, %v1988_v48  ;;  %v1990_v2 = vadd.f32 %v1989_v4, %v4297_v50  ;;  %v2031_v38 = vadd.f32 %v2030_v6, %v5954_v35  ;;  %v5964_v48 = vld [vmem:[#allocation44_spill] sm:$0xff]  ;;  %v5965_v4 = vld [vmem:[#allocation45_spill] sm:$0xff]  ;;  %v5966_v6 = vld [vmem:[#allocation46_spill] sm:$0xff] }
 0x568   :  { %v1991_v24 = vpop.f32.mrf.mxu0  ;;  %v2032_v16 = vpop.f32.mrf.mxu1 }
 0x569   :  { %3438 = vpow2.f32 %v3085_v7  ;;  %v3086_v26 = vmul.f32 -1.442695, %v1990_v2  ;;  %2197 = vmatpush1.bf16.msra.mxu0 %v5946_v17  ;;  %2238 = vmatpush1.bf16.msra.mxu1 %v5947_v18  ;;  %v3087_v39 = vmul.f32 -1.442695, %v2031_v38  ;;  %v5967_v7 = vld [vmem:[#allocation47_spill] sm:$0xff]  ;;  %v5969_v2 = vld [vmem:[#allocation49_spill] sm:$0xff] }
 0x56a   :  { %v1992_v36 = vpop.f32.mrf.mxu0  ;;  %v2033_v27 = vpop.f32.mrf.mxu1  ;;  %2198 = vmatprep.subr.bf16.mxu0 %v5948_v28  ;;  %2239 = vmatprep.subr.bf16.mxu1 %v5949_v29  ;;  %v5970_v24 = vld [vmem:[#allocation50_spill] sm:$0xff]  ;;  %v5971_v16 = vld [vmem:[#allocation51_spill] sm:$0xff] }
 0x56b   :  { %3440 = vpow2.f32 %v3086_v26  ;;  %v5972_v26 = vld [vmem:[#allocation52_spill] sm:$0xff]  ;;  %v5973_v36 = vld [vmem:[#allocation53_spill] sm:$0xff]  ;;  %v5974_v27 = vld [vmem:[#allocation54_spill] sm:$0xff] }
 0x56c   :  { %3442 = vpow2.f32 %v3087_v39 }
 0x56d   :  { %2199 = vmatpush1.bf16.msra.mxu0 %v5950_v31  ;;  %2240 = vmatpush1.bf16.msra.mxu1 %v5951_v32 }
 0x56e   :  { %2200 = vmatprep.subr.bf16.mxu0 %v5952_v33  ;;  %2241 = vmatprep.subr.bf16.mxu1 %v5953_v34 }
 0x571   :  { %2201 = vmatpush1.bf16.msra.mxu0 %v5955_v12  ;;  %2242 = vmatpush1.bf16.msra.mxu1 %v5956_v19 }
 0x572   :  { %2202 = vmatprep.subr.bf16.mxu0 %v5957_v20  ;;  %2243 = vmatprep.subr.bf16.mxu1 %v5958_v22 }
 0x575   :  { %2203 = vmatpush1.bf16.msra.mxu0 %v5959_v40  ;;  %2244 = vmatpush1.bf16.msra.mxu1 %v5960_v46 }
 0x576   :  { %v3439_v9 = vpop.eup %3438  ;;  %2204 = vmatprep.subr.bf16.mxu0 %v5962_v21  ;;  %2245 = vmatprep.subr.bf16.mxu1 %v5963_v54 }
 0x577   :  { %v2038_v30 = vadd.f32 1.0, %v3439_v9  ;;  %v5975_v9 = vld [vmem:[#allocation14_spill] sm:$0xff] }
 0x578   :  { %v3441_v57 = vpop.eup %3440 }
 0x579   :  { %3444 = vrcp.f32 %v2038_v30  ;;  %v2044_v11 = vadd.f32 1.0, %v3441_v57  ;;  %2205 = vmatpush1.bf16.msra.mxu0 %v5964_v48  ;;  %2246 = vmatpush1.bf16.msra.mxu1 %v5965_v4  ;;  %v3443_v38 = vpop.eup %3442 }
 0x57a   :  { %3446 = vtanh.f32 %v2029_v49  ;;  %2206 = vmatprep.subr.bf16.mxu0 %v5966_v6  ;;  %2247 = vmatprep.subr.bf16.mxu1 %v5967_v7  ;;  %v5976_v49 = vld [vmem:[#allocation15_spill] sm:$0xff] }
 0x57b   :  { %3448 = vrcp.f32 %v2044_v11  ;;  %v2051_v11 = vadd.f32 1.0, %v3443_v38  ;;  %v5984_v38 = vld [vmem:[#allocation23_spill] sm:$0xff] }
 0x57d   :  { %2207 = vmatpush2.bf16.msra.mxu0 %v5968_v45  ;;  %2248 = vmatpush2.bf16.msra.mxu1 %v5969_v2  ;;  %3450 = vrcp.f32 %v2051_v11 }
 0x57e   :  { %2208 = vmatprep.subr.bf16.mxu0 %v5970_v24  ;;  %2249 = vmatprep.subr.bf16.mxu1 %v5971_v16  ;;  %v5977_v16 = vld [vmem:[#allocation16_spill] sm:$0xff]  ;;  %v5978_v24 = vld [vmem:[#allocation17_spill] sm:$0xff] }
 0x581   :  { %2209 = vmatpush2.bf16.msra.mxu0 %v5972_v26  ;;  %2250 = vmatpush2.bf16.msra.mxu1 %v5973_v36 }
 0x582   :  { %2210 = vmatprep.subr.bf16.mxu0 %v5974_v27  ;;  %2251 = vmatprep.subr.bf16.mxu1 %v4729_v10  ;;  %v5979_v27 = vld [vmem:[#allocation18_spill] sm:$0xff]  ;;  %v5980_v10 = vld [vmem:[#allocation19_spill] sm:$0xff] }
 0x585   :  { %2211 = vmatpush2.bf16.msra.mxu0 %v4733_v61  ;;  %2252 = vmatpush2.bf16.msra.mxu1 %v4736_v0  ;;  %v5981_v61 = vld [vmem:[#allocation20_spill] sm:$0xff] }
 0x586   :  { %v3445_v39 = vpop.eup %3444  ;;  %2212 = vmatprep.subr.bf16.mxu0 %v5975_v9  ;;  %2253 = vmatprep.subr.bf16.mxu1 %v5976_v49  ;;  %v5982_v9 = vld [vmem:[#allocation21_spill] sm:$0xff]  ;;  %v5983_v49 = vld [vmem:[#allocation22_spill] sm:$0xff] }
 0x587   :  { %v3447_v30 = vpop.eup %3446 }
 0x588   :  { %v3449_v57 = vpop.eup %3448  ;;  %v2055_v26 = vmul.f32 %v3447_v30, %v3445_v39  ;;  %v5986_v39 = vld [vmem:[#allocation32_spill] sm:$0xff]  ;;  %v5987_v30 = vld [vmem:[#allocation35_spill] sm:$0xff] }
 0x589   :  { %v2054_v36 = vmul.f32 %v3449_v57, %v5977_v16  ;;  %2213 = vmatpush2.bf16.msra.mxu0 %v5978_v24  ;;  %2254 = vmatpush2.bf16.msra.mxu1 %v5979_v27  ;;  %v5985_v16 = vld [vmem:[#allocation31_spill] sm:$0xff]  ;;  %v5988_v57 = vld [vmem:[#allocation37_spill] sm:$0xff] }
 0x58a   :  { %2214 = vmatprep.subr.bf16.mxu0 %v5980_v10  ;;  %2255 = vmatprep.subr.bf16.mxu1 %v5981_v61  ;;  %v5989_v61 = vld [vmem:[#allocation59_spill] sm:$0xff]  ;;  %v3451_v11 = vpop.eup %3450 }
 0x58b   :  { %v4901_v0 = vadd.f32 %v2055_v26, %v2054_v36  ;;  %v5990_v26 = vld [vmem:[#allocation60_spill] sm:$0xff]  ;;  %v5991_v36 = vld [vmem:[#allocation62_spill] sm:$0xff] }
 0x58d   :  { %2215 = vmatpush2.bf16.msra.mxu0 %v5982_v9  ;;  %2256 = vmatpush2.bf16.msra.mxu1 %v5983_v49  ;;  %3452 = vtanh.f32 %v4901_v0  ;;  %v2061_v9 = vld [vmem:[#allocation2 + $0x28] sm:$0xc] }
 0x58e   :  { %2216 = vmatprep.subr.bf16.mxu0 %v5984_v38  ;;  %2257 = vmatprep.subr.bf16.mxu1 %v5985_v16  ;;  %v4918_v16 = vld [vmem:[#allocation6 + $0xe4] ss:$16 sps:$4 sm:$0xff]  }
 0x58f   :  { %5992 = vst [vmem:[#allocation66_spill] sm:$0xff] %v4918_v16 }
 0x591   :  { %2217 = vmatpush2.bf16.msra.mxu0 %v5986_v39  ;;  %2258 = vmatpush2.bf16.msra.mxu1 %v5987_v30 }
 0x592   :  { %2218 = vmatprep.subr.bf16.mxu0 %v5988_v57  ;;  %2259 = vmatprep.subr.bf16.mxu1 %v5989_v61  ;;  %v4921_v57 = vld [vmem:[#allocation6 + $0xec] ss:$16 sps:$4 sm:$0xff]  }
 0x593   :  { %5993 = vst [vmem:[#allocation67_spill] sm:$0xff] %v4921_v57 }
 0x595   :  { %2219 = vmatpush2.bf16.msra.mxu0 %v5990_v26  ;;  %2260 = vmatpush2.bf16.msra.mxu1 %v4787_v43 }
 0x596   :  { %2220 = vmatprep.subr.bf16.mxu0 %v5991_v36  ;;  %2261 = vmatprep.subr.bf16.mxu1 %v4793_v5 }
 0x599   :  { %2221 = vmatpush2.bf16.msra.mxu0 %v4796_v58  ;;  %2262 = vmatpush2.bf16.msra.mxu1 %v4799_v14  ;;  %v4926_v58 = vld [vmem:[#allocation6 + $0xe0] ss:$16 sps:$4 sm:$0xff]   ;;  %v4929_v14 = vld [vmem:[#allocation6 + $0xe8] ss:$16 sps:$4 sm:$0xff]  }
 0x59a   :  { %v3453_v39 = vpop.eup %3452  ;;  %2304 = vmatprep.subr.bf16.mxu0 %v4918_v16  ;;  %2345 = vmatprep.subr.bf16.mxu1 %v4921_v57  ;;  %5994 = vst [vmem:[#allocation68_spill] sm:$0xff] %v4926_v58  ;;  %5995 = vst [vmem:[#allocation69_spill] sm:$0xff] %v4929_v14  ;;  %v4932_v16 = vld [vmem:[#allocation6 + $0xc4] ss:$16 sps:$4 sm:$0xff]   ;;  %v2060_v57 = vld [vmem:[#allocation2 + $0x20] sm:$0xc] }
 0x59b   :  { %v2058_v26 = vmul.f32 %v3453_v39, %v3451_v11  ;;  %5996 = vst [vmem:[#allocation70_spill] sm:$0xff] %v4932_v16  ;;  %v4935_v39 = vld [vmem:[#allocation6 + $0xcc] ss:$16 sps:$4 sm:$0xff]  }
 0x59c   :  { %5997 = vst [vmem:[#allocation71_spill] sm:$0xff] %v4935_v39  ;;  %v4949_v11 = vld [vmem:[#allocation6 + $0xac] ss:$16 sps:$4 sm:$0xff]  }
 0x59d   :  { %v2189_v43 = vpack.c.bf16 %v2058_v26, %v2058_v26  ;;  %v4946_v26 = vld [vmem:[#allocation6 + $0xa4] ss:$16 sps:$4 sm:$0xff]   ;;  %6001 = vst [vmem:[#allocation27_spill] sm:$0xff] %v4949_v11 }
 0x59e   :  { %6000 = vst [vmem:[#allocation26_spill] sm:$0xff] %v4946_v26 }
 0x59f   :  { %2222 = vmatprep.mubr.bf16.mxu0 %v2189_v43  ;;  %2263 = vmatprep.mubr.bf16.mxu1 %v2189_v43  ;;  %v4940_v43 = vld [vmem:[#allocation6 + $0xc0] ss:$16 sps:$4 sm:$0xff]  }
 0x5a0   :  { %2223 = vmatmul.mubr.bf16.vlgmr.msra.gmra.mxu0 %v4844_v25  ;;  %2264 = vmatmul.mubr.bf16.vlgmr.msra.gmra.mxu1 %v4844_v25  ;;  %5998 = vst [vmem:[#allocation24_spill] sm:$0xff] %v4940_v43  ;;  %v4943_v25 = vld [vmem:[#allocation6 + $0xc8] ss:$16 sps:$4 sm:$0xff]  }
 0x5a1   :  { %2305 = vmatpush1.bf16.msra.mxu0 %v4926_v58  ;;  %2346 = vmatpush1.bf16.msra.mxu1 %v4929_v14  ;;  %5999 = vst [vmem:[#allocation25_spill] sm:$0xff] %v4943_v25 }
 0x5a2   :  { %2306 = vmatprep.subr.bf16.mxu0 %v4932_v16  ;;  %2347 = vmatprep.subr.bf16.mxu1 %v4935_v39  ;;  %v4952_v39 = vld [vmem:[#allocation6 + $0xa0] ss:$16 sps:$4 sm:$0xff]  }
 0x5a3   :  { %2336 = vmatprep.mubr.bf16.mxu0 %v5870_v3  ;;  %2377 = vmatprep.mubr.bf16.mxu1 %v5870_v3  ;;  %6002 = vst [vmem:[#allocation28_spill] sm:$0xff] %v4952_v39  ;;  %v4955_v3 = vld [vmem:[#allocation6 + $0xa8] ss:$16 sps:$4 sm:$0xff]  }
 0x5a4   :  { %6003 = vst [vmem:[#allocation29_spill] sm:$0xff] %v4955_v3 }
 0x5a5   :  { %2307 = vmatpush1.bf16.msra.mxu0 %v4940_v43  ;;  %2348 = vmatpush1.bf16.msra.mxu1 %v4943_v25  ;;  %v4958_v43 = vld [vmem:[#allocation6 + $0x84] ss:$16 sps:$4 sm:$0xff]   ;;  %v4961_v25 = vld [vmem:[#allocation6 + $0x8c] ss:$16 sps:$4 sm:$0xff]  }
 0x5a6   :  { %2308 = vmatprep.subr.bf16.mxu0 %v4946_v26  ;;  %2349 = vmatprep.subr.bf16.mxu1 %v4949_v11  ;;  %6004 = vst [vmem:[#allocation30_spill] sm:$0xff] %v4958_v43  ;;  %6005 = vst [vmem:[#allocation33_spill] sm:$0xff] %v4961_v25  ;;  %v4964_v26 = vld [vmem:[#allocation6 + $0x80] ss:$16 sps:$4 sm:$0xff]   ;;  %v4967_v11 = vld [vmem:[#allocation6 + $0x88] ss:$16 sps:$4 sm:$0xff]  }
 0x5a7   :  { %6006 = vst [vmem:[#allocation34_spill] sm:$0xff] %v4964_v26  ;;  %6007 = vst [vmem:[#allocation36_spill] sm:$0xff] %v4967_v11 }
 0x5a9   :  { %2309 = vmatpush1.bf16.msra.mxu0 %v4952_v39  ;;  %2350 = vmatpush1.bf16.msra.mxu1 %v4955_v3  ;;  %v4970_v39 = vld [vmem:[#allocation6 + $0x64] ss:$16 sps:$4 sm:$0xff]   ;;  %v4973_v3 = vld [vmem:[#allocation6 + $0x6c] ss:$16 sps:$4 sm:$0xff]  }
 0x5aa   :  { %2310 = vmatprep.subr.bf16.mxu0 %v4958_v43  ;;  %2351 = vmatprep.subr.bf16.mxu1 %v4961_v25  ;;  %6008 = vst [vmem:[#allocation38_spill] sm:$0xff] %v4970_v39  ;;  %6009 = vst [vmem:[#allocation39_spill] sm:$0xff] %v4973_v3  ;;  %v4976_v43 = vld [vmem:[#allocation6 + $0x60] ss:$16 sps:$4 sm:$0xff]   ;;  %v4979_v25 = vld [vmem:[#allocation6 + $0x68] ss:$16 sps:$4 sm:$0xff]  }
 0x5ab   :  { %6010 = vst [vmem:[#allocation40_spill] sm:$0xff] %v4976_v43  ;;  %6011 = vst [vmem:[#allocation41_spill] sm:$0xff] %v4979_v25 }
 0x5ad   :  { %2311 = vmatpush1.bf16.msra.mxu0 %v4964_v26  ;;  %2352 = vmatpush1.bf16.msra.mxu1 %v4967_v11  ;;  %v4982_v26 = vld [vmem:[#allocation6 + $0x44] ss:$16 sps:$4 sm:$0xff]   ;;  %v4985_v11 = vld [vmem:[#allocation6 + $0x4c] ss:$16 sps:$4 sm:$0xff]  }
 0x5ae   :  { %2312 = vmatprep.subr.bf16.mxu0 %v4970_v39  ;;  %2353 = vmatprep.subr.bf16.mxu1 %v4973_v3  ;;  %6012 = vst [vmem:[#allocation42_spill] sm:$0xff] %v4982_v26  ;;  %6013 = vst [vmem:[#allocation43_spill] sm:$0xff] %v4985_v11  ;;  %v4988_v39 = vld [vmem:[#allocation6 + $0x40] ss:$16 sps:$4 sm:$0xff]   ;;  %v4991_v3 = vld [vmem:[#allocation6 + $0x48] ss:$16 sps:$4 sm:$0xff]  }
 0x5af   :  { %6014 = vst [vmem:[#allocation44_spill] sm:$0xff] %v4988_v39  ;;  %6015 = vst [vmem:[#allocation45_spill] sm:$0xff] %v4991_v3 }
 0x5b1   :  { %2313 = vmatpush1.bf16.msra.mxu0 %v4976_v43  ;;  %2354 = vmatpush1.bf16.msra.mxu1 %v4979_v25  ;;  %v4994_v43 = vld [vmem:[#allocation6 + $0x24] ss:$16 sps:$4 sm:$0xff]   ;;  %v4997_v25 = vld [vmem:[#allocation6 + $0x2c] ss:$16 sps:$4 sm:$0xff]  }
 0x5b2   :  { %2314 = vmatprep.subr.bf16.mxu0 %v4982_v26  ;;  %2355 = vmatprep.subr.bf16.mxu1 %v4985_v11  ;;  %6016 = vst [vmem:[#allocation46_spill] sm:$0xff] %v4994_v43  ;;  %6017 = vst [vmem:[#allocation47_spill] sm:$0xff] %v4997_v25  ;;  %v5000_v26 = vld [vmem:[#allocation6 + $0x20] ss:$16 sps:$4 sm:$0xff]   ;;  %v5003_v11 = vld [vmem:[#allocation6 + $0x28] ss:$16 sps:$4 sm:$0xff]  }
 0x5b3   :  { %6018 = vst [vmem:[#allocation48_spill] sm:$0xff] %v5000_v26  ;;  %6019 = vst [vmem:[#allocation49_spill] sm:$0xff] %v5003_v11 }
 0x5b5   :  { %2315 = vmatpush1.bf16.msra.mxu0 %v4988_v39  ;;  %2356 = vmatpush1.bf16.msra.mxu1 %v4991_v3  ;;  %v5006_v39 = vld [vmem:[#allocation6 + $0x4] ss:$16 sps:$4 sm:$0xff]   ;;  %v5009_v3 = vld [vmem:[#allocation6 + $0xc] ss:$16 sps:$4 sm:$0xff]  }
 0x5b6   :  { %2316 = vmatprep.subr.bf16.mxu0 %v4994_v43  ;;  %2357 = vmatprep.subr.bf16.mxu1 %v4997_v25  ;;  %6020 = vst [vmem:[#allocation16_spill] sm:$0xff] %v5006_v39  ;;  %6021 = vst [vmem:[#allocation17_spill] sm:$0xff] %v5009_v3 }
 0x5b9   :  { %2317 = vmatpush1.bf16.msra.mxu0 %v5000_v26  ;;  %2358 = vmatpush1.bf16.msra.mxu1 %v5003_v11  ;;  %v2059_v11 = vld [vmem:[#allocation2 + $0x8] sm:$0xc] }
 0x5ba   :  { %2318 = vmatprep.subr.bf16.mxu0 %v5006_v39  ;;  %2359 = vmatprep.subr.bf16.mxu1 %v5009_v3 }
 0x5bd   :  { %2319 = vmatpush1.bf16.msra.mxu0 %v4588_v51  ;;  %2360 = vmatpush1.bf16.msra.mxu1 %v4591_v53 }
 0x5be   :  { %2436 = vmatprep.subr.bf16.mxu0 %v4594_v52  ;;  %2477 = vmatprep.subr.bf16.mxu1 %v4597_v55  ;;  %v2062_v55 = vld [vmem:[#allocation2 + $0x38] sm:$0xc] }
 0x61c   :  { %v2098_v26 = vpop.f32.mrf.mxu0  ;;  %v2139_v25 = vpop.f32.mrf.mxu1 }
 0x61d   :  { %v2150_v43 = vrot.slane %v2098_v26, 6  ;;  %v2152_v49 = vrot.slane %v2139_v25, 6 }
 0x61e   :  { %v2100_v16 = vpop.f32.mrf.mxu0  ;;  %v2141_v14 = vpop.f32.mrf.mxu1 }
 0x61f   :  { %v2158_v58 = vadd.f32 %v2150_v43, %v2059_v11  ;;  %v2151_v39 = vrot.slane %v2100_v16, 6  ;;  %v2153_v52 = vrot.slane %v2141_v14, 6  ;;  %v2160_v27 = vadd.f32 %v2152_v49, %v2061_v9 }
 0x620   :  { %v2102_v5 = vpop.f32.mrf.mxu0  ;;  %v2143_v36 = vpop.f32.mrf.mxu1 }
 0x621   :  { %v3088_v3 = vmul.f32 -1.442695, %v2158_v58  ;;  %v2159_v61 = vadd.f32 %v2151_v39, %v2060_v57  ;;  %v2161_v38 = vadd.f32 %v2153_v52, %v2062_v55 }
 0x622   :  { %v2103_v51 = vpop.f32.mrf.mxu0  ;;  %v2144_v30 = vpop.f32.mrf.mxu1 }
 0x623   :  { %3454 = vpow2.f32 %v3088_v3  ;;  %v3089_v53 = vmul.f32 -1.442695, %v2159_v61  ;;  %v3090_v26 = vmul.f32 -1.442695, %v2161_v38  ;;  %v2182_v61 = vrot.slane %v4841_v59, 6 }
 0x625   :  { %3456 = vpow2.f32 %v3089_v53 }
 0x626   :  { %3458 = vpow2.f32 %v3090_v26  ;;  %v6035_v26 = vld [vmem:[#allocation21_spill] sm:$0xff] }
 0x630   :  { %v3455_v10 = vpop.eup %3454 }
 0x631   :  { %v2165_v43 = vadd.f32 1.0, %v3455_v10 }
 0x632   :  { %v3457_v16 = vpop.eup %3456 }
 0x633   :  { %3460 = vrcp.f32 %v2165_v43  ;;  %v2171_v5 = vadd.f32 1.0, %v3457_v16  ;;  %v3459_v58 = vpop.eup %3458  ;;  %v6037_v43 = vld [vmem:[#allocation23_spill] sm:$0xff] }
 0x634   :  { %3462 = vtanh.f32 %v2160_v27  ;;  %v2178_v57 = vadd.f32 1.0, %v3459_v58  ;;  %v6038_v16 = vld [vmem:[#allocation31_spill] sm:$0xff] }
 0x635   :  { %3464 = vrcp.f32 %v2171_v5  ;;  %v6039_v5 = vld [vmem:[#allocation32_spill] sm:$0xff]  ;;  %v6040_v58 = vld [vmem:[#allocation35_spill] sm:$0xff] }
 0x636   :  { %3466 = vrcp.f32 %v2178_v57  ;;  %v6045_v57 = vld [vmem:[#allocation62_spill] sm:$0xff] }
 0x640   :  { %v3461_v30 = vpop.eup %3460 }
 0x641   :  { %v3463_v3 = vpop.eup %3462 }
 0x642   :  { %v3465_v14 = vpop.eup %3464  ;;  %v2185_v36 = vmul.f32 %v3463_v3, %v3461_v30  ;;  %v6042_v30 = vld [vmem:[#allocation59_spill] sm:$0xff]  ;;  %v6043_v3 = vld [vmem:[#allocation60_spill] sm:$0xff] }
 0x643   :  { %v2184_v39 = vmul.f32 %v3465_v14, %v2182_v61  ;;  %v3467_v10 = vpop.eup %3466  ;;  %v6044_v61 = vld [vmem:[#allocation61_spill] sm:$0xff] }
 0x645   :  { %v5017_v38 = vadd.f32 %v2185_v36, %v2184_v39  ;;  %v6046_v36 = vld [vmem:[#allocation63_spill] sm:$0xff] }
 0x647   :  { %3468 = vtanh.f32 %v5017_v38 }
 0x654   :  { %v3469_v9 = vpop.eup %3468 }
 0x655   :  { %v2188_v49 = vmul.f32 %v3469_v9, %v3467_v10  ;;  %v6047_v9 = vld [vmem:[#allocation64_spill] sm:$0xff] }
 0x657   :  { %v2300_v25 = vpack.c.bf16 %v2188_v49, %v2188_v49  ;;  %v6048_v49 = vld [vmem:[#allocation65_spill] sm:$0xff] }
 0x659   :  { %v5020_v27 = vrot.slane %v2300_v25, 1 }
 0x65b   :  { %2337 = vmatmul.mubr.bf16.vlgmr.msra.gmra.mxu0 %v5020_v27  ;;  %2378 = vmatmul.mubr.bf16.vlgmr.msra.gmra.mxu1 %v5020_v27 }
 0x65c   :  { %2437 = vmatpush1.bf16.msra.mxu0 %v4608_v15  ;;  %2478 = vmatpush1.bf16.msra.mxu1 %v4611_v62 }
 0x65d   :  { %2438 = vmatprep.subr.bf16.mxu0 %v4614_v44  ;;  %2479 = vmatprep.subr.bf16.mxu1 %v4617_v1 }
 0x660   :  { %v2224_v59 = vpop.f32.mrf.mxu0  ;;  %v2265_v11 = vpop.f32.mrf.mxu1  ;;  %2439 = vmatpush1.bf16.msra.mxu0 %v4621_v60  ;;  %2480 = vmatpush1.bf16.msra.mxu1 %v4624_v13 }
 0x661   :  { %v2225_v51 = vadd.f32 %v2224_v59, %v4291_v23  ;;  %2440 = vmatprep.subr.bf16.mxu0 %v4628_v8  ;;  %2481 = vmatprep.subr.bf16.mxu1 %v4631_v63  ;;  %v6049_v59 = vld [vmem:[#allocation66_spill] sm:$0xff] }
 0x662   :  { %v2226_v53 = vpop.f32.mrf.mxu0  ;;  %v2267_v15 = vpop.f32.mrf.mxu1 }
 0x663   :  { %v3091_v52 = vmul.f32 -1.442695, %v2225_v51  ;;  %v2227_v62 = vadd.f32 %v2226_v53, %v4297_v50  ;;  %v2268_v8 = vadd.f32 %v2267_v15, %v5954_v35  ;;  %v6051_v15 = vld [vmem:[#allocation68_spill] sm:$0xff] }
 0x664   :  { %v2228_v44 = vpop.f32.mrf.mxu0  ;;  %v2269_v55 = vpop.f32.mrf.mxu1  ;;  %2441 = vmatpush1.bf16.msra.mxu0 %v4634_v42  ;;  %2482 = vmatpush1.bf16.msra.mxu1 %v4637_v37  ;;  %v2266_v37 = vadd.f32 %v2265_v11, %v5961_v47  ;;  %v6050_v11 = vld [vmem:[#allocation67_spill] sm:$0xff] }
 0x665   :  { %3470 = vpow2.f32 %v3091_v52  ;;  %v3092_v1 = vmul.f32 -1.442695, %v2227_v62  ;;  %2442 = vmatprep.subr.bf16.mxu0 %v4640_v41  ;;  %2483 = vmatprep.subr.bf16.mxu1 %v4643_v56  ;;  %v3093_v63 = vmul.f32 -1.442695, %v2268_v8  ;;  %v6052_v52 = vld [vmem:[#allocation69_spill] sm:$0xff]  ;;  %v6053_v62 = vld [vmem:[#allocation70_spill] sm:$0xff] }
 0x666   :  { %v2229_v60 = vpop.f32.mrf.mxu0  ;;  %v2270_v13 = vpop.f32.mrf.mxu1  ;;  %v6054_v44 = vld [vmem:[#allocation71_spill] sm:$0xff]  ;;  %v6055_v55 = vmov 0  }
 0x667   :  { %3472 = vpow2.f32 %v3092_v1  ;;  %v6056_v1 = vld [vmem:[#allocation24_spill] sm:$0xff]  ;;  %v6057_v60 = vld [vmem:[#allocation25_spill] sm:$0xff]  ;;  %v6058_v13 = vld [vmem:[#allocation26_spill] sm:$0xff] }
 0x668   :  { %2443 = vmatpush1.bf16.msra.mxu0 %v5946_v17  ;;  %2484 = vmatpush1.bf16.msra.mxu1 %v5947_v18  ;;  %3474 = vpow2.f32 %v3093_v63  ;;  %v6022_v18 = vld [vmem:[#allocation50_spill] sm:$0xff]  ;;  %v6059_v8 = vld [vmem:[#allocation27_spill] sm:$0xff]  ;;  %v6061_v63 = vld [vmem:[#allocation29_spill] sm:$0xff] }
 0x669   :  { %2444 = vmatprep.subr.bf16.mxu0 %v5948_v28  ;;  %2485 = vmatprep.subr.bf16.mxu1 %v5949_v29  ;;  %v6023_v28 = vld [vmem:[#allocation51_spill] sm:$0xff]  ;;  %v6024_v29 = vld [vmem:[#allocation52_spill] sm:$0xff] }
 0x66c   :  { %2445 = vmatpush1.bf16.msra.mxu0 %v5950_v31  ;;  %2486 = vmatpush1.bf16.msra.mxu1 %v5951_v32  ;;  %v6025_v31 = vld [vmem:[#allocation53_spill] sm:$0xff] }
 0x66d   :  { %2446 = vmatprep.subr.bf16.mxu0 %v5952_v33  ;;  %2487 = vmatprep.subr.bf16.mxu1 %v5953_v34  ;;  %v6026_v33 = vld [vmem:[#allocation54_spill] sm:$0xff]  ;;  %v6027_v34 = vld [vmem:[#allocation11_spill] sm:$0xff] }
 0x670   :  { %2447 = vmatpush1.bf16.msra.mxu0 %v5955_v12  ;;  %2488 = vmatpush1.bf16.msra.mxu1 %v5956_v19 }
 0x671   :  { %2448 = vmatprep.subr.bf16.mxu0 %v5957_v20  ;;  %2489 = vmatprep.subr.bf16.mxu1 %v5958_v22 }
 0x672   :  { %v3471_v42 = vpop.eup %3470 }
 0x673   :  { %v2275_v41 = vadd.f32 1.0, %v3471_v42  ;;  %v6062_v42 = vld [vmem:[#allocation30_spill] sm:$0xff] }
 0x674   :  { %v3473_v56 = vpop.eup %3472  ;;  %2449 = vmatpush1.bf16.msra.mxu0 %v5959_v40  ;;  %2490 = vmatpush1.bf16.msra.mxu1 %v5960_v46  ;;  %v6028_v40 = vld [vmem:[#allocation12_spill] sm:$0xff]  ;;  %v6029_v46 = vld [vmem:[#allocation13_spill] sm:$0xff] }
 0x675   :  { %3476 = vrcp.f32 %v2275_v41  ;;  %v2281_v17 = vadd.f32 1.0, %v3473_v56  ;;  %2450 = vmatprep.subr.bf16.mxu0 %v5962_v21  ;;  %2491 = vmatprep.subr.bf16.mxu1 %v5963_v54  ;;  %v3475_v32 = vpop.eup %3474  ;;  %v6064_v41 = vld [vmem:[#allocation34_spill] sm:$0xff]  ;;  %v6065_v56 = vld [vmem:[#allocation36_spill] sm:$0xff] }
 0x676   :  { %3478 = vtanh.f32 %v2266_v37  ;;  %v2288_v22 = vadd.f32 1.0, %v3475_v32  ;;  %v6063_v37 = vld [vmem:[#allocation33_spill] sm:$0xff]  ;;  %v6071_v32 = vld [vmem:[#allocation43_spill] sm:$0xff] }
 0x677   :  { %3480 = vrcp.f32 %v2281_v17  ;;  %v6066_v17 = vld [vmem:[#allocation38_spill] sm:$0xff] }
 0x678   :  { %2451 = vmatpush1.bf16.msra.mxu0 %v5964_v48  ;;  %2492 = vmatpush1.bf16.msra.mxu1 %v5965_v4  ;;  %v6030_v48 = vld [vmem:[#allocation14_spill] sm:$0xff]  ;;  %v6031_v4 = vld [vmem:[#allocation15_spill] sm:$0xff]  ;;  %3482 = vrcp.f32 %v2288_v22  ;;  %v6077_v22 = vld [vmem:[#allocation49_spill] sm:$0xff] }
 0x679   :  { %2452 = vmatprep.subr.bf16.mxu0 %v5966_v6  ;;  %2493 = vmatprep.subr.bf16.mxu1 %v5967_v7  ;;  %v6032_v7 = vld [vmem:[#allocation18_spill] sm:$0xff] }
 0x67c   :  { %2453 = vmatpush2.bf16.msra.mxu0 %v5968_v45  ;;  %2494 = vmatpush2.bf16.msra.mxu1 %v5969_v2  ;;  %v6033_v45 = vld [vmem:[#allocation19_spill] sm:$0xff]  ;;  %v6034_v2 = vld [vmem:[#allocation20_spill] sm:$0xff] }
 0x67d   :  { %2454 = vmatprep.subr.bf16.mxu0 %v6022_v18  ;;  %2495 = vmatprep.subr.bf16.mxu1 %v6023_v28  ;;  %v6067_v18 = vld [vmem:[#allocation39_spill] sm:$0xff]  ;;  %v6068_v28 = vld [vmem:[#allocation40_spill] sm:$0xff] }
 0x680   :  { %2455 = vmatpush2.bf16.msra.mxu0 %v6024_v29  ;;  %2496 = vmatpush2.bf16.msra.mxu1 %v6025_v31  ;;  %v6069_v29 = vld [vmem:[#allocation41_spill] sm:$0xff]  ;;  %v6070_v31 = vld [vmem:[#allocation42_spill] sm:$0xff] }
 0x681   :  { %2456 = vmatprep.subr.bf16.mxu0 %v6026_v33  ;;  %2497 = vmatprep.subr.bf16.mxu1 %v6027_v34  ;;  %v6072_v33 = vld [vmem:[#allocation44_spill] sm:$0xff]  ;;  %v6073_v34 = vld [vmem:[#allocation45_spill] sm:$0xff] }
 0x682   :  { %v3477_v12 = vpop.eup %3476 }
 0x683   :  { %v3479_v19 = vpop.eup %3478 }
 0x684   :  { %v3481_v20 = vpop.eup %3480  ;;  %2457 = vmatpush2.bf16.msra.mxu0 %v6028_v40  ;;  %2498 = vmatpush2.bf16.msra.mxu1 %v6029_v46  ;;  %v2292_v21 = vmul.f32 %v3479_v19, %v3477_v12  ;;  %v6074_v12 = vld [vmem:[#allocation46_spill] sm:$0xff]  ;;  %v6075_v19 = vld [vmem:[#allocation47_spill] sm:$0xff]  ;;  %v6078_v40 = vld [vmem:[#allocation16_spill] sm:$0xff] }
 0x685   :  { %v2291_v54 = vmul.f32 %v3481_v20, %v4901_v0  ;;  %2458 = vmatprep.subr.bf16.mxu0 %v6030_v48  ;;  %2499 = vmatprep.subr.bf16.mxu1 %v6031_v4  ;;  %v6036_v0 = vld [vmem:[#allocation22_spill] sm:$0xff]  ;;  %v3483_v14 = vpop.eup %3482  ;;  %v6076_v20 = vld [vmem:[#allocation48_spill] sm:$0xff]  ;;  %v6079_v46 = vld [vmem:[#allocation17_spill] sm:$0xff] }
 0x686   :  { %v5128_v48 = vld [vmem:[#allocation8 + $0xe4] ss:$16 sps:$4 sm:$0xff]   ;;  %v5131_v4 = vld [vmem:[#allocation8 + $0xec] ss:$16 sps:$4 sm:$0xff]  }
 0x687   :  { %v5073_v6 = vadd.f32 %v2292_v21, %v2291_v54  ;;  %v3692_v21 = vld [vmem:[#allocation6] ss:$16 sps:$4 sm:$0xff]   ;;  %v3693_v54 = vld [vmem:[#allocation6 + $0x8] ss:$16 sps:$4 sm:$0xff]  }
 0x688   :  { %2459 = vmatpush2.bf16.msra.mxu0 %v5978_v24  ;;  %2500 = vmatpush2.bf16.msra.mxu1 %v6032_v7  ;;  %v6041_v24 = vld [vmem:[#allocation37_spill] sm:$0xff] }
 0x689   :  { %2460 = vmatprep.subr.bf16.mxu0 %v6033_v45  ;;  %2501 = vmatprep.subr.bf16.mxu1 %v6034_v2  ;;  %3484 = vtanh.f32 %v5073_v6 }
 0x68c   :  { %2461 = vmatpush2.bf16.msra.mxu0 %v6035_v26  ;;  %2502 = vmatpush2.bf16.msra.mxu1 %v6036_v0  ;;  %v2296_v26 = vld [vmem:[#allocation2 + $0x8] sm:$0x30] }
 0x68d   :  { %2462 = vmatprep.subr.bf16.mxu0 %v6037_v43  ;;  %2503 = vmatprep.subr.bf16.mxu1 %v6038_v16 }
 0x690   :  { %2463 = vmatpush2.bf16.msra.mxu0 %v6039_v5  ;;  %2504 = vmatpush2.bf16.msra.mxu1 %v6040_v58  ;;  %v2297_v58 = vld [vmem:[#allocation2 + $0x20] sm:$0x30] }
 0x691   :  { %2464 = vmatprep.subr.bf16.mxu0 %v6041_v24  ;;  %2505 = vmatprep.subr.bf16.mxu1 %v6042_v30 }
 0x694   :  { %2465 = vmatpush2.bf16.msra.mxu0 %v6043_v3  ;;  %2506 = vmatpush2.bf16.msra.mxu1 %v6044_v61 }
 0x695   :  { %2466 = vmatprep.subr.bf16.mxu0 %v6045_v57  ;;  %2507 = vmatprep.subr.bf16.mxu1 %v6046_v36 }
 0x696   :  { %v3485_v39 = vpop.eup %3484 }
 0x697   :  { %v2295_v10 = vmul.f32 %v3485_v39, %v3483_v14 }
 0x698   :  { %2467 = vmatpush2.bf16.msra.mxu0 %v6047_v9  ;;  %2508 = vmatpush2.bf16.msra.mxu1 %v6048_v49 }
 0x699   :  { %v2430_v25 = vrot.slane %v2295_v10, 6  ;;  %2550 = vmatprep.subr.bf16.mxu0 %v6049_v59  ;;  %2591 = vmatprep.subr.bf16.mxu1 %v6050_v11  ;;  %v2299_v10 = vld [vmem:[#allocation2 + $0x38] sm:$0x30]  ;;  %v2298_v59 = vld [vmem:[#allocation2 + $0x28] sm:$0x30] }
 0x69b   :  { %v2432_v51 = vpack.c.bf16 %v2430_v25, %v2430_v25 }
 0x69d   :  { %v2434_v53 = vrot.slane %v2432_v51, 1 }
 0x69f   :  { %2468 = vmatprep.mubr.bf16.mxu0 %v2434_v53  ;;  %2509 = vmatprep.mubr.bf16.mxu1 %v2434_v53 }
 0x6a0   :  { %2469 = vmatmul.mubr.bf16.vlgmr.msra.gmra.mxu0 %v5020_v27  ;;  %2510 = vmatmul.mubr.bf16.vlgmr.msra.gmra.mxu1 %v5020_v27  ;;  %v6060_v27 = vld [vmem:[#allocation28_spill] sm:$0xff] }
 0x6a1   :  { %2551 = vmatpush1.bf16.msra.mxu0 %v6051_v15  ;;  %2592 = vmatpush1.bf16.msra.mxu1 %v6052_v52 }
 0x6a2   :  { %2552 = vmatprep.subr.bf16.mxu0 %v6053_v62  ;;  %2593 = vmatprep.subr.bf16.mxu1 %v6054_v44 }
 0x6a3   :  { %2582 = vmatprep.mubr.bf16.mxu0 %v6055_v55  ;;  %2623 = vmatprep.mubr.bf16.mxu1 %v6055_v55 }
 0x6a5   :  { %2553 = vmatpush1.bf16.msra.mxu0 %v6056_v1  ;;  %2594 = vmatpush1.bf16.msra.mxu1 %v6057_v60  ;;  %v2422_v1 = vrot.slane %v5017_v38, 6  ;;  %v5142_v38 = vld [vmem:[#allocation8 + $0xe0] ss:$16 sps:$4 sm:$0xff]  }
 0x6a6   :  { %2554 = vmatprep.subr.bf16.mxu0 %v6058_v13  ;;  %2595 = vmatprep.subr.bf16.mxu1 %v6059_v8 }
 0x6a9   :  { %2555 = vmatpush1.bf16.msra.mxu0 %v6060_v27  ;;  %2596 = vmatpush1.bf16.msra.mxu1 %v6061_v63 }
 0x6aa   :  { %2556 = vmatprep.subr.bf16.mxu0 %v6062_v42  ;;  %2597 = vmatprep.subr.bf16.mxu1 %v6063_v37 }
 0x6ad   :  { %2557 = vmatpush1.bf16.msra.mxu0 %v6064_v41  ;;  %2598 = vmatpush1.bf16.msra.mxu1 %v6065_v56 }
 0x6ae   :  { %2558 = vmatprep.subr.bf16.mxu0 %v6066_v17  ;;  %2599 = vmatprep.subr.bf16.mxu1 %v6067_v18  ;;  %v5145_v18 = vld [vmem:[#allocation8 + $0xe8] ss:$16 sps:$4 sm:$0xff]  }
 0x6b1   :  { %2559 = vmatpush1.bf16.msra.mxu0 %v6068_v28  ;;  %2600 = vmatpush1.bf16.msra.mxu1 %v6069_v29  ;;  %v5148_v28 = vld [vmem:[#allocation8 + $0xc4] ss:$16 sps:$4 sm:$0xff]   ;;  %v5151_v29 = vld [vmem:[#allocation8 + $0xcc] ss:$16 sps:$4 sm:$0xff]  }
 0x6b2   :  { %2560 = vmatprep.subr.bf16.mxu0 %v6070_v31  ;;  %2601 = vmatprep.subr.bf16.mxu1 %v6071_v32  ;;  %v5154_v31 = vld [vmem:[#allocation8 + $0xc0] ss:$16 sps:$4 sm:$0xff]   ;;  %v5157_v32 = vld [vmem:[#allocation8 + $0xc8] ss:$16 sps:$4 sm:$0xff]  }
 0x6b5   :  { %2561 = vmatpush1.bf16.msra.mxu0 %v6072_v33  ;;  %2602 = vmatpush1.bf16.msra.mxu1 %v6073_v34 }
 0x6b6   :  { %2562 = vmatprep.subr.bf16.mxu0 %v6074_v12  ;;  %2603 = vmatprep.subr.bf16.mxu1 %v6075_v19  ;;  %v5160_v12 = vld [vmem:[#allocation8 + $0xa4] ss:$16 sps:$4 sm:$0xff]   ;;  %v5163_v19 = vld [vmem:[#allocation8 + $0xac] ss:$16 sps:$4 sm:$0xff]  }
 0x6b9   :  { %2563 = vmatpush1.bf16.msra.mxu0 %v6076_v20  ;;  %2604 = vmatpush1.bf16.msra.mxu1 %v6077_v22 }
 0x6ba   :  { %2564 = vmatprep.subr.bf16.mxu0 %v6078_v40  ;;  %2605 = vmatprep.subr.bf16.mxu1 %v6079_v46 }
 0x6bd   :  { %2565 = vmatpush1.bf16.msra.mxu0 %v3692_v21  ;;  %2606 = vmatpush1.bf16.msra.mxu1 %v3693_v54  ;;  %v5168_v54 = vld [vmem:[#allocation8 + $0xa0] ss:$16 sps:$4 sm:$0xff]  }
 0x6be   :  { %2682 = vmatprep.subr.bf16.mxu0 %v5128_v48  ;;  %2723 = vmatprep.subr.bf16.mxu1 %v5131_v4 }
 0x71b   :  { %v2338_v7 = vpop.f32.mrf.mxu0  ;;  %v2379_v45 = vpop.f32.mrf.mxu1 }
 0x71c   :  { %v2390_v2 = vrot.slane %v2338_v7, 4  ;;  %v2392_v49 = vrot.slane %v2379_v45, 4  ;;  %v5171_v7 = vld [vmem:[#allocation8 + $0xa8] ss:$16 sps:$4 sm:$0xff]  }
 0x71d   :  { %v2340_v0 = vpop.f32.mrf.mxu0  ;;  %v2381_v43 = vpop.f32.mrf.mxu1 }
 0x71e   :  { %v2398_v16 = vadd.f32 %v2390_v2, %v2296_v26  ;;  %v2391_v5 = vrot.slane %v2340_v0, 4  ;;  %v2393_v39 = vrot.slane %v2381_v43, 4  ;;  %v2400_v51 = vadd.f32 %v2392_v49, %v2298_v59  ;;  %v5174_v26 = vld [vmem:[#allocation8 + $0x84] ss:$16 sps:$4 sm:$0xff]   ;;  %v5177_v0 = vld [vmem:[#allocation8 + $0x8c] ss:$16 sps:$4 sm:$0xff]  }
 0x71f   :  { %v2342_v24 = vpop.f32.mrf.mxu0  ;;  %v2383_v30 = vpop.f32.mrf.mxu1  ;;  %v5214_v59 = vld [vmem:[#allocation8 + $0x2c] ss:$16 sps:$4 sm:$0xff]  }
 0x720   :  { %v3094_v3 = vmul.f32 -1.442695, %v2398_v16  ;;  %v2399_v61 = vadd.f32 %v2391_v5, %v2297_v58  ;;  %v2401_v9 = vadd.f32 %v2393_v39, %v2299_v10  ;;  %v5180_v58 = vld [vmem:[#allocation8 + $0x80] ss:$16 sps:$4 sm:$0xff]   ;;  %v5183_v24 = vld [vmem:[#allocation8 + $0x88] ss:$16 sps:$4 sm:$0xff]  }
 0x721   :  { %v2343_v14 = vpop.f32.mrf.mxu0  ;;  %v2384_v57 = vpop.f32.mrf.mxu1  ;;  %v5186_v30 = vld [vmem:[#allocation8 + $0x64] ss:$16 sps:$4 sm:$0xff]   ;;  %v5202_v39 = vld [vmem:[#allocation8 + $0x4c] ss:$16 sps:$4 sm:$0xff]   ;;  %v5205_v10 = vld [vmem:[#allocation8 + $0x40] ss:$16 sps:$4 sm:$0xff]  }
 0x722   :  { %3486 = vpow2.f32 %v3094_v3  ;;  %v3095_v36 = vmul.f32 -1.442695, %v2399_v61  ;;  %v3096_v25 = vmul.f32 -1.442695, %v2401_v9  ;;  %v5189_v3 = vld [vmem:[#allocation8 + $0x6c] ss:$16 sps:$4 sm:$0xff]  }
 0x723   :  { %v5192_v61 = vld [vmem:[#allocation8 + $0x60] ss:$16 sps:$4 sm:$0xff]   ;;  %v5195_v14 = vld [vmem:[#allocation8 + $0x68] ss:$16 sps:$4 sm:$0xff]  }
 0x724   :  { %3488 = vpow2.f32 %v3095_v36  ;;  %v5199_v36 = vld [vmem:[#allocation8 + $0x44] ss:$16 sps:$4 sm:$0xff]   ;;  %v5208_v9 = vld [vmem:[#allocation8 + $0x48] ss:$16 sps:$4 sm:$0xff]  }
 0x725   :  { %3490 = vpow2.f32 %v3096_v25  ;;  %v5211_v25 = vld [vmem:[#allocation8 + $0x24] ss:$16 sps:$4 sm:$0xff]  }
 0x72f   :  { %v3487_v11 = vpop.eup %3486 }
 0x730   :  { %v2405_v53 = vadd.f32 1.0, %v3487_v11 }
 0x731   :  { %v3489_v15 = vpop.eup %3488 }
 0x732   :  { %3492 = vrcp.f32 %v2405_v53  ;;  %v2411_v52 = vadd.f32 1.0, %v3489_v15  ;;  %v3491_v62 = vpop.eup %3490  ;;  %v5218_v15 = vld [vmem:[#allocation8 + $0x20] ss:$16 sps:$4 sm:$0xff]  }
 0x733   :  { %3494 = vtanh.f32 %v2400_v51  ;;  %v2418_v13 = vadd.f32 1.0, %v3491_v62 }
 0x734   :  { %3496 = vrcp.f32 %v2411_v52  ;;  %v5221_v52 = vld [vmem:[#allocation8 + $0x28] ss:$16 sps:$4 sm:$0xff]  }
 0x735   :  { %3498 = vrcp.f32 %v2418_v13  ;;  %v5233_v13 = vld [vmem:[#allocation8 + $0x8] ss:$16 sps:$4 sm:$0xff]  }
 0x73f   :  { %v3493_v44 = vpop.eup %3492 }
 0x740   :  { %v3495_v55 = vpop.eup %3494 }
 0x741   :  { %v3497_v60 = vpop.eup %3496  ;;  %v2425_v8 = vmul.f32 %v3495_v55, %v3493_v44  ;;  %v5224_v44 = vld [vmem:[#allocation8 + $0x4] ss:$16 sps:$4 sm:$0xff]   ;;  %v5227_v55 = vld [vmem:[#allocation8 + $0xc] ss:$16 sps:$4 sm:$0xff]  }
 0x742   :  { %v2424_v27 = vmul.f32 %v3497_v60, %v2422_v1  ;;  %v3499_v42 = vpop.eup %3498  ;;  %v5230_v60 = vld [vmem:[#allocation8] ss:$16 sps:$4 sm:$0xff]  }
 0x744   :  { %v5135_v63 = vadd.f32 %v2425_v8, %v2424_v27  ;;  %v5236_v8 = vld [vmem:[#allocation8 + $0x1e4] ss:$16 sps:$4 sm:$0xff]   ;;  %v5239_v27 = vld [vmem:[#allocation8 + $0x1ec] ss:$16 sps:$4 sm:$0xff]  }
 0x746   :  { %6080 = vst [vmem:[#allocation50_spill] sm:$0xff] %v5135_v63  ;;  %3500 = vtanh.f32 %v5135_v63 }
 0x753   :  { %v3501_v37 = vpop.eup %3500 }
 0x754   :  { %v2428_v41 = vmul.f32 %v3501_v37, %v3499_v42  ;;  %v5242_v42 = vld [vmem:[#allocation8 + $0x1e0] ss:$16 sps:$4 sm:$0xff]   ;;  %v5245_v37 = vld [vmem:[#allocation8 + $0x1e8] ss:$16 sps:$4 sm:$0xff]  }
 0x756   :  { %v2546_v56 = vpack.c.bf16 %v2428_v41, %v2428_v41  ;;  %v5248_v41 = vld [vmem:[#allocation8 + $0x1c4] ss:$16 sps:$4 sm:$0xff]  }
 0x758   :  { %v5138_v17 = vrot.slane %v2546_v56, 2  ;;  %v5251_v56 = vld [vmem:[#allocation8 + $0x1cc] ss:$16 sps:$4 sm:$0xff]  }
 0x75a   :  { %2583 = vmatmul.mubr.bf16.vlgmr.msra.gmra.mxu0 %v5138_v17  ;;  %2624 = vmatmul.mubr.bf16.vlgmr.msra.gmra.mxu1 %v5138_v17 }
 0x75b   :  { %2683 = vmatpush1.bf16.msra.mxu0 %v5142_v38  ;;  %2724 = vmatpush1.bf16.msra.mxu1 %v5145_v18 }
 0x75c   :  { %2684 = vmatprep.subr.bf16.mxu0 %v5148_v28  ;;  %2725 = vmatprep.subr.bf16.mxu1 %v5151_v29 }
 0x75f   :  { %2685 = vmatpush1.bf16.msra.mxu0 %v5154_v31  ;;  %2726 = vmatpush1.bf16.msra.mxu1 %v5157_v32 }
 0x760   :  { %v2470_v33 = vpop.f32.mrf.mxu0  ;;  %v2511_v34 = vpop.f32.mrf.mxu1  ;;  %2686 = vmatprep.subr.bf16.mxu0 %v5160_v12  ;;  %2727 = vmatprep.subr.bf16.mxu1 %v5163_v19 }
 0x761   :  { %v2471_v20 = vadd.f32 %v2470_v33, %v4291_v23  ;;  %v2512_v51 = vadd.f32 %v2511_v34, %v5961_v47  ;;  %v5254_v33 = vld [vmem:[#allocation8 + $0x1c0] ss:$16 sps:$4 sm:$0xff]   ;;  %v5257_v34 = vld [vmem:[#allocation8 + $0x1c8] ss:$16 sps:$4 sm:$0xff]   ;;  %v5327_v23 = vld [vmem:[#allocation8 + $0x10c] ss:$16 sps:$4 sm:$0xff]  }
 0x762   :  { %v2472_v22 = vpop.f32.mrf.mxu0  ;;  %v2513_v40 = vpop.f32.mrf.mxu1  ;;  %v5318_v47 = vld [vmem:[#allocation8 + $0x120] ss:$16 sps:$4 sm:$0xff]  }
 0x763   :  { %v3097_v46 = vmul.f32 -1.442695, %v2471_v20  ;;  %v2473_v21 = vadd.f32 %v2472_v22, %v4297_v50  ;;  %2687 = vmatpush1.bf16.msra.mxu0 %v5168_v54  ;;  %2728 = vmatpush1.bf16.msra.mxu1 %v5171_v7  ;;  %v2514_v57 = vadd.f32 %v2513_v40, %v5954_v35  ;;  %v5260_v20 = vld [vmem:[#allocation8 + $0x1a4] ss:$16 sps:$4 sm:$0xff]   ;;  %v5263_v22 = vld [vmem:[#allocation8 + $0x1ac] ss:$16 sps:$4 sm:$0xff]  }
 0x764   :  { %v2474_v45 = vpop.f32.mrf.mxu0  ;;  %v2515_v2 = vpop.f32.mrf.mxu1  ;;  %2688 = vmatprep.subr.bf16.mxu0 %v5174_v26  ;;  %2729 = vmatprep.subr.bf16.mxu1 %v5177_v0  ;;  %6086 = vst [vmem:[#allocation12_spill] sm:$0xff] %v5318_v47  ;;  %v5321_v35 = vld [vmem:[#allocation8 + $0x128] ss:$16 sps:$4 sm:$0xff]   ;;  %v5324_v50 = vld [vmem:[#allocation8 + $0x104] ss:$16 sps:$4 sm:$0xff]  }
 0x765   :  { %3502 = vpow2.f32 %v3097_v46  ;;  %v3098_v43 = vmul.f32 -1.442695, %v2473_v21  ;;  %v3099_v49 = vmul.f32 -1.442695, %v2514_v57  ;;  %v5266_v45 = vld [vmem:[#allocation8 + $0x1a0] ss:$16 sps:$4 sm:$0xff]  }
 0x766   :  { %v2475_v16 = vpop.f32.mrf.mxu0  ;;  %v2516_v5 = vpop.f32.mrf.mxu1  ;;  %v5269_v2 = vld [vmem:[#allocation8 + $0x1a8] ss:$16 sps:$4 sm:$0xff]   ;;  %v5275_v57 = vld [vmem:[#allocation8 + $0x18c] ss:$16 sps:$4 sm:$0xff]   ;;  %6087 = vst [vmem:[#allocation13_spill] sm:$0xff] %v5321_v35  ;;  %6088 = vst [vmem:[#allocation14_spill] sm:$0xff] %v5324_v50 }
 0x767   :  { %3504 = vpow2.f32 %v3098_v43  ;;  %2689 = vmatpush1.bf16.msra.mxu0 %v5180_v58  ;;  %2730 = vmatpush1.bf16.msra.mxu1 %v5183_v24  ;;  %v5272_v5 = vld [vmem:[#allocation8 + $0x184] ss:$16 sps:$4 sm:$0xff]  }
 0x768   :  { %2690 = vmatprep.subr.bf16.mxu0 %v5186_v30  ;;  %2731 = vmatprep.subr.bf16.mxu1 %v5189_v3  ;;  %3506 = vpow2.f32 %v3099_v49 }
 0x76b   :  { %2691 = vmatpush1.bf16.msra.mxu0 %v5192_v61  ;;  %2732 = vmatpush1.bf16.msra.mxu1 %v5195_v14 }
 0x76c   :  { %2692 = vmatprep.subr.bf16.mxu0 %v5199_v36  ;;  %2733 = vmatprep.subr.bf16.mxu1 %v5202_v39 }
 0x76f   :  { %2693 = vmatpush1.bf16.msra.mxu0 %v5205_v10  ;;  %2734 = vmatpush1.bf16.msra.mxu1 %v5208_v9 }
 0x770   :  { %2694 = vmatprep.subr.bf16.mxu0 %v5211_v25  ;;  %2735 = vmatprep.subr.bf16.mxu1 %v5214_v59 }
 0x772   :  { %v3503_v11 = vpop.eup %3502 }
 0x773   :  { %v2521_v53 = vadd.f32 1.0, %v3503_v11  ;;  %2695 = vmatpush1.bf16.msra.mxu0 %v5218_v15  ;;  %2736 = vmatpush1.bf16.msra.mxu1 %v5221_v52 }
 0x774   :  { %v3505_v62 = vpop.eup %3504  ;;  %2696 = vmatprep.subr.bf16.mxu0 %v5224_v44  ;;  %2737 = vmatprep.subr.bf16.mxu1 %v5227_v55 }
 0x775   :  { %3508 = vrcp.f32 %v2521_v53  ;;  %v2527_v1 = vadd.f32 1.0, %v3505_v62  ;;  %v3507_v40 = vpop.eup %3506  ;;  %v5282_v53 = vld [vmem:[#allocation8 + $0x188] ss:$16 sps:$4 sm:$0xff]  }
 0x776   :  { %3510 = vtanh.f32 %v2512_v51  ;;  %v2534_v16 = vadd.f32 1.0, %v3507_v40  ;;  %v5279_v51 = vld [vmem:[#allocation8 + $0x180] ss:$16 sps:$4 sm:$0xff]   ;;  %v5290_v40 = vld [vmem:[#allocation8 + $0x16c] ss:$16 sps:$4 sm:$0xff]  }
 0x777   :  { %3512 = vrcp.f32 %v2527_v1  ;;  %2697 = vmatpush1.bf16.msra.mxu0 %v5230_v60  ;;  %2738 = vmatpush1.bf16.msra.mxu1 %v5233_v13  ;;  %v5287_v1 = vld [vmem:[#allocation8 + $0x164] ss:$16 sps:$4 sm:$0xff]  }
 0x778   :  { %2698 = vmatprep.subr.bf16.mxu0 %v5236_v8  ;;  %2739 = vmatprep.subr.bf16.mxu1 %v5239_v27  ;;  %3514 = vrcp.f32 %v2534_v16  ;;  %v5306_v16 = vld [vmem:[#allocation8 + $0x140] ss:$16 sps:$4 sm:$0xff]  }
 0x779   :  { %6082 = vst [vmem:[#allocation52_spill] sm:$0xff] %v5306_v16 }
 0x77b   :  { %2699 = vmatpush2.bf16.msra.mxu0 %v5242_v42  ;;  %2740 = vmatpush2.bf16.msra.mxu1 %v5245_v37 }
 0x77c   :  { %2700 = vmatprep.subr.bf16.mxu0 %v5248_v41  ;;  %2741 = vmatprep.subr.bf16.mxu1 %v5251_v56 }
 0x77f   :  { %2701 = vmatpush2.bf16.msra.mxu0 %v5254_v33  ;;  %2742 = vmatpush2.bf16.msra.mxu1 %v5257_v34 }
 0x780   :  { %2702 = vmatprep.subr.bf16.mxu0 %v5260_v20  ;;  %2743 = vmatprep.subr.bf16.mxu1 %v5263_v22 }
 0x782   :  { %v3509_v46 = vpop.eup %3508 }
 0x783   :  { %v3511_v21 = vpop.eup %3510  ;;  %2703 = vmatpush2.bf16.msra.mxu0 %v5266_v45  ;;  %2744 = vmatpush2.bf16.msra.mxu1 %v5269_v2 }
 0x784   :  { %v3513_v43 = vpop.eup %3512  ;;  %2704 = vmatprep.subr.bf16.mxu0 %v5272_v5  ;;  %2745 = vmatprep.subr.bf16.mxu1 %v5275_v57  ;;  %v2538_v49 = vmul.f32 %v3511_v21, %v3509_v46  ;;  %v5297_v46 = vld [vmem:[#allocation8 + $0x168] ss:$16 sps:$4 sm:$0xff]   ;;  %v5300_v21 = vld [vmem:[#allocation8 + $0x144] ss:$16 sps:$4 sm:$0xff]  }
 0x785   :  { %v2537_v11 = vmul.f32 %v3513_v43, %v5073_v6  ;;  %v5294_v6 = vld [vmem:[#allocation8 + $0x160] ss:$16 sps:$4 sm:$0xff]   ;;  %v5303_v43 = vld [vmem:[#allocation8 + $0x14c] ss:$16 sps:$4 sm:$0xff]   ;;  %v3515_v63 = vpop.eup %3514 }
 0x787   :  { %2705 = vmatpush2.bf16.msra.mxu0 %v5279_v51  ;;  %2746 = vmatpush2.bf16.msra.mxu1 %v5282_v53  ;;  %v5285_v62 = vadd.f32 %v2538_v49, %v2537_v11  ;;  %v5309_v49 = vld [vmem:[#allocation8 + $0x148] ss:$16 sps:$4 sm:$0xff]   ;;  %v5312_v11 = vld [vmem:[#allocation8 + $0x124] ss:$16 sps:$4 sm:$0xff]  }
 0x788   :  { %2706 = vmatprep.subr.bf16.mxu0 %v5287_v1  ;;  %2747 = vmatprep.subr.bf16.mxu1 %v5290_v40  ;;  %6083 = vst [vmem:[#allocation53_spill] sm:$0xff] %v5309_v49  ;;  %6084 = vst [vmem:[#allocation54_spill] sm:$0xff] %v5312_v11 }
 0x789   :  { %6081 = vst [vmem:[#allocation51_spill] sm:$0xff] %v5285_v62  ;;  %3516 = vtanh.f32 %v5285_v62  ;;  %v5315_v62 = vld [vmem:[#allocation8 + $0x12c] ss:$16 sps:$4 sm:$0xff]  }
 0x78a   :  { %6085 = vst [vmem:[#allocation11_spill] sm:$0xff] %v5315_v62 }
 0x78b   :  { %2707 = vmatpush2.bf16.msra.mxu0 %v5294_v6  ;;  %2748 = vmatpush2.bf16.msra.mxu1 %v5297_v46 }
 0x78c   :  { %2708 = vmatprep.subr.bf16.mxu0 %v5300_v21  ;;  %2749 = vmatprep.subr.bf16.mxu1 %v5303_v43 }
 0x78f   :  { %2709 = vmatpush2.bf16.msra.mxu0 %v5306_v16  ;;  %2750 = vmatpush2.bf16.msra.mxu1 %v5309_v49  ;;  %v5330_v49 = vld [vmem:[#allocation8 + $0x100] ss:$16 sps:$4 sm:$0xff]  }
 0x790   :  { %2710 = vmatprep.subr.bf16.mxu0 %v5312_v11  ;;  %2751 = vmatprep.subr.bf16.mxu1 %v5315_v62  ;;  %v5333_v62 = vld [vmem:[#allocation8 + $0x108] ss:$16 sps:$4 sm:$0xff]  }
 0x793   :  { %2711 = vmatpush2.bf16.msra.mxu0 %v5318_v47  ;;  %2752 = vmatpush2.bf16.msra.mxu1 %v5321_v35 }
 0x794   :  { %2712 = vmatprep.subr.bf16.mxu0 %v5324_v50  ;;  %2753 = vmatprep.subr.bf16.mxu1 %v5327_v23 }
 0x796   :  { %v3517_v11 = vpop.eup %3516 }
 0x797   :  { %2713 = vmatpush2.bf16.msra.mxu0 %v5330_v49  ;;  %2754 = vmatpush2.bf16.msra.mxu1 %v5333_v62  ;;  %v2541_v47 = vmul.f32 %v3517_v11, %v3515_v63  ;;  %v6094_v63 = vld [vmem:[#allocation13_spill] sm:$0xff] }
 0x798   :  { %2799 = vmatprep.subr.bf16.mxu0 %v5128_v48  ;;  %2840 = vmatprep.subr.bf16.mxu1 %v5131_v4  ;;  %v6092_v48 = vld [vmem:[#allocation11_spill] sm:$0xff]  ;;  %v6093_v4 = vld [vmem:[#allocation12_spill] sm:$0xff] }
 0x799   :  { %v2676_v50 = vrot.slane %v2541_v47, 4  ;;  %v6091_v47 = vld [vmem:[#allocation54_spill] sm:$0xff] }
 0x79b   :  { %v2678_v35 = vpack.c.bf16 %v2676_v50, %v2676_v50  ;;  %v6089_v50 = vld [vmem:[#allocation52_spill] sm:$0xff] }
 0x79d   :  { %v2680_v16 = vrot.slane %v2678_v35, 2  ;;  %v6090_v35 = vld [vmem:[#allocation53_spill] sm:$0xff] }
 0x79f   :  { %2714 = vmatprep.mubr.bf16.mxu0 %v2680_v16  ;;  %2755 = vmatprep.mubr.bf16.mxu1 %v2680_v16  ;;  %v6099_v16 = vld [vmem:[#allocation57_spill] sm:$0xff] }
 0x7a0   :  { %2715 = vmatmul.mubr.bf16.vlgmr.msra.gmra.mxu0 %v5138_v17  ;;  %2756 = vmatmul.mubr.bf16.vlgmr.msra.gmra.mxu1 %v5138_v17  ;;  %v6095_v17 = vld [vmem:[#allocation14_spill] sm:$0xff] }
 0x7a1   :  { %2800 = vmatpush1.bf16.msra.mxu0 %v5142_v38  ;;  %2841 = vmatpush1.bf16.msra.mxu1 %v5145_v18 }
 0x7a2   :  { %2801 = vmatprep.subr.bf16.mxu0 %v5148_v28  ;;  %2842 = vmatprep.subr.bf16.mxu1 %v5151_v29  ;;  %v2542_v29 = vld [vmem:[#allocation2 + $0x8] sm:$0xc0] }
 0x7a5   :  { %2802 = vmatpush1.bf16.msra.mxu0 %v5154_v31  ;;  %2843 = vmatpush1.bf16.msra.mxu1 %v5157_v32 }
 0x7a6   :  { %2803 = vmatprep.subr.bf16.mxu0 %v5160_v12  ;;  %2844 = vmatprep.subr.bf16.mxu1 %v5163_v19 }
 0x7a9   :  { %2804 = vmatpush1.bf16.msra.mxu0 %v5168_v54  ;;  %2845 = vmatpush1.bf16.msra.mxu1 %v5171_v7  ;;  %v2543_v54 = vld [vmem:[#allocation2 + $0x20] sm:$0xc0] }
 0x7aa   :  { %2805 = vmatprep.subr.bf16.mxu0 %v5174_v26  ;;  %2846 = vmatprep.subr.bf16.mxu1 %v5177_v0 }
 0x7ad   :  { %2806 = vmatpush1.bf16.msra.mxu0 %v5180_v58  ;;  %2847 = vmatpush1.bf16.msra.mxu1 %v5183_v24 }
 0x7ae   :  { %2807 = vmatprep.subr.bf16.mxu0 %v5186_v30  ;;  %2848 = vmatprep.subr.bf16.mxu1 %v5189_v3 }
 0x7b1   :  { %2808 = vmatpush1.bf16.msra.mxu0 %v5192_v61  ;;  %2849 = vmatpush1.bf16.msra.mxu1 %v5195_v14  ;;  %v2545_v14 = vld [vmem:[#allocation2 + $0x38] sm:$0xc0] }
 0x7b2   :  { %2809 = vmatprep.subr.bf16.mxu0 %v5199_v36  ;;  %2850 = vmatprep.subr.bf16.mxu1 %v5202_v39  ;;  %v2544_v39 = vld [vmem:[#allocation2 + $0x28] sm:$0xc0] }
 0x7b5   :  { %2810 = vmatpush1.bf16.msra.mxu0 %v5205_v10  ;;  %2851 = vmatpush1.bf16.msra.mxu1 %v5208_v9 }
 0x7b6   :  { %2811 = vmatprep.subr.bf16.mxu0 %v5211_v25  ;;  %2852 = vmatprep.subr.bf16.mxu1 %v5214_v59 }
 0x7b9   :  { %2812 = vmatpush1.bf16.msra.mxu0 %v5218_v15  ;;  %2853 = vmatpush1.bf16.msra.mxu1 %v5221_v52 }
 0x7ba   :  { %2813 = vmatprep.subr.bf16.mxu0 %v5224_v44  ;;  %2854 = vmatprep.subr.bf16.mxu1 %v5227_v55 }
 0x7bd   :  { %2814 = vmatpush1.bf16.msra.mxu0 %v5230_v60  ;;  %2855 = vmatpush1.bf16.msra.mxu1 %v5233_v13 }
 0x7be   :  { %2815 = vmatprep.subr.bf16.mxu0 %v5236_v8  ;;  %2856 = vmatprep.subr.bf16.mxu1 %v5239_v27  ;;  %v6096_v8 = vld [vmem:[#allocation50_spill] sm:$0xff] }
 0x7bf   :  { %v2668_v27 = vrot.slane %v6096_v8, 6 }
 0x7c1   :  { %2816 = vmatpush2.bf16.msra.mxu0 %v5242_v42  ;;  %2857 = vmatpush2.bf16.msra.mxu1 %v5245_v37 }
 0x7c2   :  { %2817 = vmatprep.subr.bf16.mxu0 %v5248_v41  ;;  %2858 = vmatprep.subr.bf16.mxu1 %v5251_v56 }
 0x7c5   :  { %2818 = vmatpush2.bf16.msra.mxu0 %v5254_v33  ;;  %2859 = vmatpush2.bf16.msra.mxu1 %v5257_v34 }
 0x7c6   :  { %2819 = vmatprep.subr.bf16.mxu0 %v5260_v20  ;;  %2860 = vmatprep.subr.bf16.mxu1 %v5263_v22 }
 0x7c9   :  { %2820 = vmatpush2.bf16.msra.mxu0 %v5266_v45  ;;  %2861 = vmatpush2.bf16.msra.mxu1 %v5269_v2  ;;  %v6097_v2 = vld [vmem:[#allocation55_spill] sm:$0xff] }
 0x7ca   :  { %2821 = vmatprep.subr.bf16.mxu0 %v5272_v5  ;;  %2862 = vmatprep.subr.bf16.mxu1 %v5275_v57 }
 0x7cd   :  { %2822 = vmatpush2.bf16.msra.mxu0 %v5279_v51  ;;  %2863 = vmatpush2.bf16.msra.mxu1 %v5282_v53 }
 0x7ce   :  { %2823 = vmatprep.subr.bf16.mxu0 %v5287_v1  ;;  %2864 = vmatprep.subr.bf16.mxu1 %v5290_v40 }
 0x7d1   :  { %2824 = vmatpush2.bf16.msra.mxu0 %v5294_v6  ;;  %2865 = vmatpush2.bf16.msra.mxu1 %v5297_v46 }
 0x7d2   :  { %2825 = vmatprep.subr.bf16.mxu0 %v5300_v21  ;;  %2866 = vmatprep.subr.bf16.mxu1 %v5303_v43 }
 0x7d5   :  { %2826 = vmatpush2.bf16.msra.mxu0 %v6089_v50  ;;  %2867 = vmatpush2.bf16.msra.mxu1 %v6090_v35  ;;  %v6100_v35 = vld [vmem:[#allocation58_spill] sm:$0xff] }
 0x7d6   :  { %2827 = vmatprep.subr.bf16.mxu0 %v6091_v47  ;;  %2868 = vmatprep.subr.bf16.mxu1 %v6092_v48 }
 0x7d9   :  { %2828 = vmatpush2.bf16.msra.mxu0 %v6093_v4  ;;  %2869 = vmatpush2.bf16.msra.mxu1 %v6094_v63 }
 0x7da   :  { %2829 = vmatprep.subr.bf16.mxu0 %v6095_v17  ;;  %2870 = vmatprep.subr.bf16.mxu1 %v5327_v23 }
 0x7dd   :  { %2830 = vmatpush2.bf16.msra.mxu0 %v5330_v49  ;;  %2871 = vmatpush2.bf16.msra.mxu1 %v5333_v62  ;;  %v6098_v62 = vld [vmem:[#allocation56_spill] sm:$0xff] }
 0x81a   :  { %v2584_v38 = vpop.f32.mrf.mxu0  ;;  %v2625_v18 = vpop.f32.mrf.mxu1 }
 0x81b   :  { %v2636_v28 = vrot.slane %v2584_v38, 2  ;;  %v2638_v61 = vrot.slane %v2625_v18, 2 }
 0x81c   :  { %v2586_v31 = vpop.f32.mrf.mxu0  ;;  %v2627_v32 = vpop.f32.mrf.mxu1 }
 0x81d   :  { %v2644_v12 = vadd.f32 %v2636_v28, %v2542_v29  ;;  %v2637_v19 = vrot.slane %v2586_v31, 2  ;;  %v2639_v3 = vrot.slane %v2627_v32, 2  ;;  %v2646_v10 = vadd.f32 %v2638_v61, %v2544_v39  ;;  %v6101_v32 = vld [vmem:[#allocation51_spill] sm:$0xff] }
 0x81e   :  { %v2588_v7 = vpop.f32.mrf.mxu0  ;;  %v2629_v26 = vpop.f32.mrf.mxu1 }
 0x81f   :  { %v3100_v0 = vmul.f32 -1.442695, %v2644_v12  ;;  %v2645_v58 = vadd.f32 %v2637_v19, %v2543_v54  ;;  %v2647_v36 = vadd.f32 %v2639_v3, %v2545_v14 }
 0x820   :  { %v2589_v24 = vpop.f32.mrf.mxu0  ;;  %v2630_v30 = vpop.f32.mrf.mxu1 }
 0x821   :  { %3518 = vpow2.f32 %v3100_v0  ;;  %v3101_v23 = vmul.f32 -1.442695, %v2645_v58  ;;  %v3102_v9 = vmul.f32 -1.442695, %v2647_v36 }
 0x823   :  { %3520 = vpow2.f32 %v3101_v23 }
 0x824   :  { %3522 = vtanh.f32 %v2646_v10 }
 0x825   :  { %3524 = vpow2.f32 %v3102_v9 }
 0x82e   :  { %v3519_v25 = vpop.eup %3518 }
 0x82f   :  { %v2651_v59 = vadd.f32 1.0, %v3519_v25 }
 0x830   :  { %v3521_v15 = vpop.eup %3520 }
 0x831   :  { %3526 = vrcp.f32 %v2651_v59  ;;  %v2657_v52 = vadd.f32 1.0, %v3521_v15  ;;  %v3523_v44 = vpop.eup %3522 }
 0x832   :  { %v3525_v55 = vpop.eup %3524 }
 0x833   :  { %3528 = vrcp.f32 %v2657_v52  ;;  %v2664_v37 = vadd.f32 1.0, %v3525_v55 }
 0x835   :  { %3530 = vrcp.f32 %v2664_v37 }
 0x83e   :  { %v3527_v60 = vpop.eup %3526 }
 0x83f   :  { %v2671_v13 = vmul.f32 %v3527_v60, %v3523_v44 }
 0x840   :  { %v3529_v42 = vpop.eup %3528 }
 0x841   :  { %v2670_v41 = vmul.f32 %v3529_v42, %v2668_v27 }
 0x842   :  { %v3531_v33 = vpop.eup %3530 }
 0x843   :  { %v2672_v56 = vadd.f32 %v2671_v13, %v2670_v41 }
 0x845   :  { %3532 = vtanh.f32 %v2672_v56 }
 0x852   :  { %v3533_v34 = vpop.eup %3532 }
 0x853   :  { %v2674_v20 = vmul.f32 %v3533_v34, %v3531_v33 }
 0x855   :  { %v2791_v58 = vpack.c.bf16 %v2674_v20, %v2674_v20 }
 0x857   :  { %v2795_v23 = vrot.slane %v2791_v58, 3 }
 0x860   :  { %v2716_v22 = vpop.f32.mrf.mxu0  ;;  %v2757_v45 = vpop.f32.mrf.mxu1 }
 0x861   :  { %v2717_v5 = vadd.f32 %v2716_v22, %v6097_v2  ;;  %v2758_v47 = vadd.f32 %v2757_v45, %v6100_v35 }
 0x862   :  { %v2718_v57 = vpop.f32.mrf.mxu0  ;;  %v2759_v51 = vpop.f32.mrf.mxu1 }
 0x863   :  { %v3103_v53 = vmul.f32 -1.442695, %v2717_v5  ;;  %v2719_v1 = vadd.f32 %v2718_v57, %v6098_v62  ;;  %v2760_v49 = vadd.f32 %v2759_v51, %v6099_v16  ;;  %v3109_v51 = vld [vmem:[%s5424_s6] ss:$0 sm:$0xff] }
 0x864   :  { %v2720_v40 = vpop.f32.mrf.mxu0  ;;  %v2761_v6 = vpop.f32.mrf.mxu1 }
 0x865   :  { %3534 = vpow2.f32 %v3103_v53  ;;  %v3104_v46 = vmul.f32 -1.442695, %v2719_v1  ;;  %v3105_v11 = vmul.f32 -1.442695, %v2760_v49  ;;  %v3110_v40 = vld [vmem:[#allocation3] ss:$0 sm:$0xff] }
 0x866   :  { %v2721_v21 = vpop.f32.mrf.mxu0  ;;  %v2762_v43 = vpop.f32.mrf.mxu1 }
 0x867   :  { %3536 = vpow2.f32 %v3104_v46 }
 0x868   :  { %3538 = vpow2.f32 %v3105_v11 }
 0x872   :  { %v3535_v50 = vpop.eup %3534 }
 0x873   :  { %v2767_v48 = vadd.f32 1.0, %v3535_v50 }
 0x874   :  { %v3537_v4 = vpop.eup %3536 }
 0x875   :  { %3540 = vrcp.f32 %v2767_v48  ;;  %v2773_v63 = vadd.f32 1.0, %v3537_v4  ;;  %v3539_v17 = vpop.eup %3538 }
 0x876   :  { %3542 = vtanh.f32 %v2758_v47  ;;  %v2780_v29 = vadd.f32 1.0, %v3539_v17 }
 0x877   :  { %3544 = vrcp.f32 %v2773_v63 }
 0x878   :  { %3546 = vrcp.f32 %v2780_v29 }
 0x882   :  { %v3541_v38 = vpop.eup %3540 }
 0x883   :  { %v3543_v18 = vpop.eup %3542 }
 0x884   :  { %v3545_v28 = vpop.eup %3544  ;;  %v2784_v31 = vmul.f32 %v3543_v18, %v3541_v38 }
 0x885   :  { %v2783_v12 = vmul.f32 %v3545_v28, %v6101_v32  ;;  %v3547_v54 = vpop.eup %3546 }
 0x887   :  { %v2785_v19 = vadd.f32 %v2784_v31, %v2783_v12 }
 0x889   :  { %3548 = vtanh.f32 %v2785_v19 }
 0x896   :  { %v3549_v7 = vpop.eup %3548 }
 0x897   :  { %v2787_v26 = vmul.f32 %v3549_v7, %v3547_v54 }
 0x899   :  { %v2789_v0 = vrot.slane %v2787_v26, 2 }
 0x89b   :  { %v2792_v24 = vpack.c.bf16 %v2789_v0, %v2789_v0 }
 0x89d   :  { %v2796_v30 = vrot.slane %v2792_v24, 3 }
 0x89f   :  { %2831 = vmatprep.mubr.bf16.mxu0 %v2796_v30  ;;  %2872 = vmatprep.mubr.bf16.mxu1 %v2796_v30 }
 0x8a0   :  { %2832 = vmatmul.mubr.bf16.vlgmr.msra.gmra.mxu0 %v2795_v23  ;;  %2873 = vmatmul.mubr.bf16.vlgmr.msra.gmra.mxu1 %v2795_v23 }
 0x960   :  { %v2833_v3 = vpop.f32.mrf.mxu0  ;;  %v2874_v61 = vpop.f32.mrf.mxu1 }
 0x961   :  { %v2834_v14 = vadd.f32 %v2833_v3, %v6097_v2  ;;  %v2875_v8 = vadd.f32 %v2874_v61, %v6100_v35 }
 0x962   :  { %v2835_v36 = vpop.f32.mrf.mxu0  ;;  %v2876_v39 = vpop.f32.mrf.mxu1 }
 0x963   :  { %v3106_v10 = vmul.f32 -1.442695, %v2834_v14  ;;  %v2836_v9 = vadd.f32 %v2835_v36, %v6098_v62  ;;  %v2877_v55 = vadd.f32 %v2876_v39, %v6099_v16 }
 0x964   :  { %v2837_v25 = vpop.f32.mrf.mxu0  ;;  %v2878_v59 = vpop.f32.mrf.mxu1 }
 0x965   :  { %3550 = vpow2.f32 %v3106_v10  ;;  %v3107_v15 = vmul.f32 -1.442695, %v2836_v9  ;;  %v3108_v60 = vmul.f32 -1.442695, %v2877_v55 }
 0x966   :  { %v2838_v52 = vpop.f32.mrf.mxu0  ;;  %v2879_v44 = vpop.f32.mrf.mxu1 }
 0x967   :  { %3552 = vpow2.f32 %v3107_v15 }
 0x968   :  { %3554 = vpow2.f32 %v3108_v60 }
 0x972   :  { %v3551_v13 = vpop.eup %3550 }
 0x973   :  { %v2884_v27 = vadd.f32 1.0, %v3551_v13 }
 0x974   :  { %v3553_v42 = vpop.eup %3552 }
 0x975   :  { %3556 = vrcp.f32 %v2884_v27  ;;  %v2890_v37 = vadd.f32 1.0, %v3553_v42  ;;  %v3555_v41 = vpop.eup %3554 }
 0x976   :  { %3558 = vtanh.f32 %v2875_v8  ;;  %v2897_v20 = vadd.f32 1.0, %v3555_v41 }
 0x977   :  { %3560 = vrcp.f32 %v2890_v37 }
 0x978   :  { %3562 = vrcp.f32 %v2897_v20 }
 0x982   :  { %v3557_v56 = vpop.eup %3556 }
 0x983   :  { %v3559_v33 = vpop.eup %3558 }
 0x984   :  { %v3561_v34 = vpop.eup %3560  ;;  %v2901_v22 = vmul.f32 %v3559_v33, %v3557_v56 }
 0x985   :  { %v2900_v45 = vmul.f32 %v3561_v34, %v2785_v19  ;;  %v3563_v5 = vpop.eup %3562 }
 0x987   :  { %v2902_v2 = vadd.f32 %v2901_v22, %v2900_v45 }
 0x989   :  { %3564 = vtanh.f32 %v2902_v2 }
 0x996   :  { %v3565_v57 = vpop.eup %3564 }
 0x997   :  { %v2904_v53 = vmul.f32 %v3565_v57, %v3563_v5 }
 0x999   :  { %v2912_v62 = vmul.f32 %v3109_v51, %v2904_v53 }
 0x99b   :  { %v2914_v1 = vsel %vm2913_vm0, %v2912_v62, 0.0 }
 0x99c   :  { %2915 = vadd.xlane.f32.xlu0 %v2914_v1 }
 0xa25   :  { %v2916_v6 = vpop.xlane.xlu0 %2915 }
 0xa26   :  { %v2924_v46 = vadd.f32 %v3110_v40, %v2916_v6 }
 0xa28   :  { %2926 = vst.msk [vmem:[%s5426_s8] sm:$0x3] %vm2925_vm1, %v2924_v46 }
 0xa29   :  { %2931 = vsyncpa [#allocation5], 1 }
 0xa2a   :  { %2932 = vsyncpa [#allocation7], 1 }

</bundles_post_ra>
